<compile_context>
chip_gen: v5e
topology: v5e:2x2
jax: 0.10.0
libtpu: 0.0.40
codegen_flags: <defaults>
</compile_context>

<pallas_src>
import math
import functools

import jax
import jax.numpy as jnp
from jax.experimental import pallas as pl
from jax.experimental.pallas import tpu as pltpu


# rows of the packed per-layer vector slab `vecs`, shape (L, 9, H)
_BQ, _BK, _BV, _BO, _LN1G, _LN1B, _LN2G, _LN2B, _B2 = range(9)


def _mya_vsubnet_kernel(x_ref, pos_ref, wproj_ref, wqkv_ref, wo_ref,
                        w1_ref, w2_ref, vecs_ref, b1_ref, fvec_ref,
                        out_ref, *, L, NH, embed_scale):
    S, H = pos_ref.shape
    HD = H // NH
    scale = HD ** -0.5

    def layer_norm(x, g, b):
        mu = jnp.mean(x, axis=-1, keepdims=True)
        var = jnp.mean((x - mu) ** 2, axis=-1, keepdims=True)
        return (x - mu) * jax.lax.rsqrt(var + 1e-5) * g + b

    # ---- 1x1-conv projection (== matmul), embed scale, positional emb ----
    x = jnp.dot(x_ref[...], wproj_ref[...], preferred_element_type=jnp.float32)
    x = x * embed_scale + pos_ref[...]
    # TODO(synk): dropout layers are identity (inference semantics).

    nt = (((1,), (1,)), ((), ()))      # contract on dim 1: q @ k^T w/o transpose

    for l in range(L):                 # static unroll: all layers, one grid step
        vec = vecs_ref[l]              # (9, H) packed biases / LayerNorm params
        wo_l = wo_ref[l]               # (H, H)

        # --- self-attention block (pre-LN) ---
        residual = x
        xn = layer_norm(x, vec[_LN1G:_LN1G + 1], vec[_LN1B:_LN1B + 1])
        qkv = jnp.dot(xn, wqkv_ref[l], preferred_element_type=jnp.float32)
        q = (qkv[:, 0:H] + vec[_BQ:_BQ + 1]) * scale
        k = qkv[:, H:2 * H] + vec[_BK:_BK + 1]
        v = qkv[:, 2 * H:3 * H] + vec[_BV:_BV + 1]

        acc = jnp.zeros((S, H), jnp.float32)
        for h in range(NH):            # tiny static head loop, no concatenates
            c = slice(h * HD, (h + 1) * HD)
            s = jax.lax.dot_general(q[:, c], k[:, c], nt,
                                    preferred_element_type=jnp.float32)
            s = s - jnp.max(s, axis=-1, keepdims=True)
            p = jnp.exp(s)
            p = p * pl.reciprocal(jnp.sum(p, axis=-1, keepdims=True),
                                  approx=True)
            oh = jnp.dot(p, v[:, c], preferred_element_type=jnp.float32)
            # fuse head merge with the output projection: attn @ Wo == sum_h oh @ Wo[h]
            acc = acc + jnp.dot(oh, wo_l[c, :],
                                preferred_element_type=jnp.float32)
        x = residual + acc + vec[_BO:_BO + 1]

        # --- feed-forward block (pre-LN) ---
        residual = x
        xn = layer_norm(x, vec[_LN2G:_LN2G + 1], vec[_LN2B:_LN2B + 1])
        h1 = jnp.dot(xn, w1_ref[l], preferred_element_type=jnp.float32)
        h1 = jnp.maximum(h1 + b1_ref[l], 0.0)
        h2 = jnp.dot(h1, w2_ref[l], preferred_element_type=jnp.float32)
        x = residual + h2 + vec[_B2:_B2 + 1]

    # ---- final LayerNorm + mean pooling over the sequence ----
    fvec = fvec_ref[...]
    xf = layer_norm(x, fvec[0:1], fvec[1:2])
    out_ref[...] = jnp.mean(xf, axis=0, keepdims=True)


def sinusoidal_pos_emb(S, H, padding_idx=0):
    """fairseq-style sinusoidal positional embedding (sin || cos)."""
    half = H // 2
    freq = jnp.exp(jnp.arange(half, dtype=jnp.float32)
                   * (-math.log(10000.0) / (half - 1)))
    pos = jnp.arange(padding_idx + 1, padding_idx + 1 + S, dtype=jnp.float32)
    ang = pos[:, None] * freq[None, :]
    return jnp.concatenate([jnp.sin(ang), jnp.cos(ang)], axis=1)  # (S, H)


def init_params(key, in_size, hidden, layers, ffn_mult=4):
    ff = ffn_mult * hidden
    ks = jax.random.split(key, 8)
    n = lambda k, shape: (0.02 * jax.random.normal(k, shape)).astype(jnp.float32)
    vecs = jnp.zeros((layers, 9, hidden), jnp.float32)
    vecs = vecs.at[:, _LN1G, :].set(1.0)     # LayerNorm gammas init to 1
    vecs = vecs.at[:, _LN2G, :].set(1.0)
    return {
        "wproj": n(ks[0], (in_size, hidden)),
        "wqkv": n(ks[1], (layers, hidden, 3 * hidden)),   # fused Q|K|V
        "wo": n(ks[2], (layers, hidden, hidden)),
        "w1": n(ks[3], (layers, hidden, ff)),
        "w2": n(ks[4], (layers, ff, hidden)),
        "vecs": vecs,                         # [bq,bk,bv,bo,ln1g,ln1b,ln2g,ln2b,b2]
        "b1": jnp.zeros((layers, 1, ff), jnp.float32),
        "fvec": jnp.concatenate([jnp.ones((1, hidden), jnp.float32),
                                 jnp.zeros((1, hidden), jnp.float32)], axis=0),
    }


def my_av_subnet(x, params, num_heads=4):
    """x: (B, S, in_size) float32  ->  (B, hidden) float32 (mean-pooled)."""
    B, S, IN = x.shape
    H = params["wproj"].shape[1]
    L = params["wqkv"].shape[0]
    FF = params["w1"].shape[2]
    assert H % num_heads == 0

    pos = sinusoidal_pos_emb(S, H)

    const2 = lambda shape: pl.BlockSpec(shape, lambda b: (0, 0))
    const3 = lambda shape: pl.BlockSpec(shape, lambda b: (0, 0, 0))

    grid_spec = pltpu.PrefetchScalarGridSpec(
        num_scalar_prefetch=0,
        grid=(B,),                                   # batch axis only ("parallel")
        in_specs=[
            pl.BlockSpec((None, S, IN), lambda b: (b, 0, 0)),  # x, per-batch slab
            const2((S, H)),              # pos
            const2((IN, H)),             # wproj
            const3((L, H, 3 * H)),       # fused wqkv (all layers resident)
            const3((L, H, H)),           # wo
            const3((L, H, FF)),          # w1
            const3((L, FF, H)),          # w2
            const3((L, 9, H)),           # packed per-layer biases / LN params
            const3((L, 1, FF)),          # b1
            const2((2, H)),              # final LN gamma/beta
        ],
        out_specs=pl.BlockSpec((None, 1, H), lambda b: (b, 0, 0)),
    )

    kernel = functools.partial(_mya_vsubnet_kernel, L=L, NH=num_heads,
                               embed_scale=math.sqrt(H))

    out = pl.pallas_call(
        kernel,
        out_shape=jax.ShapeDtypeStruct((B, 1, H), jnp.float32),
        grid_spec=grid_spec,
        compiler_params=pltpu.CompilerParams(
            dimension_semantics=("parallel",)),      # 2nd TC on v7x; no-op v5e/v6e
    )(x.astype(jnp.float32), pos, params["wproj"], params["wqkv"],
      params["wo"], params["w1"], params["w2"], params["vecs"],
      params["b1"], params["fvec"])
    return out.reshape(B, H)


if __name__ == "__main__":
    B, S, IN, H, NH, L = 2, 8, 20, 32, 4, 6
    key = jax.random.PRNGKey(0)
    kx, kp = jax.random.split(key)
    x = jax.random.normal(kx, (B, S, IN), dtype=jnp.float32)
    params = init_params(kp, IN, H, L)

    out = my_av_subnet(x, params, num_heads=NH)
    out = jax.block_until_ready(out)
    assert out.shape == (B, H) and out.dtype == jnp.float32
    print("KERNEL_OK")
</pallas_src>

<mosaic_0001>
module attributes {stable_mosaic.version = 11 : i64} {
  func.func @_mya_vsubnet_kernel(%arg0: i32, %arg1: memref<1x8x20xf32, #tpu.memory_space<vmem>>, %arg2: memref<8x32xf32, #tpu.memory_space<vmem>>, %arg3: memref<20x32xf32, #tpu.memory_space<vmem>>, %arg4: memref<6x32x96xf32, #tpu.memory_space<vmem>>, %arg5: memref<6x32x32xf32, #tpu.memory_space<vmem>>, %arg6: memref<6x32x128xf32, #tpu.memory_space<vmem>>, %arg7: memref<6x128x32xf32, #tpu.memory_space<vmem>>, %arg8: memref<6x9x32xf32, #tpu.memory_space<vmem>>, %arg9: memref<6x1x128xf32, #tpu.memory_space<vmem>>, %arg10: memref<2x32xf32, #tpu.memory_space<vmem>>, %arg11: memref<1x1x32xf32, #tpu.memory_space<vmem>>) attributes {dimension_semantics = [#tpu.dimension_semantics<parallel>], iteration_bounds = array<i64: 2>, scalar_prefetch = 0 : i64, scratch_operands = 0 : i64, tpu.core_type = #tpu.core_type<tc>, window_params = [{transform_indices = @transform_0, window_bounds = array<i64: 1, 8, 20>}, {pipeline_mode = #tpu.pipeline_mode<synchronous>, transform_indices = @transform_1, window_bounds = array<i64: 8, 32>}, {pipeline_mode = #tpu.pipeline_mode<synchronous>, transform_indices = @transform_2, window_bounds = array<i64: 20, 32>}, {pipeline_mode = #tpu.pipeline_mode<synchronous>, transform_indices = @transform_3, window_bounds = array<i64: 6, 32, 96>}, {pipeline_mode = #tpu.pipeline_mode<synchronous>, transform_indices = @transform_4, window_bounds = array<i64: 6, 32, 32>}, {pipeline_mode = #tpu.pipeline_mode<synchronous>, transform_indices = @transform_5, window_bounds = array<i64: 6, 32, 128>}, {pipeline_mode = #tpu.pipeline_mode<synchronous>, transform_indices = @transform_6, window_bounds = array<i64: 6, 128, 32>}, {pipeline_mode = #tpu.pipeline_mode<synchronous>, transform_indices = @transform_7, window_bounds = array<i64: 6, 9, 32>}, {pipeline_mode = #tpu.pipeline_mode<synchronous>, transform_indices = @transform_8, window_bounds = array<i64: 6, 1, 128>}, {pipeline_mode = #tpu.pipeline_mode<synchronous>, transform_indices = @transform_9, window_bounds = array<i64: 2, 32>}, {transform_indices = @transform_10, window_bounds = array<i64: 1, 1, 32>}]} {
    %c0 = arith.constant 0 : index
    %c0_0 = arith.constant 0 : index
    %c0_1 = arith.constant 0 : index
    %0 = vector.load %arg1[%c0, %c0_0, %c0_1] : memref<1x8x20xf32, #tpu.memory_space<vmem>>, vector<1x8x20xf32>
    %1 = vector.shape_cast %0 : vector<1x8x20xf32> to vector<8x20xf32>
    %c0_2 = arith.constant 0 : index
    %c0_3 = arith.constant 0 : index
    %2 = vector.load %arg3[%c0_2, %c0_3] : memref<20x32xf32, #tpu.memory_space<vmem>>, vector<20x32xf32>
    %cst = arith.constant dense<0.000000e+00> : vector<8x32xf32>
    %3 = tpu.matmul %1, %2, %cst {dimension_numbers = #tpu.dot_dimension_numbers<[1], [0], [0], [1], [0, 0, 1, 1], [], []>} : vector<8x20xf32>, vector<20x32xf32>, vector<8x32xf32> -> vector<8x32xf32>
    %cst_4 = arith.constant 5.65685415 : f32
    %4 = vector.broadcast %cst_4 : f32 to vector<8x32xf32>
    %5 = arith.mulf %3, %4 : vector<8x32xf32>
    %c0_5 = arith.constant 0 : index
    %c0_6 = arith.constant 0 : index
    %6 = vector.load %arg2[%c0_5, %c0_6] : memref<8x32xf32, #tpu.memory_space<vmem>>, vector<8x32xf32>
    %7 = arith.addf %5, %6 : vector<8x32xf32>
    %c0_7 = arith.constant 0 : index
    %c0_8 = arith.constant 0 : index
    %c0_9 = arith.constant 0 : index
    %8 = vector.load %arg8[%c0_7, %c0_8, %c0_9] : memref<6x9x32xf32, #tpu.memory_space<vmem>>, vector<1x9x32xf32>
    %9 = vector.shape_cast %8 : vector<1x9x32xf32> to vector<9x32xf32>
    %c0_10 = arith.constant 0 : index
    %c0_11 = arith.constant 0 : index
    %c0_12 = arith.constant 0 : index
    %10 = vector.load %arg5[%c0_10, %c0_11, %c0_12] : memref<6x32x32xf32, #tpu.memory_space<vmem>>, vector<1x32x32xf32>
    %11 = vector.shape_cast %10 : vector<1x32x32xf32> to vector<32x32xf32>
    %12 = vector.extract_strided_slice %9 {offsets = [4, 0], sizes = [1, 32], strides = [1, 1]} : vector<9x32xf32> to vector<1x32xf32>
    %13 = vector.extract_strided_slice %9 {offsets = [5, 0], sizes = [1, 32], strides = [1, 1]} : vector<9x32xf32> to vector<1x32xf32>
    %cst_13 = arith.constant dense<0.000000e+00> : vector<8xf32>
    %14 = vector.multi_reduction <add>, %7, %cst_13 [1] : vector<8x32xf32> to vector<8xf32>
    %15 = vector.shape_cast %14 : vector<8xf32> to vector<8x1xf32>
    %cst_14 = arith.constant 3.200000e+01 : f32
    %16 = vector.broadcast %cst_14 : f32 to vector<8x1xf32>
    %17 = arith.divf %15, %16 : vector<8x1xf32>
    %18 = vector.broadcast %17 : vector<8x1xf32> to vector<8x32xf32>
    %19 = arith.subf %7, %18 : vector<8x32xf32>
    %20 = arith.mulf %19, %19 : vector<8x32xf32>
    %cst_15 = arith.constant dense<0.000000e+00> : vector<8xf32>
    %21 = vector.multi_reduction <add>, %20, %cst_15 [1] : vector<8x32xf32> to vector<8xf32>
    %22 = vector.shape_cast %21 : vector<8xf32> to vector<8x1xf32>
    %cst_16 = arith.constant 3.200000e+01 : f32
    %23 = vector.broadcast %cst_16 : f32 to vector<8x1xf32>
    %24 = arith.divf %22, %23 : vector<8x1xf32>
    %25 = vector.broadcast %17 : vector<8x1xf32> to vector<8x32xf32>
    %26 = arith.subf %7, %25 : vector<8x32xf32>
    %cst_17 = arith.constant 9.99999974E-6 : f32
    %27 = vector.broadcast %cst_17 : f32 to vector<8x1xf32>
    %28 = arith.addf %24, %27 : vector<8x1xf32>
    %29 = math.rsqrt %28 : vector<8x1xf32>
    %30 = vector.broadcast %29 : vector<8x1xf32> to vector<8x32xf32>
    %31 = arith.mulf %26, %30 : vector<8x32xf32>
    %32 = vector.broadcast %12 : vector<1x32xf32> to vector<8x32xf32>
    %33 = arith.mulf %31, %32 : vector<8x32xf32>
    %34 = vector.broadcast %13 : vector<1x32xf32> to vector<8x32xf32>
    %35 = arith.addf %33, %34 : vector<8x32xf32>
    %c0_18 = arith.constant 0 : index
    %c0_19 = arith.constant 0 : index
    %c0_20 = arith.constant 0 : index
    %36 = vector.load %arg4[%c0_18, %c0_19, %c0_20] : memref<6x32x96xf32, #tpu.memory_space<vmem>>, vector<1x32x96xf32>
    %37 = vector.shape_cast %36 : vector<1x32x96xf32> to vector<32x96xf32>
    %cst_21 = arith.constant dense<0.000000e+00> : vector<8x96xf32>
    %38 = tpu.matmul %35, %37, %cst_21 {dimension_numbers = #tpu.dot_dimension_numbers<[1], [0], [0], [1], [0, 0, 1, 1], [], []>} : vector<8x32xf32>, vector<32x96xf32>, vector<8x96xf32> -> vector<8x96xf32>
    %39 = vector.extract_strided_slice %38 {offsets = [0, 0], sizes = [8, 32], strides = [1, 1]} : vector<8x96xf32> to vector<8x32xf32>
    %40 = vector.extract_strided_slice %9 {offsets = [0, 0], sizes = [1, 32], strides = [1, 1]} : vector<9x32xf32> to vector<1x32xf32>
    %41 = vector.broadcast %40 : vector<1x32xf32> to vector<8x32xf32>
    %42 = arith.addf %39, %41 : vector<8x32xf32>
    %cst_22 = arith.constant 0.353553385 : f32
    %43 = vector.broadcast %cst_22 : f32 to vector<8x32xf32>
    %44 = arith.mulf %42, %43 : vector<8x32xf32>
    %45 = vector.extract_strided_slice %38 {offsets = [0, 32], sizes = [8, 32], strides = [1, 1]} : vector<8x96xf32> to vector<8x32xf32>
    %46 = vector.extract_strided_slice %9 {offsets = [1, 0], sizes = [1, 32], strides = [1, 1]} : vector<9x32xf32> to vector<1x32xf32>
    %47 = vector.broadcast %46 : vector<1x32xf32> to vector<8x32xf32>
    %48 = arith.addf %45, %47 : vector<8x32xf32>
    %49 = vector.extract_strided_slice %38 {offsets = [0, 64], sizes = [8, 32], strides = [1, 1]} : vector<8x96xf32> to vector<8x32xf32>
    %50 = vector.extract_strided_slice %9 {offsets = [2, 0], sizes = [1, 32], strides = [1, 1]} : vector<9x32xf32> to vector<1x32xf32>
    %51 = vector.broadcast %50 : vector<1x32xf32> to vector<8x32xf32>
    %52 = arith.addf %49, %51 : vector<8x32xf32>
    %cst_23 = arith.constant 0.000000e+00 : f32
    %53 = vector.broadcast %cst_23 : f32 to vector<8x32xf32>
    %54 = vector.extract_strided_slice %44 {offsets = [0, 0], sizes = [8, 8], strides = [1, 1]} : vector<8x32xf32> to vector<8x8xf32>
    %55 = vector.extract_strided_slice %48 {offsets = [0, 0], sizes = [8, 8], strides = [1, 1]} : vector<8x32xf32> to vector<8x8xf32>
    %cst_24 = arith.constant dense<0.000000e+00> : vector<8x8xf32>
    %56 = tpu.matmul %54, %55, %cst_24 {dimension_numbers = #tpu.dot_dimension_numbers<[1], [1], [0], [0], [0, 0, 1, 0], [], []>} : vector<8x8xf32>, vector<8x8xf32>, vector<8x8xf32> -> vector<8x8xf32>
    %cst_25 = arith.constant dense<0xFF800000> : vector<8xf32>
    %57 = vector.multi_reduction <maximumf>, %56, %cst_25 [1] : vector<8x8xf32> to vector<8xf32>
    %58 = vector.shape_cast %57 : vector<8xf32> to vector<8x1xf32>
    %59 = vector.broadcast %58 : vector<8x1xf32> to vector<8x8xf32>
    %60 = arith.subf %56, %59 : vector<8x8xf32>
    %61 = math.exp %60 : vector<8x8xf32>
    %cst_26 = arith.constant dense<0.000000e+00> : vector<8xf32>
    %62 = vector.multi_reduction <add>, %61, %cst_26 [1] : vector<8x8xf32> to vector<8xf32>
    %63 = vector.shape_cast %62 : vector<8xf32> to vector<8x1xf32>
    %64 = tpu.reciprocal %63 {approx = true} : vector<8x1xf32> -> vector<8x1xf32>
    %65 = vector.broadcast %64 : vector<8x1xf32> to vector<8x8xf32>
    %66 = arith.mulf %61, %65 : vector<8x8xf32>
    %67 = vector.extract_strided_slice %52 {offsets = [0, 0], sizes = [8, 8], strides = [1, 1]} : vector<8x32xf32> to vector<8x8xf32>
    %cst_27 = arith.constant dense<0.000000e+00> : vector<8x8xf32>
    %68 = tpu.matmul %66, %67, %cst_27 {dimension_numbers = #tpu.dot_dimension_numbers<[1], [0], [0], [1], [0, 0, 1, 1], [], []>} : vector<8x8xf32>, vector<8x8xf32>, vector<8x8xf32> -> vector<8x8xf32>
    %69 = vector.extract_strided_slice %11 {offsets = [0, 0], sizes = [8, 32], strides = [1, 1]} : vector<32x32xf32> to vector<8x32xf32>
    %cst_28 = arith.constant dense<0.000000e+00> : vector<8x32xf32>
    %70 = tpu.matmul %68, %69, %cst_28 {dimension_numbers = #tpu.dot_dimension_numbers<[1], [0], [0], [1], [0, 0, 1, 1], [], []>} : vector<8x8xf32>, vector<8x32xf32>, vector<8x32xf32> -> vector<8x32xf32>
    %71 = arith.addf %53, %70 : vector<8x32xf32>
    %72 = vector.extract_strided_slice %44 {offsets = [0, 8], sizes = [8, 8], strides = [1, 1]} : vector<8x32xf32> to vector<8x8xf32>
    %73 = vector.extract_strided_slice %48 {offsets = [0, 8], sizes = [8, 8], strides = [1, 1]} : vector<8x32xf32> to vector<8x8xf32>
    %cst_29 = arith.constant dense<0.000000e+00> : vector<8x8xf32>
    %74 = tpu.matmul %72, %73, %cst_29 {dimension_numbers = #tpu.dot_dimension_numbers<[1], [1], [0], [0], [0, 0, 1, 0], [], []>} : vector<8x8xf32>, vector<8x8xf32>, vector<8x8xf32> -> vector<8x8xf32>
    %cst_30 = arith.constant dense<0xFF800000> : vector<8xf32>
    %75 = vector.multi_reduction <maximumf>, %74, %cst_30 [1] : vector<8x8xf32> to vector<8xf32>
    %76 = vector.shape_cast %75 : vector<8xf32> to vector<8x1xf32>
    %77 = vector.broadcast %76 : vector<8x1xf32> to vector<8x8xf32>
    %78 = arith.subf %74, %77 : vector<8x8xf32>
    %79 = math.exp %78 : vector<8x8xf32>
    %cst_31 = arith.constant dense<0.000000e+00> : vector<8xf32>
    %80 = vector.multi_reduction <add>, %79, %cst_31 [1] : vector<8x8xf32> to vector<8xf32>
    %81 = vector.shape_cast %80 : vector<8xf32> to vector<8x1xf32>
    %82 = tpu.reciprocal %81 {approx = true} : vector<8x1xf32> -> vector<8x1xf32>
    %83 = vector.broadcast %82 : vector<8x1xf32> to vector<8x8xf32>
    %84 = arith.mulf %79, %83 : vector<8x8xf32>
    %85 = vector.extract_strided_slice %52 {offsets = [0, 8], sizes = [8, 8], strides = [1, 1]} : vector<8x32xf32> to vector<8x8xf32>
    %cst_32 = arith.constant dense<0.000000e+00> : vector<8x8xf32>
    %86 = tpu.matmul %84, %85, %cst_32 {dimension_numbers = #tpu.dot_dimension_numbers<[1], [0], [0], [1], [0, 0, 1, 1], [], []>} : vector<8x8xf32>, vector<8x8xf32>, vector<8x8xf32> -> vector<8x8xf32>
    %87 = vector.extract_strided_slice %11 {offsets = [8, 0], sizes = [8, 32], strides = [1, 1]} : vector<32x32xf32> to vector<8x32xf32>
    %cst_33 = arith.constant dense<0.000000e+00> : vector<8x32xf32>
    %88 = tpu.matmul %86, %87, %cst_33 {dimension_numbers = #tpu.dot_dimension_numbers<[1], [0], [0], [1], [0, 0, 1, 1], [], []>} : vector<8x8xf32>, vector<8x32xf32>, vector<8x32xf32> -> vector<8x32xf32>
    %89 = arith.addf %71, %88 : vector<8x32xf32>
    %90 = vector.extract_strided_slice %44 {offsets = [0, 16], sizes = [8, 8], strides = [1, 1]} : vector<8x32xf32> to vector<8x8xf32>
    %91 = vector.extract_strided_slice %48 {offsets = [0, 16], sizes = [8, 8], strides = [1, 1]} : vector<8x32xf32> to vector<8x8xf32>
    %cst_34 = arith.constant dense<0.000000e+00> : vector<8x8xf32>
    %92 = tpu.matmul %90, %91, %cst_34 {dimension_numbers = #tpu.dot_dimension_numbers<[1], [1], [0], [0], [0, 0, 1, 0], [], []>} : vector<8x8xf32>, vector<8x8xf32>, vector<8x8xf32> -> vector<8x8xf32>
    %cst_35 = arith.constant dense<0xFF800000> : vector<8xf32>
    %93 = vector.multi_reduction <maximumf>, %92, %cst_35 [1] : vector<8x8xf32> to vector<8xf32>
    %94 = vector.shape_cast %93 : vector<8xf32> to vector<8x1xf32>
    %95 = vector.broadcast %94 : vector<8x1xf32> to vector<8x8xf32>
    %96 = arith.subf %92, %95 : vector<8x8xf32>
    %97 = math.exp %96 : vector<8x8xf32>
    %cst_36 = arith.constant dense<0.000000e+00> : vector<8xf32>
    %98 = vector.multi_reduction <add>, %97, %cst_36 [1] : vector<8x8xf32> to vector<8xf32>
    %99 = vector.shape_cast %98 : vector<8xf32> to vector<8x1xf32>
    %100 = tpu.reciprocal %99 {approx = true} : vector<8x1xf32> -> vector<8x1xf32>
    %101 = vector.broadcast %100 : vector<8x1xf32> to vector<8x8xf32>
    %102 = arith.mulf %97, %101 : vector<8x8xf32>
    %103 = vector.extract_strided_slice %52 {offsets = [0, 16], sizes = [8, 8], strides = [1, 1]} : vector<8x32xf32> to vector<8x8xf32>
    %cst_37 = arith.constant dense<0.000000e+00> : vector<8x8xf32>
    %104 = tpu.matmul %102, %103, %cst_37 {dimension_numbers = #tpu.dot_dimension_numbers<[1], [0], [0], [1], [0, 0, 1, 1], [], []>} : vector<8x8xf32>, vector<8x8xf32>, vector<8x8xf32> -> vector<8x8xf32>
    %105 = vector.extract_strided_slice %11 {offsets = [16, 0], sizes = [8, 32], strides = [1, 1]} : vector<32x32xf32> to vector<8x32xf32>
    %cst_38 = arith.constant dense<0.000000e+00> : vector<8x32xf32>
    %106 = tpu.matmul %104, %105, %cst_38 {dimension_numbers = #tpu.dot_dimension_numbers<[1], [0], [0], [1], [0, 0, 1, 1], [], []>} : vector<8x8xf32>, vector<8x32xf32>, vector<8x32xf32> -> vector<8x32xf32>
    %107 = arith.addf %89, %106 : vector<8x32xf32>
    %108 = vector.extract_strided_slice %44 {offsets = [0, 24], sizes = [8, 8], strides = [1, 1]} : vector<8x32xf32> to vector<8x8xf32>
    %109 = vector.extract_strided_slice %48 {offsets = [0, 24], sizes = [8, 8], strides = [1, 1]} : vector<8x32xf32> to vector<8x8xf32>
    %cst_39 = arith.constant dense<0.000000e+00> : vector<8x8xf32>
    %110 = tpu.matmul %108, %109, %cst_39 {dimension_numbers = #tpu.dot_dimension_numbers<[1], [1], [0], [0], [0, 0, 1, 0], [], []>} : vector<8x8xf32>, vector<8x8xf32>, vector<8x8xf32> -> vector<8x8xf32>
    %cst_40 = arith.constant dense<0xFF800000> : vector<8xf32>
    %111 = vector.multi_reduction <maximumf>, %110, %cst_40 [1] : vector<8x8xf32> to vector<8xf32>
    %112 = vector.shape_cast %111 : vector<8xf32> to vector<8x1xf32>
    %113 = vector.broadcast %112 : vector<8x1xf32> to vector<8x8xf32>
    %114 = arith.subf %110, %113 : vector<8x8xf32>
    %115 = math.exp %114 : vector<8x8xf32>
    %cst_41 = arith.constant dense<0.000000e+00> : vector<8xf32>
    %116 = vector.multi_reduction <add>, %115, %cst_41 [1] : vector<8x8xf32> to vector<8xf32>
    %117 = vector.shape_cast %116 : vector<8xf32> to vector<8x1xf32>
    %118 = tpu.reciprocal %117 {approx = true} : vector<8x1xf32> -> vector<8x1xf32>
    %119 = vector.broadcast %118 : vector<8x1xf32> to vector<8x8xf32>
    %120 = arith.mulf %115, %119 : vector<8x8xf32>
    %121 = vector.extract_strided_slice %52 {offsets = [0, 24], sizes = [8, 8], strides = [1, 1]} : vector<8x32xf32> to vector<8x8xf32>
    %cst_42 = arith.constant dense<0.000000e+00> : vector<8x8xf32>
    %122 = tpu.matmul %120, %121, %cst_42 {dimension_numbers = #tpu.dot_dimension_numbers<[1], [0], [0], [1], [0, 0, 1, 1], [], []>} : vector<8x8xf32>, vector<8x8xf32>, vector<8x8xf32> -> vector<8x8xf32>
    %123 = vector.extract_strided_slice %11 {offsets = [24, 0], sizes = [8, 32], strides = [1, 1]} : vector<32x32xf32> to vector<8x32xf32>
    %cst_43 = arith.constant dense<0.000000e+00> : vector<8x32xf32>
    %124 = tpu.matmul %122, %123, %cst_43 {dimension_numbers = #tpu.dot_dimension_numbers<[1], [0], [0], [1], [0, 0, 1, 1], [], []>} : vector<8x8xf32>, vector<8x32xf32>, vector<8x32xf32> -> vector<8x32xf32>
    %125 = arith.addf %107, %124 : vector<8x32xf32>
    %126 = arith.addf %7, %125 : vector<8x32xf32>
    %127 = vector.extract_strided_slice %9 {offsets = [3, 0], sizes = [1, 32], strides = [1, 1]} : vector<9x32xf32> to vector<1x32xf32>
    %128 = vector.broadcast %127 : vector<1x32xf32> to vector<8x32xf32>
    %129 = arith.addf %126, %128 : vector<8x32xf32>
    %130 = vector.extract_strided_slice %9 {offsets = [6, 0], sizes = [1, 32], strides = [1, 1]} : vector<9x32xf32> to vector<1x32xf32>
    %131 = vector.extract_strided_slice %9 {offsets = [7, 0], sizes = [1, 32], strides = [1, 1]} : vector<9x32xf32> to vector<1x32xf32>
    %cst_44 = arith.constant dense<0.000000e+00> : vector<8xf32>
    %132 = vector.multi_reduction <add>, %129, %cst_44 [1] : vector<8x32xf32> to vector<8xf32>
    %133 = vector.shape_cast %132 : vector<8xf32> to vector<8x1xf32>
    %cst_45 = arith.constant 3.200000e+01 : f32
    %134 = vector.broadcast %cst_45 : f32 to vector<8x1xf32>
    %135 = arith.divf %133, %134 : vector<8x1xf32>
    %136 = vector.broadcast %135 : vector<8x1xf32> to vector<8x32xf32>
    %137 = arith.subf %129, %136 : vector<8x32xf32>
    %138 = arith.mulf %137, %137 : vector<8x32xf32>
    %cst_46 = arith.constant dense<0.000000e+00> : vector<8xf32>
    %139 = vector.multi_reduction <add>, %138, %cst_46 [1] : vector<8x32xf32> to vector<8xf32>
    %140 = vector.shape_cast %139 : vector<8xf32> to vector<8x1xf32>
    %cst_47 = arith.constant 3.200000e+01 : f32
    %141 = vector.broadcast %cst_47 : f32 to vector<8x1xf32>
    %142 = arith.divf %140, %141 : vector<8x1xf32>
    %143 = vector.broadcast %135 : vector<8x1xf32> to vector<8x32xf32>
    %144 = arith.subf %129, %143 : vector<8x32xf32>
    %cst_48 = arith.constant 9.99999974E-6 : f32
    %145 = vector.broadcast %cst_48 : f32 to vector<8x1xf32>
    %146 = arith.addf %142, %145 : vector<8x1xf32>
    %147 = math.rsqrt %146 : vector<8x1xf32>
    %148 = vector.broadcast %147 : vector<8x1xf32> to vector<8x32xf32>
    %149 = arith.mulf %144, %148 : vector<8x32xf32>
    %150 = vector.broadcast %130 : vector<1x32xf32> to vector<8x32xf32>
    %151 = arith.mulf %149, %150 : vector<8x32xf32>
    %152 = vector.broadcast %131 : vector<1x32xf32> to vector<8x32xf32>
    %153 = arith.addf %151, %152 : vector<8x32xf32>
    %c0_49 = arith.constant 0 : index
    %c0_50 = arith.constant 0 : index
    %c0_51 = arith.constant 0 : index
    %154 = vector.load %arg6[%c0_49, %c0_50, %c0_51] : memref<6x32x128xf32, #tpu.memory_space<vmem>>, vector<1x32x128xf32>
    %155 = vector.shape_cast %154 : vector<1x32x128xf32> to vector<32x128xf32>
    %cst_52 = arith.constant dense<0.000000e+00> : vector<8x128xf32>
    %156 = tpu.matmul %153, %155, %cst_52 {dimension_numbers = #tpu.dot_dimension_numbers<[1], [0], [0], [1], [0, 0, 1, 1], [], []>} : vector<8x32xf32>, vector<32x128xf32>, vector<8x128xf32> -> vector<8x128xf32>
    %c0_53 = arith.constant 0 : index
    %c0_54 = arith.constant 0 : index
    %c0_55 = arith.constant 0 : index
    %157 = vector.load %arg9[%c0_53, %c0_54, %c0_55] : memref<6x1x128xf32, #tpu.memory_space<vmem>>, vector<1x1x128xf32>
    %158 = vector.shape_cast %157 : vector<1x1x128xf32> to vector<1x128xf32>
    %159 = vector.broadcast %158 : vector<1x128xf32> to vector<8x128xf32>
    %160 = arith.addf %156, %159 : vector<8x128xf32>
    %cst_56 = arith.constant 0.000000e+00 : f32
    %161 = vector.broadcast %cst_56 : f32 to vector<8x128xf32>
    %162 = arith.maximumf %160, %161 : vector<8x128xf32>
    %c0_57 = arith.constant 0 : index
    %c0_58 = arith.constant 0 : index
    %c0_59 = arith.constant 0 : index
    %163 = vector.load %arg7[%c0_57, %c0_58, %c0_59] : memref<6x128x32xf32, #tpu.memory_space<vmem>>, vector<1x128x32xf32>
    %164 = vector.shape_cast %163 : vector<1x128x32xf32> to vector<128x32xf32>
    %cst_60 = arith.constant dense<0.000000e+00> : vector<8x32xf32>
    %165 = tpu.matmul %162, %164, %cst_60 {dimension_numbers = #tpu.dot_dimension_numbers<[1], [0], [0], [1], [0, 0, 1, 1], [], []>} : vector<8x128xf32>, vector<128x32xf32>, vector<8x32xf32> -> vector<8x32xf32>
    %166 = arith.addf %129, %165 : vector<8x32xf32>
    %167 = vector.extract_strided_slice %9 {offsets = [8, 0], sizes = [1, 32], strides = [1, 1]} : vector<9x32xf32> to vector<1x32xf32>
    %168 = vector.broadcast %167 : vector<1x32xf32> to vector<8x32xf32>
    %169 = arith.addf %166, %168 : vector<8x32xf32>
    %c1 = arith.constant 1 : index
    %c0_61 = arith.constant 0 : index
    %c0_62 = arith.constant 0 : index
    %170 = vector.load %arg8[%c1, %c0_61, %c0_62] : memref<6x9x32xf32, #tpu.memory_space<vmem>>, vector<1x9x32xf32>
    %171 = vector.shape_cast %170 : vector<1x9x32xf32> to vector<9x32xf32>
    %c1_63 = arith.constant 1 : index
    %c0_64 = arith.constant 0 : index
    %c0_65 = arith.constant 0 : index
    %172 = vector.load %arg5[%c1_63, %c0_64, %c0_65] : memref<6x32x32xf32, #tpu.memory_space<vmem>>, vector<1x32x32xf32>
    %173 = vector.shape_cast %172 : vector<1x32x32xf32> to vector<32x32xf32>
    %174 = vector.extract_strided_slice %171 {offsets = [4, 0], sizes = [1, 32], strides = [1, 1]} : vector<9x32xf32> to vector<1x32xf32>
    %175 = vector.extract_strided_slice %171 {offsets = [5, 0], sizes = [1, 32], strides = [1, 1]} : vector<9x32xf32> to vector<1x32xf32>
    %cst_66 = arith.constant dense<0.000000e+00> : vector<8xf32>
    %176 = vector.multi_reduction <add>, %169, %cst_66 [1] : vector<8x32xf32> to vector<8xf32>
    %177 = vector.shape_cast %176 : vector<8xf32> to vector<8x1xf32>
    %cst_67 = arith.constant 3.200000e+01 : f32
    %178 = vector.broadcast %cst_67 : f32 to vector<8x1xf32>
    %179 = arith.divf %177, %178 : vector<8x1xf32>
    %180 = vector.broadcast %179 : vector<8x1xf32> to vector<8x32xf32>
    %181 = arith.subf %169, %180 : vector<8x32xf32>
    %182 = arith.mulf %181, %181 : vector<8x32xf32>
    %cst_68 = arith.constant dense<0.000000e+00> : vector<8xf32>
    %183 = vector.multi_reduction <add>, %182, %cst_68 [1] : vector<8x32xf32> to vector<8xf32>
    %184 = vector.shape_cast %183 : vector<8xf32> to vector<8x1xf32>
    %cst_69 = arith.constant 3.200000e+01 : f32
    %185 = vector.broadcast %cst_69 : f32 to vector<8x1xf32>
    %186 = arith.divf %184, %185 : vector<8x1xf32>
    %187 = vector.broadcast %179 : vector<8x1xf32> to vector<8x32xf32>
    %188 = arith.subf %169, %187 : vector<8x32xf32>
    %cst_70 = arith.constant 9.99999974E-6 : f32
    %189 = vector.broadcast %cst_70 : f32 to vector<8x1xf32>
    %190 = arith.addf %186, %189 : vector<8x1xf32>
    %191 = math.rsqrt %190 : vector<8x1xf32>
    %192 = vector.broadcast %191 : vector<8x1xf32> to vector<8x32xf32>
    %193 = arith.mulf %188, %192 : vector<8x32xf32>
    %194 = vector.broadcast %174 : vector<1x32xf32> to vector<8x32xf32>
    %195 = arith.mulf %193, %194 : vector<8x32xf32>
    %196 = vector.broadcast %175 : vector<1x32xf32> to vector<8x32xf32>
    %197 = arith.addf %195, %196 : vector<8x32xf32>
    %c1_71 = arith.constant 1 : index
    %c0_72 = arith.constant 0 : index
    %c0_73 = arith.constant 0 : index
    %198 = vector.load %arg4[%c1_71, %c0_72, %c0_73] : memref<6x32x96xf32, #tpu.memory_space<vmem>>, vector<1x32x96xf32>
    %199 = vector.shape_cast %198 : vector<1x32x96xf32> to vector<32x96xf32>
    %cst_74 = arith.constant dense<0.000000e+00> : vector<8x96xf32>
    %200 = tpu.matmul %197, %199, %cst_74 {dimension_numbers = #tpu.dot_dimension_numbers<[1], [0], [0], [1], [0, 0, 1, 1], [], []>} : vector<8x32xf32>, vector<32x96xf32>, vector<8x96xf32> -> vector<8x96xf32>
    %201 = vector.extract_strided_slice %200 {offsets = [0, 0], sizes = [8, 32], strides = [1, 1]} : vector<8x96xf32> to vector<8x32xf32>
    %202 = vector.extract_strided_slice %171 {offsets = [0, 0], sizes = [1, 32], strides = [1, 1]} : vector<9x32xf32> to vector<1x32xf32>
    %203 = vector.broadcast %202 : vector<1x32xf32> to vector<8x32xf32>
    %204 = arith.addf %201, %203 : vector<8x32xf32>
    %cst_75 = arith.constant 0.353553385 : f32
    %205 = vector.broadcast %cst_75 : f32 to vector<8x32xf32>
    %206 = arith.mulf %204, %205 : vector<8x32xf32>
    %207 = vector.extract_strided_slice %200 {offsets = [0, 32], sizes = [8, 32], strides = [1, 1]} : vector<8x96xf32> to vector<8x32xf32>
    %208 = vector.extract_strided_slice %171 {offsets = [1, 0], sizes = [1, 32], strides = [1, 1]} : vector<9x32xf32> to vector<1x32xf32>
    %209 = vector.broadcast %208 : vector<1x32xf32> to vector<8x32xf32>
    %210 = arith.addf %207, %209 : vector<8x32xf32>
    %211 = vector.extract_strided_slice %200 {offsets = [0, 64], sizes = [8, 32], strides = [1, 1]} : vector<8x96xf32> to vector<8x32xf32>
    %212 = vector.extract_strided_slice %171 {offsets = [2, 0], sizes = [1, 32], strides = [1, 1]} : vector<9x32xf32> to vector<1x32xf32>
    %213 = vector.broadcast %212 : vector<1x32xf32> to vector<8x32xf32>
    %214 = arith.addf %211, %213 : vector<8x32xf32>
    %cst_76 = arith.constant 0.000000e+00 : f32
    %215 = vector.broadcast %cst_76 : f32 to vector<8x32xf32>
    %216 = vector.extract_strided_slice %206 {offsets = [0, 0], sizes = [8, 8], strides = [1, 1]} : vector<8x32xf32> to vector<8x8xf32>
    %217 = vector.extract_strided_slice %210 {offsets = [0, 0], sizes = [8, 8], strides = [1, 1]} : vector<8x32xf32> to vector<8x8xf32>
    %cst_77 = arith.constant dense<0.000000e+00> : vector<8x8xf32>
    %218 = tpu.matmul %216, %217, %cst_77 {dimension_numbers = #tpu.dot_dimension_numbers<[1], [1], [0], [0], [0, 0, 1, 0], [], []>} : vector<8x8xf32>, vector<8x8xf32>, vector<8x8xf32> -> vector<8x8xf32>
    %cst_78 = arith.constant dense<0xFF800000> : vector<8xf32>
    %219 = vector.multi_reduction <maximumf>, %218, %cst_78 [1] : vector<8x8xf32> to vector<8xf32>
    %220 = vector.shape_cast %219 : vector<8xf32> to vector<8x1xf32>
    %221 = vector.broadcast %220 : vector<8x1xf32> to vector<8x8xf32>
    %222 = arith.subf %218, %221 : vector<8x8xf32>
    %223 = math.exp %222 : vector<8x8xf32>
    %cst_79 = arith.constant dense<0.000000e+00> : vector<8xf32>
    %224 = vector.multi_reduction <add>, %223, %cst_79 [1] : vector<8x8xf32> to vector<8xf32>
    %225 = vector.shape_cast %224 : vector<8xf32> to vector<8x1xf32>
    %226 = tpu.reciprocal %225 {approx = true} : vector<8x1xf32> -> vector<8x1xf32>
    %227 = vector.broadcast %226 : vector<8x1xf32> to vector<8x8xf32>
    %228 = arith.mulf %223, %227 : vector<8x8xf32>
    %229 = vector.extract_strided_slice %214 {offsets = [0, 0], sizes = [8, 8], strides = [1, 1]} : vector<8x32xf32> to vector<8x8xf32>
    %cst_80 = arith.constant dense<0.000000e+00> : vector<8x8xf32>
    %230 = tpu.matmul %228, %229, %cst_80 {dimension_numbers = #tpu.dot_dimension_numbers<[1], [0], [0], [1], [0, 0, 1, 1], [], []>} : vector<8x8xf32>, vector<8x8xf32>, vector<8x8xf32> -> vector<8x8xf32>
    %231 = vector.extract_strided_slice %173 {offsets = [0, 0], sizes = [8, 32], strides = [1, 1]} : vector<32x32xf32> to vector<8x32xf32>
    %cst_81 = arith.constant dense<0.000000e+00> : vector<8x32xf32>
    %232 = tpu.matmul %230, %231, %cst_81 {dimension_numbers = #tpu.dot_dimension_numbers<[1], [0], [0], [1], [0, 0, 1, 1], [], []>} : vector<8x8xf32>, vector<8x32xf32>, vector<8x32xf32> -> vector<8x32xf32>
    %233 = arith.addf %215, %232 : vector<8x32xf32>
    %234 = vector.extract_strided_slice %206 {offsets = [0, 8], sizes = [8, 8], strides = [1, 1]} : vector<8x32xf32> to vector<8x8xf32>
    %235 = vector.extract_strided_slice %210 {offsets = [0, 8], sizes = [8, 8], strides = [1, 1]} : vector<8x32xf32> to vector<8x8xf32>
    %cst_82 = arith.constant dense<0.000000e+00> : vector<8x8xf32>
    %236 = tpu.matmul %234, %235, %cst_82 {dimension_numbers = #tpu.dot_dimension_numbers<[1], [1], [0], [0], [0, 0, 1, 0], [], []>} : vector<8x8xf32>, vector<8x8xf32>, vector<8x8xf32> -> vector<8x8xf32>
    %cst_83 = arith.constant dense<0xFF800000> : vector<8xf32>
    %237 = vector.multi_reduction <maximumf>, %236, %cst_83 [1] : vector<8x8xf32> to vector<8xf32>
    %238 = vector.shape_cast %237 : vector<8xf32> to vector<8x1xf32>
    %239 = vector.broadcast %238 : vector<8x1xf32> to vector<8x8xf32>
    %240 = arith.subf %236, %239 : vector<8x8xf32>
    %241 = math.exp %240 : vector<8x8xf32>
    %cst_84 = arith.constant dense<0.000000e+00> : vector<8xf32>
    %242 = vector.multi_reduction <add>, %241, %cst_84 [1] : vector<8x8xf32> to vector<8xf32>
    %243 = vector.shape_cast %242 : vector<8xf32> to vector<8x1xf32>
    %244 = tpu.reciprocal %243 {approx = true} : vector<8x1xf32> -> vector<8x1xf32>
    %245 = vector.broadcast %244 : vector<8x1xf32> to vector<8x8xf32>
    %246 = arith.mulf %241, %245 : vector<8x8xf32>
    %247 = vector.extract_strided_slice %214 {offsets = [0, 8], sizes = [8, 8], strides = [1, 1]} : vector<8x32xf32> to vector<8x8xf32>
    %cst_85 = arith.constant dense<0.000000e+00> : vector<8x8xf32>
    %248 = tpu.matmul %246, %247, %cst_85 {dimension_numbers = #tpu.dot_dimension_numbers<[1], [0], [0], [1], [0, 0, 1, 1], [], []>} : vector<8x8xf32>, vector<8x8xf32>, vector<8x8xf32> -> vector<8x8xf32>
    %249 = vector.extract_strided_slice %173 {offsets = [8, 0], sizes = [8, 32], strides = [1, 1]} : vector<32x32xf32> to vector<8x32xf32>
    %cst_86 = arith.constant dense<0.000000e+00> : vector<8x32xf32>
    %250 = tpu.matmul %248, %249, %cst_86 {dimension_numbers = #tpu.dot_dimension_numbers<[1], [0], [0], [1], [0, 0, 1, 1], [], []>} : vector<8x8xf32>, vector<8x32xf32>, vector<8x32xf32> -> vector<8x32xf32>
    %251 = arith.addf %233, %250 : vector<8x32xf32>
    %252 = vector.extract_strided_slice %206 {offsets = [0, 16], sizes = [8, 8], strides = [1, 1]} : vector<8x32xf32> to vector<8x8xf32>
    %253 = vector.extract_strided_slice %210 {offsets = [0, 16], sizes = [8, 8], strides = [1, 1]} : vector<8x32xf32> to vector<8x8xf32>
    %cst_87 = arith.constant dense<0.000000e+00> : vector<8x8xf32>
    %254 = tpu.matmul %252, %253, %cst_87 {dimension_numbers = #tpu.dot_dimension_numbers<[1], [1], [0], [0], [0, 0, 1, 0], [], []>} : vector<8x8xf32>, vector<8x8xf32>, vector<8x8xf32> -> vector<8x8xf32>
    %cst_88 = arith.constant dense<0xFF800000> : vector<8xf32>
    %255 = vector.multi_reduction <maximumf>, %254, %cst_88 [1] : vector<8x8xf32> to vector<8xf32>
    %256 = vector.shape_cast %255 : vector<8xf32> to vector<8x1xf32>
    %257 = vector.broadcast %256 : vector<8x1xf32> to vector<8x8xf32>
    %258 = arith.subf %254, %257 : vector<8x8xf32>
    %259 = math.exp %258 : vector<8x8xf32>
    %cst_89 = arith.constant dense<0.000000e+00> : vector<8xf32>
    %260 = vector.multi_reduction <add>, %259, %cst_89 [1] : vector<8x8xf32> to vector<8xf32>
    %261 = vector.shape_cast %260 : vector<8xf32> to vector<8x1xf32>
    %262 = tpu.reciprocal %261 {approx = true} : vector<8x1xf32> -> vector<8x1xf32>
    %263 = vector.broadcast %262 : vector<8x1xf32> to vector<8x8xf32>
    %264 = arith.mulf %259, %263 : vector<8x8xf32>
    %265 = vector.extract_strided_slice %214 {offsets = [0, 16], sizes = [8, 8], strides = [1, 1]} : vector<8x32xf32> to vector<8x8xf32>
    %cst_90 = arith.constant dense<0.000000e+00> : vector<8x8xf32>
    %266 = tpu.matmul %264, %265, %cst_90 {dimension_numbers = #tpu.dot_dimension_numbers<[1], [0], [0], [1], [0, 0, 1, 1], [], []>} : vector<8x8xf32>, vector<8x8xf32>, vector<8x8xf32> -> vector<8x8xf32>
    %267 = vector.extract_strided_slice %173 {offsets = [16, 0], sizes = [8, 32], strides = [1, 1]} : vector<32x32xf32> to vector<8x32xf32>
    %cst_91 = arith.constant dense<0.000000e+00> : vector<8x32xf32>
    %268 = tpu.matmul %266, %267, %cst_91 {dimension_numbers = #tpu.dot_dimension_numbers<[1], [0], [0], [1], [0, 0, 1, 1], [], []>} : vector<8x8xf32>, vector<8x32xf32>, vector<8x32xf32> -> vector<8x32xf32>
    %269 = arith.addf %251, %268 : vector<8x32xf32>
    %270 = vector.extract_strided_slice %206 {offsets = [0, 24], sizes = [8, 8], strides = [1, 1]} : vector<8x32xf32> to vector<8x8xf32>
    %271 = vector.extract_strided_slice %210 {offsets = [0, 24], sizes = [8, 8], strides = [1, 1]} : vector<8x32xf32> to vector<8x8xf32>
    %cst_92 = arith.constant dense<0.000000e+00> : vector<8x8xf32>
    %272 = tpu.matmul %270, %271, %cst_92 {dimension_numbers = #tpu.dot_dimension_numbers<[1], [1], [0], [0], [0, 0, 1, 0], [], []>} : vector<8x8xf32>, vector<8x8xf32>, vector<8x8xf32> -> vector<8x8xf32>
    %cst_93 = arith.constant dense<0xFF800000> : vector<8xf32>
    %273 = vector.multi_reduction <maximumf>, %272, %cst_93 [1] : vector<8x8xf32> to vector<8xf32>
    %274 = vector.shape_cast %273 : vector<8xf32> to vector<8x1xf32>
    %275 = vector.broadcast %274 : vector<8x1xf32> to vector<8x8xf32>
    %276 = arith.subf %272, %275 : vector<8x8xf32>
    %277 = math.exp %276 : vector<8x8xf32>
    %cst_94 = arith.constant dense<0.000000e+00> : vector<8xf32>
    %278 = vector.multi_reduction <add>, %277, %cst_94 [1] : vector<8x8xf32> to vector<8xf32>
    %279 = vector.shape_cast %278 : vector<8xf32> to vector<8x1xf32>
    %280 = tpu.reciprocal %279 {approx = true} : vector<8x1xf32> -> vector<8x1xf32>
    %281 = vector.broadcast %280 : vector<8x1xf32> to vector<8x8xf32>
    %282 = arith.mulf %277, %281 : vector<8x8xf32>
    %283 = vector.extract_strided_slice %214 {offsets = [0, 24], sizes = [8, 8], strides = [1, 1]} : vector<8x32xf32> to vector<8x8xf32>
    %cst_95 = arith.constant dense<0.000000e+00> : vector<8x8xf32>
    %284 = tpu.matmul %282, %283, %cst_95 {dimension_numbers = #tpu.dot_dimension_numbers<[1], [0], [0], [1], [0, 0, 1, 1], [], []>} : vector<8x8xf32>, vector<8x8xf32>, vector<8x8xf32> -> vector<8x8xf32>
    %285 = vector.extract_strided_slice %173 {offsets = [24, 0], sizes = [8, 32], strides = [1, 1]} : vector<32x32xf32> to vector<8x32xf32>
    %cst_96 = arith.constant dense<0.000000e+00> : vector<8x32xf32>
    %286 = tpu.matmul %284, %285, %cst_96 {dimension_numbers = #tpu.dot_dimension_numbers<[1], [0], [0], [1], [0, 0, 1, 1], [], []>} : vector<8x8xf32>, vector<8x32xf32>, vector<8x32xf32> -> vector<8x32xf32>
    %287 = arith.addf %269, %286 : vector<8x32xf32>
    %288 = arith.addf %169, %287 : vector<8x32xf32>
    %289 = vector.extract_strided_slice %171 {offsets = [3, 0], sizes = [1, 32], strides = [1, 1]} : vector<9x32xf32> to vector<1x32xf32>
    %290 = vector.broadcast %289 : vector<1x32xf32> to vector<8x32xf32>
    %291 = arith.addf %288, %290 : vector<8x32xf32>
    %292 = vector.extract_strided_slice %171 {offsets = [6, 0], sizes = [1, 32], strides = [1, 1]} : vector<9x32xf32> to vector<1x32xf32>
    %293 = vector.extract_strided_slice %171 {offsets = [7, 0], sizes = [1, 32], strides = [1, 1]} : vector<9x32xf32> to vector<1x32xf32>
    %cst_97 = arith.constant dense<0.000000e+00> : vector<8xf32>
    %294 = vector.multi_reduction <add>, %291, %cst_97 [1] : vector<8x32xf32> to vector<8xf32>
    %295 = vector.shape_cast %294 : vector<8xf32> to vector<8x1xf32>
    %cst_98 = arith.constant 3.200000e+01 : f32
    %296 = vector.broadcast %cst_98 : f32 to vector<8x1xf32>
    %297 = arith.divf %295, %296 : vector<8x1xf32>
    %298 = vector.broadcast %297 : vector<8x1xf32> to vector<8x32xf32>
    %299 = arith.subf %291, %298 : vector<8x32xf32>
    %300 = arith.mulf %299, %299 : vector<8x32xf32>
    %cst_99 = arith.constant dense<0.000000e+00> : vector<8xf32>
    %301 = vector.multi_reduction <add>, %300, %cst_99 [1] : vector<8x32xf32> to vector<8xf32>
    %302 = vector.shape_cast %301 : vector<8xf32> to vector<8x1xf32>
    %cst_100 = arith.constant 3.200000e+01 : f32
    %303 = vector.broadcast %cst_100 : f32 to vector<8x1xf32>
    %304 = arith.divf %302, %303 : vector<8x1xf32>
    %305 = vector.broadcast %297 : vector<8x1xf32> to vector<8x32xf32>
    %306 = arith.subf %291, %305 : vector<8x32xf32>
    %cst_101 = arith.constant 9.99999974E-6 : f32
    %307 = vector.broadcast %cst_101 : f32 to vector<8x1xf32>
    %308 = arith.addf %304, %307 : vector<8x1xf32>
    %309 = math.rsqrt %308 : vector<8x1xf32>
    %310 = vector.broadcast %309 : vector<8x1xf32> to vector<8x32xf32>
    %311 = arith.mulf %306, %310 : vector<8x32xf32>
    %312 = vector.broadcast %292 : vector<1x32xf32> to vector<8x32xf32>
    %313 = arith.mulf %311, %312 : vector<8x32xf32>
    %314 = vector.broadcast %293 : vector<1x32xf32> to vector<8x32xf32>
    %315 = arith.addf %313, %314 : vector<8x32xf32>
    %c1_102 = arith.constant 1 : index
    %c0_103 = arith.constant 0 : index
    %c0_104 = arith.constant 0 : index
    %316 = vector.load %arg6[%c1_102, %c0_103, %c0_104] : memref<6x32x128xf32, #tpu.memory_space<vmem>>, vector<1x32x128xf32>
    %317 = vector.shape_cast %316 : vector<1x32x128xf32> to vector<32x128xf32>
    %cst_105 = arith.constant dense<0.000000e+00> : vector<8x128xf32>
    %318 = tpu.matmul %315, %317, %cst_105 {dimension_numbers = #tpu.dot_dimension_numbers<[1], [0], [0], [1], [0, 0, 1, 1], [], []>} : vector<8x32xf32>, vector<32x128xf32>, vector<8x128xf32> -> vector<8x128xf32>
    %c1_106 = arith.constant 1 : index
    %c0_107 = arith.constant 0 : index
    %c0_108 = arith.constant 0 : index
    %319 = vector.load %arg9[%c1_106, %c0_107, %c0_108] : memref<6x1x128xf32, #tpu.memory_space<vmem>>, vector<1x1x128xf32>
    %320 = vector.shape_cast %319 : vector<1x1x128xf32> to vector<1x128xf32>
    %321 = vector.broadcast %320 : vector<1x128xf32> to vector<8x128xf32>
    %322 = arith.addf %318, %321 : vector<8x128xf32>
    %cst_109 = arith.constant 0.000000e+00 : f32
    %323 = vector.broadcast %cst_109 : f32 to vector<8x128xf32>
    %324 = arith.maximumf %322, %323 : vector<8x128xf32>
    %c1_110 = arith.constant 1 : index
    %c0_111 = arith.constant 0 : index
    %c0_112 = arith.constant 0 : index
    %325 = vector.load %arg7[%c1_110, %c0_111, %c0_112] : memref<6x128x32xf32, #tpu.memory_space<vmem>>, vector<1x128x32xf32>
    %326 = vector.shape_cast %325 : vector<1x128x32xf32> to vector<128x32xf32>
    %cst_113 = arith.constant dense<0.000000e+00> : vector<8x32xf32>
    %327 = tpu.matmul %324, %326, %cst_113 {dimension_numbers = #tpu.dot_dimension_numbers<[1], [0], [0], [1], [0, 0, 1, 1], [], []>} : vector<8x128xf32>, vector<128x32xf32>, vector<8x32xf32> -> vector<8x32xf32>
    %328 = arith.addf %291, %327 : vector<8x32xf32>
    %329 = vector.extract_strided_slice %171 {offsets = [8, 0], sizes = [1, 32], strides = [1, 1]} : vector<9x32xf32> to vector<1x32xf32>
    %330 = vector.broadcast %329 : vector<1x32xf32> to vector<8x32xf32>
    %331 = arith.addf %328, %330 : vector<8x32xf32>
    %c2 = arith.constant 2 : index
    %c0_114 = arith.constant 0 : index
    %c0_115 = arith.constant 0 : index
    %332 = vector.load %arg8[%c2, %c0_114, %c0_115] : memref<6x9x32xf32, #tpu.memory_space<vmem>>, vector<1x9x32xf32>
    %333 = vector.shape_cast %332 : vector<1x9x32xf32> to vector<9x32xf32>
    %c2_116 = arith.constant 2 : index
    %c0_117 = arith.constant 0 : index
    %c0_118 = arith.constant 0 : index
    %334 = vector.load %arg5[%c2_116, %c0_117, %c0_118] : memref<6x32x32xf32, #tpu.memory_space<vmem>>, vector<1x32x32xf32>
    %335 = vector.shape_cast %334 : vector<1x32x32xf32> to vector<32x32xf32>
    %336 = vector.extract_strided_slice %333 {offsets = [4, 0], sizes = [1, 32], strides = [1, 1]} : vector<9x32xf32> to vector<1x32xf32>
    %337 = vector.extract_strided_slice %333 {offsets = [5, 0], sizes = [1, 32], strides = [1, 1]} : vector<9x32xf32> to vector<1x32xf32>
    %cst_119 = arith.constant dense<0.000000e+00> : vector<8xf32>
    %338 = vector.multi_reduction <add>, %331, %cst_119 [1] : vector<8x32xf32> to vector<8xf32>
    %339 = vector.shape_cast %338 : vector<8xf32> to vector<8x1xf32>
    %cst_120 = arith.constant 3.200000e+01 : f32
    %340 = vector.broadcast %cst_120 : f32 to vector<8x1xf32>
    %341 = arith.divf %339, %340 : vector<8x1xf32>
    %342 = vector.broadcast %341 : vector<8x1xf32> to vector<8x32xf32>
    %343 = arith.subf %331, %342 : vector<8x32xf32>
    %344 = arith.mulf %343, %343 : vector<8x32xf32>
    %cst_121 = arith.constant dense<0.000000e+00> : vector<8xf32>
    %345 = vector.multi_reduction <add>, %344, %cst_121 [1] : vector<8x32xf32> to vector<8xf32>
    %346 = vector.shape_cast %345 : vector<8xf32> to vector<8x1xf32>
    %cst_122 = arith.constant 3.200000e+01 : f32
    %347 = vector.broadcast %cst_122 : f32 to vector<8x1xf32>
    %348 = arith.divf %346, %347 : vector<8x1xf32>
    %349 = vector.broadcast %341 : vector<8x1xf32> to vector<8x32xf32>
    %350 = arith.subf %331, %349 : vector<8x32xf32>
    %cst_123 = arith.constant 9.99999974E-6 : f32
    %351 = vector.broadcast %cst_123 : f32 to vector<8x1xf32>
    %352 = arith.addf %348, %351 : vector<8x1xf32>
    %353 = math.rsqrt %352 : vector<8x1xf32>
    %354 = vector.broadcast %353 : vector<8x1xf32> to vector<8x32xf32>
    %355 = arith.mulf %350, %354 : vector<8x32xf32>
    %356 = vector.broadcast %336 : vector<1x32xf32> to vector<8x32xf32>
    %357 = arith.mulf %355, %356 : vector<8x32xf32>
    %358 = vector.broadcast %337 : vector<1x32xf32> to vector<8x32xf32>
    %359 = arith.addf %357, %358 : vector<8x32xf32>
    %c2_124 = arith.constant 2 : index
    %c0_125 = arith.constant 0 : index
    %c0_126 = arith.constant 0 : index
    %360 = vector.load %arg4[%c2_124, %c0_125, %c0_126] : memref<6x32x96xf32, #tpu.memory_space<vmem>>, vector<1x32x96xf32>
    %361 = vector.shape_cast %360 : vector<1x32x96xf32> to vector<32x96xf32>
    %cst_127 = arith.constant dense<0.000000e+00> : vector<8x96xf32>
    %362 = tpu.matmul %359, %361, %cst_127 {dimension_numbers = #tpu.dot_dimension_numbers<[1], [0], [0], [1], [0, 0, 1, 1], [], []>} : vector<8x32xf32>, vector<32x96xf32>, vector<8x96xf32> -> vector<8x96xf32>
    %363 = vector.extract_strided_slice %362 {offsets = [0, 0], sizes = [8, 32], strides = [1, 1]} : vector<8x96xf32> to vector<8x32xf32>
    %364 = vector.extract_strided_slice %333 {offsets = [0, 0], sizes = [1, 32], strides = [1, 1]} : vector<9x32xf32> to vector<1x32xf32>
    %365 = vector.broadcast %364 : vector<1x32xf32> to vector<8x32xf32>
    %366 = arith.addf %363, %365 : vector<8x32xf32>
    %cst_128 = arith.constant 0.353553385 : f32
    %367 = vector.broadcast %cst_128 : f32 to vector<8x32xf32>
    %368 = arith.mulf %366, %367 : vector<8x32xf32>
    %369 = vector.extract_strided_slice %362 {offsets = [0, 32], sizes = [8, 32], strides = [1, 1]} : vector<8x96xf32> to vector<8x32xf32>
    %370 = vector.extract_strided_slice %333 {offsets = [1, 0], sizes = [1, 32], strides = [1, 1]} : vector<9x32xf32> to vector<1x32xf32>
    %371 = vector.broadcast %370 : vector<1x32xf32> to vector<8x32xf32>
    %372 = arith.addf %369, %371 : vector<8x32xf32>
    %373 = vector.extract_strided_slice %362 {offsets = [0, 64], sizes = [8, 32], strides = [1, 1]} : vector<8x96xf32> to vector<8x32xf32>
    %374 = vector.extract_strided_slice %333 {offsets = [2, 0], sizes = [1, 32], strides = [1, 1]} : vector<9x32xf32> to vector<1x32xf32>
    %375 = vector.broadcast %374 : vector<1x32xf32> to vector<8x32xf32>
    %376 = arith.addf %373, %375 : vector<8x32xf32>
    %cst_129 = arith.constant 0.000000e+00 : f32
    %377 = vector.broadcast %cst_129 : f32 to vector<8x32xf32>
    %378 = vector.extract_strided_slice %368 {offsets = [0, 0], sizes = [8, 8], strides = [1, 1]} : vector<8x32xf32> to vector<8x8xf32>
    %379 = vector.extract_strided_slice %372 {offsets = [0, 0], sizes = [8, 8], strides = [1, 1]} : vector<8x32xf32> to vector<8x8xf32>
    %cst_130 = arith.constant dense<0.000000e+00> : vector<8x8xf32>
    %380 = tpu.matmul %378, %379, %cst_130 {dimension_numbers = #tpu.dot_dimension_numbers<[1], [1], [0], [0], [0, 0, 1, 0], [], []>} : vector<8x8xf32>, vector<8x8xf32>, vector<8x8xf32> -> vector<8x8xf32>
    %cst_131 = arith.constant dense<0xFF800000> : vector<8xf32>
    %381 = vector.multi_reduction <maximumf>, %380, %cst_131 [1] : vector<8x8xf32> to vector<8xf32>
    %382 = vector.shape_cast %381 : vector<8xf32> to vector<8x1xf32>
    %383 = vector.broadcast %382 : vector<8x1xf32> to vector<8x8xf32>
    %384 = arith.subf %380, %383 : vector<8x8xf32>
    %385 = math.exp %384 : vector<8x8xf32>
    %cst_132 = arith.constant dense<0.000000e+00> : vector<8xf32>
    %386 = vector.multi_reduction <add>, %385, %cst_132 [1] : vector<8x8xf32> to vector<8xf32>
    %387 = vector.shape_cast %386 : vector<8xf32> to vector<8x1xf32>
    %388 = tpu.reciprocal %387 {approx = true} : vector<8x1xf32> -> vector<8x1xf32>
    %389 = vector.broadcast %388 : vector<8x1xf32> to vector<8x8xf32>
    %390 = arith.mulf %385, %389 : vector<8x8xf32>
    %391 = vector.extract_strided_slice %376 {offsets = [0, 0], sizes = [8, 8], strides = [1, 1]} : vector<8x32xf32> to vector<8x8xf32>
    %cst_133 = arith.constant dense<0.000000e+00> : vector<8x8xf32>
    %392 = tpu.matmul %390, %391, %cst_133 {dimension_numbers = #tpu.dot_dimension_numbers<[1], [0], [0], [1], [0, 0, 1, 1], [], []>} : vector<8x8xf32>, vector<8x8xf32>, vector<8x8xf32> -> vector<8x8xf32>
    %393 = vector.extract_strided_slice %335 {offsets = [0, 0], sizes = [8, 32], strides = [1, 1]} : vector<32x32xf32> to vector<8x32xf32>
    %cst_134 = arith.constant dense<0.000000e+00> : vector<8x32xf32>
    %394 = tpu.matmul %392, %393, %cst_134 {dimension_numbers = #tpu.dot_dimension_numbers<[1], [0], [0], [1], [0, 0, 1, 1], [], []>} : vector<8x8xf32>, vector<8x32xf32>, vector<8x32xf32> -> vector<8x32xf32>
    %395 = arith.addf %377, %394 : vector<8x32xf32>
    %396 = vector.extract_strided_slice %368 {offsets = [0, 8], sizes = [8, 8], strides = [1, 1]} : vector<8x32xf32> to vector<8x8xf32>
    %397 = vector.extract_strided_slice %372 {offsets = [0, 8], sizes = [8, 8], strides = [1, 1]} : vector<8x32xf32> to vector<8x8xf32>
    %cst_135 = arith.constant dense<0.000000e+00> : vector<8x8xf32>
    %398 = tpu.matmul %396, %397, %cst_135 {dimension_numbers = #tpu.dot_dimension_numbers<[1], [1], [0], [0], [0, 0, 1, 0], [], []>} : vector<8x8xf32>, vector<8x8xf32>, vector<8x8xf32> -> vector<8x8xf32>
    %cst_136 = arith.constant dense<0xFF800000> : vector<8xf32>
    %399 = vector.multi_reduction <maximumf>, %398, %cst_136 [1] : vector<8x8xf32> to vector<8xf32>
    %400 = vector.shape_cast %399 : vector<8xf32> to vector<8x1xf32>
    %401 = vector.broadcast %400 : vector<8x1xf32> to vector<8x8xf32>
    %402 = arith.subf %398, %401 : vector<8x8xf32>
    %403 = math.exp %402 : vector<8x8xf32>
    %cst_137 = arith.constant dense<0.000000e+00> : vector<8xf32>
    %404 = vector.multi_reduction <add>, %403, %cst_137 [1] : vector<8x8xf32> to vector<8xf32>
    %405 = vector.shape_cast %404 : vector<8xf32> to vector<8x1xf32>
    %406 = tpu.reciprocal %405 {approx = true} : vector<8x1xf32> -> vector<8x1xf32>
    %407 = vector.broadcast %406 : vector<8x1xf32> to vector<8x8xf32>
    %408 = arith.mulf %403, %407 : vector<8x8xf32>
    %409 = vector.extract_strided_slice %376 {offsets = [0, 8], sizes = [8, 8], strides = [1, 1]} : vector<8x32xf32> to vector<8x8xf32>
    %cst_138 = arith.constant dense<0.000000e+00> : vector<8x8xf32>
    %410 = tpu.matmul %408, %409, %cst_138 {dimension_numbers = #tpu.dot_dimension_numbers<[1], [0], [0], [1], [0, 0, 1, 1], [], []>} : vector<8x8xf32>, vector<8x8xf32>, vector<8x8xf32> -> vector<8x8xf32>
    %411 = vector.extract_strided_slice %335 {offsets = [8, 0], sizes = [8, 32], strides = [1, 1]} : vector<32x32xf32> to vector<8x32xf32>
    %cst_139 = arith.constant dense<0.000000e+00> : vector<8x32xf32>
    %412 = tpu.matmul %410, %411, %cst_139 {dimension_numbers = #tpu.dot_dimension_numbers<[1], [0], [0], [1], [0, 0, 1, 1], [], []>} : vector<8x8xf32>, vector<8x32xf32>, vector<8x32xf32> -> vector<8x32xf32>
    %413 = arith.addf %395, %412 : vector<8x32xf32>
    %414 = vector.extract_strided_slice %368 {offsets = [0, 16], sizes = [8, 8], strides = [1, 1]} : vector<8x32xf32> to vector<8x8xf32>
    %415 = vector.extract_strided_slice %372 {offsets = [0, 16], sizes = [8, 8], strides = [1, 1]} : vector<8x32xf32> to vector<8x8xf32>
    %cst_140 = arith.constant dense<0.000000e+00> : vector<8x8xf32>
    %416 = tpu.matmul %414, %415, %cst_140 {dimension_numbers = #tpu.dot_dimension_numbers<[1], [1], [0], [0], [0, 0, 1, 0], [], []>} : vector<8x8xf32>, vector<8x8xf32>, vector<8x8xf32> -> vector<8x8xf32>
    %cst_141 = arith.constant dense<0xFF800000> : vector<8xf32>
    %417 = vector.multi_reduction <maximumf>, %416, %cst_141 [1] : vector<8x8xf32> to vector<8xf32>
    %418 = vector.shape_cast %417 : vector<8xf32> to vector<8x1xf32>
    %419 = vector.broadcast %418 : vector<8x1xf32> to vector<8x8xf32>
    %420 = arith.subf %416, %419 : vector<8x8xf32>
    %421 = math.exp %420 : vector<8x8xf32>
    %cst_142 = arith.constant dense<0.000000e+00> : vector<8xf32>
    %422 = vector.multi_reduction <add>, %421, %cst_142 [1] : vector<8x8xf32> to vector<8xf32>
    %423 = vector.shape_cast %422 : vector<8xf32> to vector<8x1xf32>
    %424 = tpu.reciprocal %423 {approx = true} : vector<8x1xf32> -> vector<8x1xf32>
    %425 = vector.broadcast %424 : vector<8x1xf32> to vector<8x8xf32>
    %426 = arith.mulf %421, %425 : vector<8x8xf32>
    %427 = vector.extract_strided_slice %376 {offsets = [0, 16], sizes = [8, 8], strides = [1, 1]} : vector<8x32xf32> to vector<8x8xf32>
    %cst_143 = arith.constant dense<0.000000e+00> : vector<8x8xf32>
    %428 = tpu.matmul %426, %427, %cst_143 {dimension_numbers = #tpu.dot_dimension_numbers<[1], [0], [0], [1], [0, 0, 1, 1], [], []>} : vector<8x8xf32>, vector<8x8xf32>, vector<8x8xf32> -> vector<8x8xf32>
    %429 = vector.extract_strided_slice %335 {offsets = [16, 0], sizes = [8, 32], strides = [1, 1]} : vector<32x32xf32> to vector<8x32xf32>
    %cst_144 = arith.constant dense<0.000000e+00> : vector<8x32xf32>
    %430 = tpu.matmul %428, %429, %cst_144 {dimension_numbers = #tpu.dot_dimension_numbers<[1], [0], [0], [1], [0, 0, 1, 1], [], []>} : vector<8x8xf32>, vector<8x32xf32>, vector<8x32xf32> -> vector<8x32xf32>
    %431 = arith.addf %413, %430 : vector<8x32xf32>
    %432 = vector.extract_strided_slice %368 {offsets = [0, 24], sizes = [8, 8], strides = [1, 1]} : vector<8x32xf32> to vector<8x8xf32>
    %433 = vector.extract_strided_slice %372 {offsets = [0, 24], sizes = [8, 8], strides = [1, 1]} : vector<8x32xf32> to vector<8x8xf32>
    %cst_145 = arith.constant dense<0.000000e+00> : vector<8x8xf32>
    %434 = tpu.matmul %432, %433, %cst_145 {dimension_numbers = #tpu.dot_dimension_numbers<[1], [1], [0], [0], [0, 0, 1, 0], [], []>} : vector<8x8xf32>, vector<8x8xf32>, vector<8x8xf32> -> vector<8x8xf32>
    %cst_146 = arith.constant dense<0xFF800000> : vector<8xf32>
    %435 = vector.multi_reduction <maximumf>, %434, %cst_146 [1] : vector<8x8xf32> to vector<8xf32>
    %436 = vector.shape_cast %435 : vector<8xf32> to vector<8x1xf32>
    %437 = vector.broadcast %436 : vector<8x1xf32> to vector<8x8xf32>
    %438 = arith.subf %434, %437 : vector<8x8xf32>
    %439 = math.exp %438 : vector<8x8xf32>
    %cst_147 = arith.constant dense<0.000000e+00> : vector<8xf32>
    %440 = vector.multi_reduction <add>, %439, %cst_147 [1] : vector<8x8xf32> to vector<8xf32>
    %441 = vector.shape_cast %440 : vector<8xf32> to vector<8x1xf32>
    %442 = tpu.reciprocal %441 {approx = true} : vector<8x1xf32> -> vector<8x1xf32>
    %443 = vector.broadcast %442 : vector<8x1xf32> to vector<8x8xf32>
    %444 = arith.mulf %439, %443 : vector<8x8xf32>
    %445 = vector.extract_strided_slice %376 {offsets = [0, 24], sizes = [8, 8], strides = [1, 1]} : vector<8x32xf32> to vector<8x8xf32>
    %cst_148 = arith.constant dense<0.000000e+00> : vector<8x8xf32>
    %446 = tpu.matmul %444, %445, %cst_148 {dimension_numbers = #tpu.dot_dimension_numbers<[1], [0], [0], [1], [0, 0, 1, 1], [], []>} : vector<8x8xf32>, vector<8x8xf32>, vector<8x8xf32> -> vector<8x8xf32>
    %447 = vector.extract_strided_slice %335 {offsets = [24, 0], sizes = [8, 32], strides = [1, 1]} : vector<32x32xf32> to vector<8x32xf32>
    %cst_149 = arith.constant dense<0.000000e+00> : vector<8x32xf32>
    %448 = tpu.matmul %446, %447, %cst_149 {dimension_numbers = #tpu.dot_dimension_numbers<[1], [0], [0], [1], [0, 0, 1, 1], [], []>} : vector<8x8xf32>, vector<8x32xf32>, vector<8x32xf32> -> vector<8x32xf32>
    %449 = arith.addf %431, %448 : vector<8x32xf32>
    %450 = arith.addf %331, %449 : vector<8x32xf32>
    %451 = vector.extract_strided_slice %333 {offsets = [3, 0], sizes = [1, 32], strides = [1, 1]} : vector<9x32xf32> to vector<1x32xf32>
    %452 = vector.broadcast %451 : vector<1x32xf32> to vector<8x32xf32>
    %453 = arith.addf %450, %452 : vector<8x32xf32>
    %454 = vector.extract_strided_slice %333 {offsets = [6, 0], sizes = [1, 32], strides = [1, 1]} : vector<9x32xf32> to vector<1x32xf32>
    %455 = vector.extract_strided_slice %333 {offsets = [7, 0], sizes = [1, 32], strides = [1, 1]} : vector<9x32xf32> to vector<1x32xf32>
    %cst_150 = arith.constant dense<0.000000e+00> : vector<8xf32>
    %456 = vector.multi_reduction <add>, %453, %cst_150 [1] : vector<8x32xf32> to vector<8xf32>
    %457 = vector.shape_cast %456 : vector<8xf32> to vector<8x1xf32>
    %cst_151 = arith.constant 3.200000e+01 : f32
    %458 = vector.broadcast %cst_151 : f32 to vector<8x1xf32>
    %459 = arith.divf %457, %458 : vector<8x1xf32>
    %460 = vector.broadcast %459 : vector<8x1xf32> to vector<8x32xf32>
    %461 = arith.subf %453, %460 : vector<8x32xf32>
    %462 = arith.mulf %461, %461 : vector<8x32xf32>
    %cst_152 = arith.constant dense<0.000000e+00> : vector<8xf32>
    %463 = vector.multi_reduction <add>, %462, %cst_152 [1] : vector<8x32xf32> to vector<8xf32>
    %464 = vector.shape_cast %463 : vector<8xf32> to vector<8x1xf32>
    %cst_153 = arith.constant 3.200000e+01 : f32
    %465 = vector.broadcast %cst_153 : f32 to vector<8x1xf32>
    %466 = arith.divf %464, %465 : vector<8x1xf32>
    %467 = vector.broadcast %459 : vector<8x1xf32> to vector<8x32xf32>
    %468 = arith.subf %453, %467 : vector<8x32xf32>
    %cst_154 = arith.constant 9.99999974E-6 : f32
    %469 = vector.broadcast %cst_154 : f32 to vector<8x1xf32>
    %470 = arith.addf %466, %469 : vector<8x1xf32>
    %471 = math.rsqrt %470 : vector<8x1xf32>
    %472 = vector.broadcast %471 : vector<8x1xf32> to vector<8x32xf32>
    %473 = arith.mulf %468, %472 : vector<8x32xf32>
    %474 = vector.broadcast %454 : vector<1x32xf32> to vector<8x32xf32>
    %475 = arith.mulf %473, %474 : vector<8x32xf32>
    %476 = vector.broadcast %455 : vector<1x32xf32> to vector<8x32xf32>
    %477 = arith.addf %475, %476 : vector<8x32xf32>
    %c2_155 = arith.constant 2 : index
    %c0_156 = arith.constant 0 : index
    %c0_157 = arith.constant 0 : index
    %478 = vector.load %arg6[%c2_155, %c0_156, %c0_157] : memref<6x32x128xf32, #tpu.memory_space<vmem>>, vector<1x32x128xf32>
    %479 = vector.shape_cast %478 : vector<1x32x128xf32> to vector<32x128xf32>
    %cst_158 = arith.constant dense<0.000000e+00> : vector<8x128xf32>
    %480 = tpu.matmul %477, %479, %cst_158 {dimension_numbers = #tpu.dot_dimension_numbers<[1], [0], [0], [1], [0, 0, 1, 1], [], []>} : vector<8x32xf32>, vector<32x128xf32>, vector<8x128xf32> -> vector<8x128xf32>
    %c2_159 = arith.constant 2 : index
    %c0_160 = arith.constant 0 : index
    %c0_161 = arith.constant 0 : index
    %481 = vector.load %arg9[%c2_159, %c0_160, %c0_161] : memref<6x1x128xf32, #tpu.memory_space<vmem>>, vector<1x1x128xf32>
    %482 = vector.shape_cast %481 : vector<1x1x128xf32> to vector<1x128xf32>
    %483 = vector.broadcast %482 : vector<1x128xf32> to vector<8x128xf32>
    %484 = arith.addf %480, %483 : vector<8x128xf32>
    %cst_162 = arith.constant 0.000000e+00 : f32
    %485 = vector.broadcast %cst_162 : f32 to vector<8x128xf32>
    %486 = arith.maximumf %484, %485 : vector<8x128xf32>
    %c2_163 = arith.constant 2 : index
    %c0_164 = arith.constant 0 : index
    %c0_165 = arith.constant 0 : index
    %487 = vector.load %arg7[%c2_163, %c0_164, %c0_165] : memref<6x128x32xf32, #tpu.memory_space<vmem>>, vector<1x128x32xf32>
    %488 = vector.shape_cast %487 : vector<1x128x32xf32> to vector<128x32xf32>
    %cst_166 = arith.constant dense<0.000000e+00> : vector<8x32xf32>
    %489 = tpu.matmul %486, %488, %cst_166 {dimension_numbers = #tpu.dot_dimension_numbers<[1], [0], [0], [1], [0, 0, 1, 1], [], []>} : vector<8x128xf32>, vector<128x32xf32>, vector<8x32xf32> -> vector<8x32xf32>
    %490 = arith.addf %453, %489 : vector<8x32xf32>
    %491 = vector.extract_strided_slice %333 {offsets = [8, 0], sizes = [1, 32], strides = [1, 1]} : vector<9x32xf32> to vector<1x32xf32>
    %492 = vector.broadcast %491 : vector<1x32xf32> to vector<8x32xf32>
    %493 = arith.addf %490, %492 : vector<8x32xf32>
    %c3 = arith.constant 3 : index
    %c0_167 = arith.constant 0 : index
    %c0_168 = arith.constant 0 : index
    %494 = vector.load %arg8[%c3, %c0_167, %c0_168] : memref<6x9x32xf32, #tpu.memory_space<vmem>>, vector<1x9x32xf32>
    %495 = vector.shape_cast %494 : vector<1x9x32xf32> to vector<9x32xf32>
    %c3_169 = arith.constant 3 : index
    %c0_170 = arith.constant 0 : index
    %c0_171 = arith.constant 0 : index
    %496 = vector.load %arg5[%c3_169, %c0_170, %c0_171] : memref<6x32x32xf32, #tpu.memory_space<vmem>>, vector<1x32x32xf32>
    %497 = vector.shape_cast %496 : vector<1x32x32xf32> to vector<32x32xf32>
    %498 = vector.extract_strided_slice %495 {offsets = [4, 0], sizes = [1, 32], strides = [1, 1]} : vector<9x32xf32> to vector<1x32xf32>
    %499 = vector.extract_strided_slice %495 {offsets = [5, 0], sizes = [1, 32], strides = [1, 1]} : vector<9x32xf32> to vector<1x32xf32>
    %cst_172 = arith.constant dense<0.000000e+00> : vector<8xf32>
    %500 = vector.multi_reduction <add>, %493, %cst_172 [1] : vector<8x32xf32> to vector<8xf32>
    %501 = vector.shape_cast %500 : vector<8xf32> to vector<8x1xf32>
    %cst_173 = arith.constant 3.200000e+01 : f32
    %502 = vector.broadcast %cst_173 : f32 to vector<8x1xf32>
    %503 = arith.divf %501, %502 : vector<8x1xf32>
    %504 = vector.broadcast %503 : vector<8x1xf32> to vector<8x32xf32>
    %505 = arith.subf %493, %504 : vector<8x32xf32>
    %506 = arith.mulf %505, %505 : vector<8x32xf32>
    %cst_174 = arith.constant dense<0.000000e+00> : vector<8xf32>
    %507 = vector.multi_reduction <add>, %506, %cst_174 [1] : vector<8x32xf32> to vector<8xf32>
    %508 = vector.shape_cast %507 : vector<8xf32> to vector<8x1xf32>
    %cst_175 = arith.constant 3.200000e+01 : f32
    %509 = vector.broadcast %cst_175 : f32 to vector<8x1xf32>
    %510 = arith.divf %508, %509 : vector<8x1xf32>
    %511 = vector.broadcast %503 : vector<8x1xf32> to vector<8x32xf32>
    %512 = arith.subf %493, %511 : vector<8x32xf32>
    %cst_176 = arith.constant 9.99999974E-6 : f32
    %513 = vector.broadcast %cst_176 : f32 to vector<8x1xf32>
    %514 = arith.addf %510, %513 : vector<8x1xf32>
    %515 = math.rsqrt %514 : vector<8x1xf32>
    %516 = vector.broadcast %515 : vector<8x1xf32> to vector<8x32xf32>
    %517 = arith.mulf %512, %516 : vector<8x32xf32>
    %518 = vector.broadcast %498 : vector<1x32xf32> to vector<8x32xf32>
    %519 = arith.mulf %517, %518 : vector<8x32xf32>
    %520 = vector.broadcast %499 : vector<1x32xf32> to vector<8x32xf32>
    %521 = arith.addf %519, %520 : vector<8x32xf32>
    %c3_177 = arith.constant 3 : index
    %c0_178 = arith.constant 0 : index
    %c0_179 = arith.constant 0 : index
    %522 = vector.load %arg4[%c3_177, %c0_178, %c0_179] : memref<6x32x96xf32, #tpu.memory_space<vmem>>, vector<1x32x96xf32>
    %523 = vector.shape_cast %522 : vector<1x32x96xf32> to vector<32x96xf32>
    %cst_180 = arith.constant dense<0.000000e+00> : vector<8x96xf32>
    %524 = tpu.matmul %521, %523, %cst_180 {dimension_numbers = #tpu.dot_dimension_numbers<[1], [0], [0], [1], [0, 0, 1, 1], [], []>} : vector<8x32xf32>, vector<32x96xf32>, vector<8x96xf32> -> vector<8x96xf32>
    %525 = vector.extract_strided_slice %524 {offsets = [0, 0], sizes = [8, 32], strides = [1, 1]} : vector<8x96xf32> to vector<8x32xf32>
    %526 = vector.extract_strided_slice %495 {offsets = [0, 0], sizes = [1, 32], strides = [1, 1]} : vector<9x32xf32> to vector<1x32xf32>
    %527 = vector.broadcast %526 : vector<1x32xf32> to vector<8x32xf32>
    %528 = arith.addf %525, %527 : vector<8x32xf32>
    %cst_181 = arith.constant 0.353553385 : f32
    %529 = vector.broadcast %cst_181 : f32 to vector<8x32xf32>
    %530 = arith.mulf %528, %529 : vector<8x32xf32>
    %531 = vector.extract_strided_slice %524 {offsets = [0, 32], sizes = [8, 32], strides = [1, 1]} : vector<8x96xf32> to vector<8x32xf32>
    %532 = vector.extract_strided_slice %495 {offsets = [1, 0], sizes = [1, 32], strides = [1, 1]} : vector<9x32xf32> to vector<1x32xf32>
    %533 = vector.broadcast %532 : vector<1x32xf32> to vector<8x32xf32>
    %534 = arith.addf %531, %533 : vector<8x32xf32>
    %535 = vector.extract_strided_slice %524 {offsets = [0, 64], sizes = [8, 32], strides = [1, 1]} : vector<8x96xf32> to vector<8x32xf32>
    %536 = vector.extract_strided_slice %495 {offsets = [2, 0], sizes = [1, 32], strides = [1, 1]} : vector<9x32xf32> to vector<1x32xf32>
    %537 = vector.broadcast %536 : vector<1x32xf32> to vector<8x32xf32>
    %538 = arith.addf %535, %537 : vector<8x32xf32>
    %cst_182 = arith.constant 0.000000e+00 : f32
    %539 = vector.broadcast %cst_182 : f32 to vector<8x32xf32>
    %540 = vector.extract_strided_slice %530 {offsets = [0, 0], sizes = [8, 8], strides = [1, 1]} : vector<8x32xf32> to vector<8x8xf32>
    %541 = vector.extract_strided_slice %534 {offsets = [0, 0], sizes = [8, 8], strides = [1, 1]} : vector<8x32xf32> to vector<8x8xf32>
    %cst_183 = arith.constant dense<0.000000e+00> : vector<8x8xf32>
    %542 = tpu.matmul %540, %541, %cst_183 {dimension_numbers = #tpu.dot_dimension_numbers<[1], [1], [0], [0], [0, 0, 1, 0], [], []>} : vector<8x8xf32>, vector<8x8xf32>, vector<8x8xf32> -> vector<8x8xf32>
    %cst_184 = arith.constant dense<0xFF800000> : vector<8xf32>
    %543 = vector.multi_reduction <maximumf>, %542, %cst_184 [1] : vector<8x8xf32> to vector<8xf32>
    %544 = vector.shape_cast %543 : vector<8xf32> to vector<8x1xf32>
    %545 = vector.broadcast %544 : vector<8x1xf32> to vector<8x8xf32>
    %546 = arith.subf %542, %545 : vector<8x8xf32>
    %547 = math.exp %546 : vector<8x8xf32>
    %cst_185 = arith.constant dense<0.000000e+00> : vector<8xf32>
    %548 = vector.multi_reduction <add>, %547, %cst_185 [1] : vector<8x8xf32> to vector<8xf32>
    %549 = vector.shape_cast %548 : vector<8xf32> to vector<8x1xf32>
    %550 = tpu.reciprocal %549 {approx = true} : vector<8x1xf32> -> vector<8x1xf32>
    %551 = vector.broadcast %550 : vector<8x1xf32> to vector<8x8xf32>
    %552 = arith.mulf %547, %551 : vector<8x8xf32>
    %553 = vector.extract_strided_slice %538 {offsets = [0, 0], sizes = [8, 8], strides = [1, 1]} : vector<8x32xf32> to vector<8x8xf32>
    %cst_186 = arith.constant dense<0.000000e+00> : vector<8x8xf32>
    %554 = tpu.matmul %552, %553, %cst_186 {dimension_numbers = #tpu.dot_dimension_numbers<[1], [0], [0], [1], [0, 0, 1, 1], [], []>} : vector<8x8xf32>, vector<8x8xf32>, vector<8x8xf32> -> vector<8x8xf32>
    %555 = vector.extract_strided_slice %497 {offsets = [0, 0], sizes = [8, 32], strides = [1, 1]} : vector<32x32xf32> to vector<8x32xf32>
    %cst_187 = arith.constant dense<0.000000e+00> : vector<8x32xf32>
    %556 = tpu.matmul %554, %555, %cst_187 {dimension_numbers = #tpu.dot_dimension_numbers<[1], [0], [0], [1], [0, 0, 1, 1], [], []>} : vector<8x8xf32>, vector<8x32xf32>, vector<8x32xf32> -> vector<8x32xf32>
    %557 = arith.addf %539, %556 : vector<8x32xf32>
    %558 = vector.extract_strided_slice %530 {offsets = [0, 8], sizes = [8, 8], strides = [1, 1]} : vector<8x32xf32> to vector<8x8xf32>
    %559 = vector.extract_strided_slice %534 {offsets = [0, 8], sizes = [8, 8], strides = [1, 1]} : vector<8x32xf32> to vector<8x8xf32>
    %cst_188 = arith.constant dense<0.000000e+00> : vector<8x8xf32>
    %560 = tpu.matmul %558, %559, %cst_188 {dimension_numbers = #tpu.dot_dimension_numbers<[1], [1], [0], [0], [0, 0, 1, 0], [], []>} : vector<8x8xf32>, vector<8x8xf32>, vector<8x8xf32> -> vector<8x8xf32>
    %cst_189 = arith.constant dense<0xFF800000> : vector<8xf32>
    %561 = vector.multi_reduction <maximumf>, %560, %cst_189 [1] : vector<8x8xf32> to vector<8xf32>
    %562 = vector.shape_cast %561 : vector<8xf32> to vector<8x1xf32>
    %563 = vector.broadcast %562 : vector<8x1xf32> to vector<8x8xf32>
    %564 = arith.subf %560, %563 : vector<8x8xf32>
    %565 = math.exp %564 : vector<8x8xf32>
    %cst_190 = arith.constant dense<0.000000e+00> : vector<8xf32>
    %566 = vector.multi_reduction <add>, %565, %cst_190 [1] : vector<8x8xf32> to vector<8xf32>
    %567 = vector.shape_cast %566 : vector<8xf32> to vector<8x1xf32>
    %568 = tpu.reciprocal %567 {approx = true} : vector<8x1xf32> -> vector<8x1xf32>
    %569 = vector.broadcast %568 : vector<8x1xf32> to vector<8x8xf32>
    %570 = arith.mulf %565, %569 : vector<8x8xf32>
    %571 = vector.extract_strided_slice %538 {offsets = [0, 8], sizes = [8, 8], strides = [1, 1]} : vector<8x32xf32> to vector<8x8xf32>
    %cst_191 = arith.constant dense<0.000000e+00> : vector<8x8xf32>
    %572 = tpu.matmul %570, %571, %cst_191 {dimension_numbers = #tpu.dot_dimension_numbers<[1], [0], [0], [1], [0, 0, 1, 1], [], []>} : vector<8x8xf32>, vector<8x8xf32>, vector<8x8xf32> -> vector<8x8xf32>
    %573 = vector.extract_strided_slice %497 {offsets = [8, 0], sizes = [8, 32], strides = [1, 1]} : vector<32x32xf32> to vector<8x32xf32>
    %cst_192 = arith.constant dense<0.000000e+00> : vector<8x32xf32>
    %574 = tpu.matmul %572, %573, %cst_192 {dimension_numbers = #tpu.dot_dimension_numbers<[1], [0], [0], [1], [0, 0, 1, 1], [], []>} : vector<8x8xf32>, vector<8x32xf32>, vector<8x32xf32> -> vector<8x32xf32>
    %575 = arith.addf %557, %574 : vector<8x32xf32>
    %576 = vector.extract_strided_slice %530 {offsets = [0, 16], sizes = [8, 8], strides = [1, 1]} : vector<8x32xf32> to vector<8x8xf32>
    %577 = vector.extract_strided_slice %534 {offsets = [0, 16], sizes = [8, 8], strides = [1, 1]} : vector<8x32xf32> to vector<8x8xf32>
    %cst_193 = arith.constant dense<0.000000e+00> : vector<8x8xf32>
    %578 = tpu.matmul %576, %577, %cst_193 {dimension_numbers = #tpu.dot_dimension_numbers<[1], [1], [0], [0], [0, 0, 1, 0], [], []>} : vector<8x8xf32>, vector<8x8xf32>, vector<8x8xf32> -> vector<8x8xf32>
    %cst_194 = arith.constant dense<0xFF800000> : vector<8xf32>
    %579 = vector.multi_reduction <maximumf>, %578, %cst_194 [1] : vector<8x8xf32> to vector<8xf32>
    %580 = vector.shape_cast %579 : vector<8xf32> to vector<8x1xf32>
    %581 = vector.broadcast %580 : vector<8x1xf32> to vector<8x8xf32>
    %582 = arith.subf %578, %581 : vector<8x8xf32>
    %583 = math.exp %582 : vector<8x8xf32>
    %cst_195 = arith.constant dense<0.000000e+00> : vector<8xf32>
    %584 = vector.multi_reduction <add>, %583, %cst_195 [1] : vector<8x8xf32> to vector<8xf32>
    %585 = vector.shape_cast %584 : vector<8xf32> to vector<8x1xf32>
    %586 = tpu.reciprocal %585 {approx = true} : vector<8x1xf32> -> vector<8x1xf32>
    %587 = vector.broadcast %586 : vector<8x1xf32> to vector<8x8xf32>
    %588 = arith.mulf %583, %587 : vector<8x8xf32>
    %589 = vector.extract_strided_slice %538 {offsets = [0, 16], sizes = [8, 8], strides = [1, 1]} : vector<8x32xf32> to vector<8x8xf32>
    %cst_196 = arith.constant dense<0.000000e+00> : vector<8x8xf32>
    %590 = tpu.matmul %588, %589, %cst_196 {dimension_numbers = #tpu.dot_dimension_numbers<[1], [0], [0], [1], [0, 0, 1, 1], [], []>} : vector<8x8xf32>, vector<8x8xf32>, vector<8x8xf32> -> vector<8x8xf32>
    %591 = vector.extract_strided_slice %497 {offsets = [16, 0], sizes = [8, 32], strides = [1, 1]} : vector<32x32xf32> to vector<8x32xf32>
    %cst_197 = arith.constant dense<0.000000e+00> : vector<8x32xf32>
    %592 = tpu.matmul %590, %591, %cst_197 {dimension_numbers = #tpu.dot_dimension_numbers<[1], [0], [0], [1], [0, 0, 1, 1], [], []>} : vector<8x8xf32>, vector<8x32xf32>, vector<8x32xf32> -> vector<8x32xf32>
    %593 = arith.addf %575, %592 : vector<8x32xf32>
    %594 = vector.extract_strided_slice %530 {offsets = [0, 24], sizes = [8, 8], strides = [1, 1]} : vector<8x32xf32> to vector<8x8xf32>
    %595 = vector.extract_strided_slice %534 {offsets = [0, 24], sizes = [8, 8], strides = [1, 1]} : vector<8x32xf32> to vector<8x8xf32>
    %cst_198 = arith.constant dense<0.000000e+00> : vector<8x8xf32>
    %596 = tpu.matmul %594, %595, %cst_198 {dimension_numbers = #tpu.dot_dimension_numbers<[1], [1], [0], [0], [0, 0, 1, 0], [], []>} : vector<8x8xf32>, vector<8x8xf32>, vector<8x8xf32> -> vector<8x8xf32>
    %cst_199 = arith.constant dense<0xFF800000> : vector<8xf32>
    %597 = vector.multi_reduction <maximumf>, %596, %cst_199 [1] : vector<8x8xf32> to vector<8xf32>
    %598 = vector.shape_cast %597 : vector<8xf32> to vector<8x1xf32>
    %599 = vector.broadcast %598 : vector<8x1xf32> to vector<8x8xf32>
    %600 = arith.subf %596, %599 : vector<8x8xf32>
    %601 = math.exp %600 : vector<8x8xf32>
    %cst_200 = arith.constant dense<0.000000e+00> : vector<8xf32>
    %602 = vector.multi_reduction <add>, %601, %cst_200 [1] : vector<8x8xf32> to vector<8xf32>
    %603 = vector.shape_cast %602 : vector<8xf32> to vector<8x1xf32>
    %604 = tpu.reciprocal %603 {approx = true} : vector<8x1xf32> -> vector<8x1xf32>
    %605 = vector.broadcast %604 : vector<8x1xf32> to vector<8x8xf32>
    %606 = arith.mulf %601, %605 : vector<8x8xf32>
    %607 = vector.extract_strided_slice %538 {offsets = [0, 24], sizes = [8, 8], strides = [1, 1]} : vector<8x32xf32> to vector<8x8xf32>
    %cst_201 = arith.constant dense<0.000000e+00> : vector<8x8xf32>
    %608 = tpu.matmul %606, %607, %cst_201 {dimension_numbers = #tpu.dot_dimension_numbers<[1], [0], [0], [1], [0, 0, 1, 1], [], []>} : vector<8x8xf32>, vector<8x8xf32>, vector<8x8xf32> -> vector<8x8xf32>
    %609 = vector.extract_strided_slice %497 {offsets = [24, 0], sizes = [8, 32], strides = [1, 1]} : vector<32x32xf32> to vector<8x32xf32>
    %cst_202 = arith.constant dense<0.000000e+00> : vector<8x32xf32>
    %610 = tpu.matmul %608, %609, %cst_202 {dimension_numbers = #tpu.dot_dimension_numbers<[1], [0], [0], [1], [0, 0, 1, 1], [], []>} : vector<8x8xf32>, vector<8x32xf32>, vector<8x32xf32> -> vector<8x32xf32>
    %611 = arith.addf %593, %610 : vector<8x32xf32>
    %612 = arith.addf %493, %611 : vector<8x32xf32>
    %613 = vector.extract_strided_slice %495 {offsets = [3, 0], sizes = [1, 32], strides = [1, 1]} : vector<9x32xf32> to vector<1x32xf32>
    %614 = vector.broadcast %613 : vector<1x32xf32> to vector<8x32xf32>
    %615 = arith.addf %612, %614 : vector<8x32xf32>
    %616 = vector.extract_strided_slice %495 {offsets = [6, 0], sizes = [1, 32], strides = [1, 1]} : vector<9x32xf32> to vector<1x32xf32>
    %617 = vector.extract_strided_slice %495 {offsets = [7, 0], sizes = [1, 32], strides = [1, 1]} : vector<9x32xf32> to vector<1x32xf32>
    %cst_203 = arith.constant dense<0.000000e+00> : vector<8xf32>
    %618 = vector.multi_reduction <add>, %615, %cst_203 [1] : vector<8x32xf32> to vector<8xf32>
    %619 = vector.shape_cast %618 : vector<8xf32> to vector<8x1xf32>
    %cst_204 = arith.constant 3.200000e+01 : f32
    %620 = vector.broadcast %cst_204 : f32 to vector<8x1xf32>
    %621 = arith.divf %619, %620 : vector<8x1xf32>
    %622 = vector.broadcast %621 : vector<8x1xf32> to vector<8x32xf32>
    %623 = arith.subf %615, %622 : vector<8x32xf32>
    %624 = arith.mulf %623, %623 : vector<8x32xf32>
    %cst_205 = arith.constant dense<0.000000e+00> : vector<8xf32>
    %625 = vector.multi_reduction <add>, %624, %cst_205 [1] : vector<8x32xf32> to vector<8xf32>
    %626 = vector.shape_cast %625 : vector<8xf32> to vector<8x1xf32>
    %cst_206 = arith.constant 3.200000e+01 : f32
    %627 = vector.broadcast %cst_206 : f32 to vector<8x1xf32>
    %628 = arith.divf %626, %627 : vector<8x1xf32>
    %629 = vector.broadcast %621 : vector<8x1xf32> to vector<8x32xf32>
    %630 = arith.subf %615, %629 : vector<8x32xf32>
    %cst_207 = arith.constant 9.99999974E-6 : f32
    %631 = vector.broadcast %cst_207 : f32 to vector<8x1xf32>
    %632 = arith.addf %628, %631 : vector<8x1xf32>
    %633 = math.rsqrt %632 : vector<8x1xf32>
    %634 = vector.broadcast %633 : vector<8x1xf32> to vector<8x32xf32>
    %635 = arith.mulf %630, %634 : vector<8x32xf32>
    %636 = vector.broadcast %616 : vector<1x32xf32> to vector<8x32xf32>
    %637 = arith.mulf %635, %636 : vector<8x32xf32>
    %638 = vector.broadcast %617 : vector<1x32xf32> to vector<8x32xf32>
    %639 = arith.addf %637, %638 : vector<8x32xf32>
    %c3_208 = arith.constant 3 : index
    %c0_209 = arith.constant 0 : index
    %c0_210 = arith.constant 0 : index
    %640 = vector.load %arg6[%c3_208, %c0_209, %c0_210] : memref<6x32x128xf32, #tpu.memory_space<vmem>>, vector<1x32x128xf32>
    %641 = vector.shape_cast %640 : vector<1x32x128xf32> to vector<32x128xf32>
    %cst_211 = arith.constant dense<0.000000e+00> : vector<8x128xf32>
    %642 = tpu.matmul %639, %641, %cst_211 {dimension_numbers = #tpu.dot_dimension_numbers<[1], [0], [0], [1], [0, 0, 1, 1], [], []>} : vector<8x32xf32>, vector<32x128xf32>, vector<8x128xf32> -> vector<8x128xf32>
    %c3_212 = arith.constant 3 : index
    %c0_213 = arith.constant 0 : index
    %c0_214 = arith.constant 0 : index
    %643 = vector.load %arg9[%c3_212, %c0_213, %c0_214] : memref<6x1x128xf32, #tpu.memory_space<vmem>>, vector<1x1x128xf32>
    %644 = vector.shape_cast %643 : vector<1x1x128xf32> to vector<1x128xf32>
    %645 = vector.broadcast %644 : vector<1x128xf32> to vector<8x128xf32>
    %646 = arith.addf %642, %645 : vector<8x128xf32>
    %cst_215 = arith.constant 0.000000e+00 : f32
    %647 = vector.broadcast %cst_215 : f32 to vector<8x128xf32>
    %648 = arith.maximumf %646, %647 : vector<8x128xf32>
    %c3_216 = arith.constant 3 : index
    %c0_217 = arith.constant 0 : index
    %c0_218 = arith.constant 0 : index
    %649 = vector.load %arg7[%c3_216, %c0_217, %c0_218] : memref<6x128x32xf32, #tpu.memory_space<vmem>>, vector<1x128x32xf32>
    %650 = vector.shape_cast %649 : vector<1x128x32xf32> to vector<128x32xf32>
    %cst_219 = arith.constant dense<0.000000e+00> : vector<8x32xf32>
    %651 = tpu.matmul %648, %650, %cst_219 {dimension_numbers = #tpu.dot_dimension_numbers<[1], [0], [0], [1], [0, 0, 1, 1], [], []>} : vector<8x128xf32>, vector<128x32xf32>, vector<8x32xf32> -> vector<8x32xf32>
    %652 = arith.addf %615, %651 : vector<8x32xf32>
    %653 = vector.extract_strided_slice %495 {offsets = [8, 0], sizes = [1, 32], strides = [1, 1]} : vector<9x32xf32> to vector<1x32xf32>
    %654 = vector.broadcast %653 : vector<1x32xf32> to vector<8x32xf32>
    %655 = arith.addf %652, %654 : vector<8x32xf32>
    %c4 = arith.constant 4 : index
    %c0_220 = arith.constant 0 : index
    %c0_221 = arith.constant 0 : index
    %656 = vector.load %arg8[%c4, %c0_220, %c0_221] : memref<6x9x32xf32, #tpu.memory_space<vmem>>, vector<1x9x32xf32>
    %657 = vector.shape_cast %656 : vector<1x9x32xf32> to vector<9x32xf32>
    %c4_222 = arith.constant 4 : index
    %c0_223 = arith.constant 0 : index
    %c0_224 = arith.constant 0 : index
    %658 = vector.load %arg5[%c4_222, %c0_223, %c0_224] : memref<6x32x32xf32, #tpu.memory_space<vmem>>, vector<1x32x32xf32>
    %659 = vector.shape_cast %658 : vector<1x32x32xf32> to vector<32x32xf32>
    %660 = vector.extract_strided_slice %657 {offsets = [4, 0], sizes = [1, 32], strides = [1, 1]} : vector<9x32xf32> to vector<1x32xf32>
    %661 = vector.extract_strided_slice %657 {offsets = [5, 0], sizes = [1, 32], strides = [1, 1]} : vector<9x32xf32> to vector<1x32xf32>
    %cst_225 = arith.constant dense<0.000000e+00> : vector<8xf32>
    %662 = vector.multi_reduction <add>, %655, %cst_225 [1] : vector<8x32xf32> to vector<8xf32>
    %663 = vector.shape_cast %662 : vector<8xf32> to vector<8x1xf32>
    %cst_226 = arith.constant 3.200000e+01 : f32
    %664 = vector.broadcast %cst_226 : f32 to vector<8x1xf32>
    %665 = arith.divf %663, %664 : vector<8x1xf32>
    %666 = vector.broadcast %665 : vector<8x1xf32> to vector<8x32xf32>
    %667 = arith.subf %655, %666 : vector<8x32xf32>
    %668 = arith.mulf %667, %667 : vector<8x32xf32>
    %cst_227 = arith.constant dense<0.000000e+00> : vector<8xf32>
    %669 = vector.multi_reduction <add>, %668, %cst_227 [1] : vector<8x32xf32> to vector<8xf32>
    %670 = vector.shape_cast %669 : vector<8xf32> to vector<8x1xf32>
    %cst_228 = arith.constant 3.200000e+01 : f32
    %671 = vector.broadcast %cst_228 : f32 to vector<8x1xf32>
    %672 = arith.divf %670, %671 : vector<8x1xf32>
    %673 = vector.broadcast %665 : vector<8x1xf32> to vector<8x32xf32>
    %674 = arith.subf %655, %673 : vector<8x32xf32>
    %cst_229 = arith.constant 9.99999974E-6 : f32
    %675 = vector.broadcast %cst_229 : f32 to vector<8x1xf32>
    %676 = arith.addf %672, %675 : vector<8x1xf32>
    %677 = math.rsqrt %676 : vector<8x1xf32>
    %678 = vector.broadcast %677 : vector<8x1xf32> to vector<8x32xf32>
    %679 = arith.mulf %674, %678 : vector<8x32xf32>
    %680 = vector.broadcast %660 : vector<1x32xf32> to vector<8x32xf32>
    %681 = arith.mulf %679, %680 : vector<8x32xf32>
    %682 = vector.broadcast %661 : vector<1x32xf32> to vector<8x32xf32>
    %683 = arith.addf %681, %682 : vector<8x32xf32>
    %c4_230 = arith.constant 4 : index
    %c0_231 = arith.constant 0 : index
    %c0_232 = arith.constant 0 : index
    %684 = vector.load %arg4[%c4_230, %c0_231, %c0_232] : memref<6x32x96xf32, #tpu.memory_space<vmem>>, vector<1x32x96xf32>
    %685 = vector.shape_cast %684 : vector<1x32x96xf32> to vector<32x96xf32>
    %cst_233 = arith.constant dense<0.000000e+00> : vector<8x96xf32>
    %686 = tpu.matmul %683, %685, %cst_233 {dimension_numbers = #tpu.dot_dimension_numbers<[1], [0], [0], [1], [0, 0, 1, 1], [], []>} : vector<8x32xf32>, vector<32x96xf32>, vector<8x96xf32> -> vector<8x96xf32>
    %687 = vector.extract_strided_slice %686 {offsets = [0, 0], sizes = [8, 32], strides = [1, 1]} : vector<8x96xf32> to vector<8x32xf32>
    %688 = vector.extract_strided_slice %657 {offsets = [0, 0], sizes = [1, 32], strides = [1, 1]} : vector<9x32xf32> to vector<1x32xf32>
    %689 = vector.broadcast %688 : vector<1x32xf32> to vector<8x32xf32>
    %690 = arith.addf %687, %689 : vector<8x32xf32>
    %cst_234 = arith.constant 0.353553385 : f32
    %691 = vector.broadcast %cst_234 : f32 to vector<8x32xf32>
    %692 = arith.mulf %690, %691 : vector<8x32xf32>
    %693 = vector.extract_strided_slice %686 {offsets = [0, 32], sizes = [8, 32], strides = [1, 1]} : vector<8x96xf32> to vector<8x32xf32>
    %694 = vector.extract_strided_slice %657 {offsets = [1, 0], sizes = [1, 32], strides = [1, 1]} : vector<9x32xf32> to vector<1x32xf32>
    %695 = vector.broadcast %694 : vector<1x32xf32> to vector<8x32xf32>
    %696 = arith.addf %693, %695 : vector<8x32xf32>
    %697 = vector.extract_strided_slice %686 {offsets = [0, 64], sizes = [8, 32], strides = [1, 1]} : vector<8x96xf32> to vector<8x32xf32>
    %698 = vector.extract_strided_slice %657 {offsets = [2, 0], sizes = [1, 32], strides = [1, 1]} : vector<9x32xf32> to vector<1x32xf32>
    %699 = vector.broadcast %698 : vector<1x32xf32> to vector<8x32xf32>
    %700 = arith.addf %697, %699 : vector<8x32xf32>
    %cst_235 = arith.constant 0.000000e+00 : f32
    %701 = vector.broadcast %cst_235 : f32 to vector<8x32xf32>
    %702 = vector.extract_strided_slice %692 {offsets = [0, 0], sizes = [8, 8], strides = [1, 1]} : vector<8x32xf32> to vector<8x8xf32>
    %703 = vector.extract_strided_slice %696 {offsets = [0, 0], sizes = [8, 8], strides = [1, 1]} : vector<8x32xf32> to vector<8x8xf32>
    %cst_236 = arith.constant dense<0.000000e+00> : vector<8x8xf32>
    %704 = tpu.matmul %702, %703, %cst_236 {dimension_numbers = #tpu.dot_dimension_numbers<[1], [1], [0], [0], [0, 0, 1, 0], [], []>} : vector<8x8xf32>, vector<8x8xf32>, vector<8x8xf32> -> vector<8x8xf32>
    %cst_237 = arith.constant dense<0xFF800000> : vector<8xf32>
    %705 = vector.multi_reduction <maximumf>, %704, %cst_237 [1] : vector<8x8xf32> to vector<8xf32>
    %706 = vector.shape_cast %705 : vector<8xf32> to vector<8x1xf32>
    %707 = vector.broadcast %706 : vector<8x1xf32> to vector<8x8xf32>
    %708 = arith.subf %704, %707 : vector<8x8xf32>
    %709 = math.exp %708 : vector<8x8xf32>
    %cst_238 = arith.constant dense<0.000000e+00> : vector<8xf32>
    %710 = vector.multi_reduction <add>, %709, %cst_238 [1] : vector<8x8xf32> to vector<8xf32>
    %711 = vector.shape_cast %710 : vector<8xf32> to vector<8x1xf32>
    %712 = tpu.reciprocal %711 {approx = true} : vector<8x1xf32> -> vector<8x1xf32>
    %713 = vector.broadcast %712 : vector<8x1xf32> to vector<8x8xf32>
    %714 = arith.mulf %709, %713 : vector<8x8xf32>
    %715 = vector.extract_strided_slice %700 {offsets = [0, 0], sizes = [8, 8], strides = [1, 1]} : vector<8x32xf32> to vector<8x8xf32>
    %cst_239 = arith.constant dense<0.000000e+00> : vector<8x8xf32>
    %716 = tpu.matmul %714, %715, %cst_239 {dimension_numbers = #tpu.dot_dimension_numbers<[1], [0], [0], [1], [0, 0, 1, 1], [], []>} : vector<8x8xf32>, vector<8x8xf32>, vector<8x8xf32> -> vector<8x8xf32>
    %717 = vector.extract_strided_slice %659 {offsets = [0, 0], sizes = [8, 32], strides = [1, 1]} : vector<32x32xf32> to vector<8x32xf32>
    %cst_240 = arith.constant dense<0.000000e+00> : vector<8x32xf32>
    %718 = tpu.matmul %716, %717, %cst_240 {dimension_numbers = #tpu.dot_dimension_numbers<[1], [0], [0], [1], [0, 0, 1, 1], [], []>} : vector<8x8xf32>, vector<8x32xf32>, vector<8x32xf32> -> vector<8x32xf32>
    %719 = arith.addf %701, %718 : vector<8x32xf32>
    %720 = vector.extract_strided_slice %692 {offsets = [0, 8], sizes = [8, 8], strides = [1, 1]} : vector<8x32xf32> to vector<8x8xf32>
    %721 = vector.extract_strided_slice %696 {offsets = [0, 8], sizes = [8, 8], strides = [1, 1]} : vector<8x32xf32> to vector<8x8xf32>
    %cst_241 = arith.constant dense<0.000000e+00> : vector<8x8xf32>
    %722 = tpu.matmul %720, %721, %cst_241 {dimension_numbers = #tpu.dot_dimension_numbers<[1], [1], [0], [0], [0, 0, 1, 0], [], []>} : vector<8x8xf32>, vector<8x8xf32>, vector<8x8xf32> -> vector<8x8xf32>
    %cst_242 = arith.constant dense<0xFF800000> : vector<8xf32>
    %723 = vector.multi_reduction <maximumf>, %722, %cst_242 [1] : vector<8x8xf32> to vector<8xf32>
    %724 = vector.shape_cast %723 : vector<8xf32> to vector<8x1xf32>
    %725 = vector.broadcast %724 : vector<8x1xf32> to vector<8x8xf32>
    %726 = arith.subf %722, %725 : vector<8x8xf32>
    %727 = math.exp %726 : vector<8x8xf32>
    %cst_243 = arith.constant dense<0.000000e+00> : vector<8xf32>
    %728 = vector.multi_reduction <add>, %727, %cst_243 [1] : vector<8x8xf32> to vector<8xf32>
    %729 = vector.shape_cast %728 : vector<8xf32> to vector<8x1xf32>
    %730 = tpu.reciprocal %729 {approx = true} : vector<8x1xf32> -> vector<8x1xf32>
    %731 = vector.broadcast %730 : vector<8x1xf32> to vector<8x8xf32>
    %732 = arith.mulf %727, %731 : vector<8x8xf32>
    %733 = vector.extract_strided_slice %700 {offsets = [0, 8], sizes = [8, 8], strides = [1, 1]} : vector<8x32xf32> to vector<8x8xf32>
    %cst_244 = arith.constant dense<0.000000e+00> : vector<8x8xf32>
    %734 = tpu.matmul %732, %733, %cst_244 {dimension_numbers = #tpu.dot_dimension_numbers<[1], [0], [0], [1], [0, 0, 1, 1], [], []>} : vector<8x8xf32>, vector<8x8xf32>, vector<8x8xf32> -> vector<8x8xf32>
    %735 = vector.extract_strided_slice %659 {offsets = [8, 0], sizes = [8, 32], strides = [1, 1]} : vector<32x32xf32> to vector<8x32xf32>
    %cst_245 = arith.constant dense<0.000000e+00> : vector<8x32xf32>
    %736 = tpu.matmul %734, %735, %cst_245 {dimension_numbers = #tpu.dot_dimension_numbers<[1], [0], [0], [1], [0, 0, 1, 1], [], []>} : vector<8x8xf32>, vector<8x32xf32>, vector<8x32xf32> -> vector<8x32xf32>
    %737 = arith.addf %719, %736 : vector<8x32xf32>
    %738 = vector.extract_strided_slice %692 {offsets = [0, 16], sizes = [8, 8], strides = [1, 1]} : vector<8x32xf32> to vector<8x8xf32>
    %739 = vector.extract_strided_slice %696 {offsets = [0, 16], sizes = [8, 8], strides = [1, 1]} : vector<8x32xf32> to vector<8x8xf32>
    %cst_246 = arith.constant dense<0.000000e+00> : vector<8x8xf32>
    %740 = tpu.matmul %738, %739, %cst_246 {dimension_numbers = #tpu.dot_dimension_numbers<[1], [1], [0], [0], [0, 0, 1, 0], [], []>} : vector<8x8xf32>, vector<8x8xf32>, vector<8x8xf32> -> vector<8x8xf32>
    %cst_247 = arith.constant dense<0xFF800000> : vector<8xf32>
    %741 = vector.multi_reduction <maximumf>, %740, %cst_247 [1] : vector<8x8xf32> to vector<8xf32>
    %742 = vector.shape_cast %741 : vector<8xf32> to vector<8x1xf32>
    %743 = vector.broadcast %742 : vector<8x1xf32> to vector<8x8xf32>
    %744 = arith.subf %740, %743 : vector<8x8xf32>
    %745 = math.exp %744 : vector<8x8xf32>
    %cst_248 = arith.constant dense<0.000000e+00> : vector<8xf32>
    %746 = vector.multi_reduction <add>, %745, %cst_248 [1] : vector<8x8xf32> to vector<8xf32>
    %747 = vector.shape_cast %746 : vector<8xf32> to vector<8x1xf32>
    %748 = tpu.reciprocal %747 {approx = true} : vector<8x1xf32> -> vector<8x1xf32>
    %749 = vector.broadcast %748 : vector<8x1xf32> to vector<8x8xf32>
    %750 = arith.mulf %745, %749 : vector<8x8xf32>
    %751 = vector.extract_strided_slice %700 {offsets = [0, 16], sizes = [8, 8], strides = [1, 1]} : vector<8x32xf32> to vector<8x8xf32>
    %cst_249 = arith.constant dense<0.000000e+00> : vector<8x8xf32>
    %752 = tpu.matmul %750, %751, %cst_249 {dimension_numbers = #tpu.dot_dimension_numbers<[1], [0], [0], [1], [0, 0, 1, 1], [], []>} : vector<8x8xf32>, vector<8x8xf32>, vector<8x8xf32> -> vector<8x8xf32>
    %753 = vector.extract_strided_slice %659 {offsets = [16, 0], sizes = [8, 32], strides = [1, 1]} : vector<32x32xf32> to vector<8x32xf32>
    %cst_250 = arith.constant dense<0.000000e+00> : vector<8x32xf32>
    %754 = tpu.matmul %752, %753, %cst_250 {dimension_numbers = #tpu.dot_dimension_numbers<[1], [0], [0], [1], [0, 0, 1, 1], [], []>} : vector<8x8xf32>, vector<8x32xf32>, vector<8x32xf32> -> vector<8x32xf32>
    %755 = arith.addf %737, %754 : vector<8x32xf32>
    %756 = vector.extract_strided_slice %692 {offsets = [0, 24], sizes = [8, 8], strides = [1, 1]} : vector<8x32xf32> to vector<8x8xf32>
    %757 = vector.extract_strided_slice %696 {offsets = [0, 24], sizes = [8, 8], strides = [1, 1]} : vector<8x32xf32> to vector<8x8xf32>
    %cst_251 = arith.constant dense<0.000000e+00> : vector<8x8xf32>
    %758 = tpu.matmul %756, %757, %cst_251 {dimension_numbers = #tpu.dot_dimension_numbers<[1], [1], [0], [0], [0, 0, 1, 0], [], []>} : vector<8x8xf32>, vector<8x8xf32>, vector<8x8xf32> -> vector<8x8xf32>
    %cst_252 = arith.constant dense<0xFF800000> : vector<8xf32>
    %759 = vector.multi_reduction <maximumf>, %758, %cst_252 [1] : vector<8x8xf32> to vector<8xf32>
    %760 = vector.shape_cast %759 : vector<8xf32> to vector<8x1xf32>
    %761 = vector.broadcast %760 : vector<8x1xf32> to vector<8x8xf32>
    %762 = arith.subf %758, %761 : vector<8x8xf32>
    %763 = math.exp %762 : vector<8x8xf32>
    %cst_253 = arith.constant dense<0.000000e+00> : vector<8xf32>
    %764 = vector.multi_reduction <add>, %763, %cst_253 [1] : vector<8x8xf32> to vector<8xf32>
    %765 = vector.shape_cast %764 : vector<8xf32> to vector<8x1xf32>
    %766 = tpu.reciprocal %765 {approx = true} : vector<8x1xf32> -> vector<8x1xf32>
    %767 = vector.broadcast %766 : vector<8x1xf32> to vector<8x8xf32>
    %768 = arith.mulf %763, %767 : vector<8x8xf32>
    %769 = vector.extract_strided_slice %700 {offsets = [0, 24], sizes = [8, 8], strides = [1, 1]} : vector<8x32xf32> to vector<8x8xf32>
    %cst_254 = arith.constant dense<0.000000e+00> : vector<8x8xf32>
    %770 = tpu.matmul %768, %769, %cst_254 {dimension_numbers = #tpu.dot_dimension_numbers<[1], [0], [0], [1], [0, 0, 1, 1], [], []>} : vector<8x8xf32>, vector<8x8xf32>, vector<8x8xf32> -> vector<8x8xf32>
    %771 = vector.extract_strided_slice %659 {offsets = [24, 0], sizes = [8, 32], strides = [1, 1]} : vector<32x32xf32> to vector<8x32xf32>
    %cst_255 = arith.constant dense<0.000000e+00> : vector<8x32xf32>
    %772 = tpu.matmul %770, %771, %cst_255 {dimension_numbers = #tpu.dot_dimension_numbers<[1], [0], [0], [1], [0, 0, 1, 1], [], []>} : vector<8x8xf32>, vector<8x32xf32>, vector<8x32xf32> -> vector<8x32xf32>
    %773 = arith.addf %755, %772 : vector<8x32xf32>
    %774 = arith.addf %655, %773 : vector<8x32xf32>
    %775 = vector.extract_strided_slice %657 {offsets = [3, 0], sizes = [1, 32], strides = [1, 1]} : vector<9x32xf32> to vector<1x32xf32>
    %776 = vector.broadcast %775 : vector<1x32xf32> to vector<8x32xf32>
    %777 = arith.addf %774, %776 : vector<8x32xf32>
    %778 = vector.extract_strided_slice %657 {offsets = [6, 0], sizes = [1, 32], strides = [1, 1]} : vector<9x32xf32> to vector<1x32xf32>
    %779 = vector.extract_strided_slice %657 {offsets = [7, 0], sizes = [1, 32], strides = [1, 1]} : vector<9x32xf32> to vector<1x32xf32>
    %cst_256 = arith.constant dense<0.000000e+00> : vector<8xf32>
    %780 = vector.multi_reduction <add>, %777, %cst_256 [1] : vector<8x32xf32> to vector<8xf32>
    %781 = vector.shape_cast %780 : vector<8xf32> to vector<8x1xf32>
    %cst_257 = arith.constant 3.200000e+01 : f32
    %782 = vector.broadcast %cst_257 : f32 to vector<8x1xf32>
    %783 = arith.divf %781, %782 : vector<8x1xf32>
    %784 = vector.broadcast %783 : vector<8x1xf32> to vector<8x32xf32>
    %785 = arith.subf %777, %784 : vector<8x32xf32>
    %786 = arith.mulf %785, %785 : vector<8x32xf32>
    %cst_258 = arith.constant dense<0.000000e+00> : vector<8xf32>
    %787 = vector.multi_reduction <add>, %786, %cst_258 [1] : vector<8x32xf32> to vector<8xf32>
    %788 = vector.shape_cast %787 : vector<8xf32> to vector<8x1xf32>
    %cst_259 = arith.constant 3.200000e+01 : f32
    %789 = vector.broadcast %cst_259 : f32 to vector<8x1xf32>
    %790 = arith.divf %788, %789 : vector<8x1xf32>
    %791 = vector.broadcast %783 : vector<8x1xf32> to vector<8x32xf32>
    %792 = arith.subf %777, %791 : vector<8x32xf32>
    %cst_260 = arith.constant 9.99999974E-6 : f32
    %793 = vector.broadcast %cst_260 : f32 to vector<8x1xf32>
    %794 = arith.addf %790, %793 : vector<8x1xf32>
    %795 = math.rsqrt %794 : vector<8x1xf32>
    %796 = vector.broadcast %795 : vector<8x1xf32> to vector<8x32xf32>
    %797 = arith.mulf %792, %796 : vector<8x32xf32>
    %798 = vector.broadcast %778 : vector<1x32xf32> to vector<8x32xf32>
    %799 = arith.mulf %797, %798 : vector<8x32xf32>
    %800 = vector.broadcast %779 : vector<1x32xf32> to vector<8x32xf32>
    %801 = arith.addf %799, %800 : vector<8x32xf32>
    %c4_261 = arith.constant 4 : index
    %c0_262 = arith.constant 0 : index
    %c0_263 = arith.constant 0 : index
    %802 = vector.load %arg6[%c4_261, %c0_262, %c0_263] : memref<6x32x128xf32, #tpu.memory_space<vmem>>, vector<1x32x128xf32>
    %803 = vector.shape_cast %802 : vector<1x32x128xf32> to vector<32x128xf32>
    %cst_264 = arith.constant dense<0.000000e+00> : vector<8x128xf32>
    %804 = tpu.matmul %801, %803, %cst_264 {dimension_numbers = #tpu.dot_dimension_numbers<[1], [0], [0], [1], [0, 0, 1, 1], [], []>} : vector<8x32xf32>, vector<32x128xf32>, vector<8x128xf32> -> vector<8x128xf32>
    %c4_265 = arith.constant 4 : index
    %c0_266 = arith.constant 0 : index
    %c0_267 = arith.constant 0 : index
    %805 = vector.load %arg9[%c4_265, %c0_266, %c0_267] : memref<6x1x128xf32, #tpu.memory_space<vmem>>, vector<1x1x128xf32>
    %806 = vector.shape_cast %805 : vector<1x1x128xf32> to vector<1x128xf32>
    %807 = vector.broadcast %806 : vector<1x128xf32> to vector<8x128xf32>
    %808 = arith.addf %804, %807 : vector<8x128xf32>
    %cst_268 = arith.constant 0.000000e+00 : f32
    %809 = vector.broadcast %cst_268 : f32 to vector<8x128xf32>
    %810 = arith.maximumf %808, %809 : vector<8x128xf32>
    %c4_269 = arith.constant 4 : index
    %c0_270 = arith.constant 0 : index
    %c0_271 = arith.constant 0 : index
    %811 = vector.load %arg7[%c4_269, %c0_270, %c0_271] : memref<6x128x32xf32, #tpu.memory_space<vmem>>, vector<1x128x32xf32>
    %812 = vector.shape_cast %811 : vector<1x128x32xf32> to vector<128x32xf32>
    %cst_272 = arith.constant dense<0.000000e+00> : vector<8x32xf32>
    %813 = tpu.matmul %810, %812, %cst_272 {dimension_numbers = #tpu.dot_dimension_numbers<[1], [0], [0], [1], [0, 0, 1, 1], [], []>} : vector<8x128xf32>, vector<128x32xf32>, vector<8x32xf32> -> vector<8x32xf32>
    %814 = arith.addf %777, %813 : vector<8x32xf32>
    %815 = vector.extract_strided_slice %657 {offsets = [8, 0], sizes = [1, 32], strides = [1, 1]} : vector<9x32xf32> to vector<1x32xf32>
    %816 = vector.broadcast %815 : vector<1x32xf32> to vector<8x32xf32>
    %817 = arith.addf %814, %816 : vector<8x32xf32>
    %c5 = arith.constant 5 : index
    %c0_273 = arith.constant 0 : index
    %c0_274 = arith.constant 0 : index
    %818 = vector.load %arg8[%c5, %c0_273, %c0_274] : memref<6x9x32xf32, #tpu.memory_space<vmem>>, vector<1x9x32xf32>
    %819 = vector.shape_cast %818 : vector<1x9x32xf32> to vector<9x32xf32>
    %c5_275 = arith.constant 5 : index
    %c0_276 = arith.constant 0 : index
    %c0_277 = arith.constant 0 : index
    %820 = vector.load %arg5[%c5_275, %c0_276, %c0_277] : memref<6x32x32xf32, #tpu.memory_space<vmem>>, vector<1x32x32xf32>
    %821 = vector.shape_cast %820 : vector<1x32x32xf32> to vector<32x32xf32>
    %822 = vector.extract_strided_slice %819 {offsets = [4, 0], sizes = [1, 32], strides = [1, 1]} : vector<9x32xf32> to vector<1x32xf32>
    %823 = vector.extract_strided_slice %819 {offsets = [5, 0], sizes = [1, 32], strides = [1, 1]} : vector<9x32xf32> to vector<1x32xf32>
    %cst_278 = arith.constant dense<0.000000e+00> : vector<8xf32>
    %824 = vector.multi_reduction <add>, %817, %cst_278 [1] : vector<8x32xf32> to vector<8xf32>
    %825 = vector.shape_cast %824 : vector<8xf32> to vector<8x1xf32>
    %cst_279 = arith.constant 3.200000e+01 : f32
    %826 = vector.broadcast %cst_279 : f32 to vector<8x1xf32>
    %827 = arith.divf %825, %826 : vector<8x1xf32>
    %828 = vector.broadcast %827 : vector<8x1xf32> to vector<8x32xf32>
    %829 = arith.subf %817, %828 : vector<8x32xf32>
    %830 = arith.mulf %829, %829 : vector<8x32xf32>
    %cst_280 = arith.constant dense<0.000000e+00> : vector<8xf32>
    %831 = vector.multi_reduction <add>, %830, %cst_280 [1] : vector<8x32xf32> to vector<8xf32>
    %832 = vector.shape_cast %831 : vector<8xf32> to vector<8x1xf32>
    %cst_281 = arith.constant 3.200000e+01 : f32
    %833 = vector.broadcast %cst_281 : f32 to vector<8x1xf32>
    %834 = arith.divf %832, %833 : vector<8x1xf32>
    %835 = vector.broadcast %827 : vector<8x1xf32> to vector<8x32xf32>
    %836 = arith.subf %817, %835 : vector<8x32xf32>
    %cst_282 = arith.constant 9.99999974E-6 : f32
    %837 = vector.broadcast %cst_282 : f32 to vector<8x1xf32>
    %838 = arith.addf %834, %837 : vector<8x1xf32>
    %839 = math.rsqrt %838 : vector<8x1xf32>
    %840 = vector.broadcast %839 : vector<8x1xf32> to vector<8x32xf32>
    %841 = arith.mulf %836, %840 : vector<8x32xf32>
    %842 = vector.broadcast %822 : vector<1x32xf32> to vector<8x32xf32>
    %843 = arith.mulf %841, %842 : vector<8x32xf32>
    %844 = vector.broadcast %823 : vector<1x32xf32> to vector<8x32xf32>
    %845 = arith.addf %843, %844 : vector<8x32xf32>
    %c5_283 = arith.constant 5 : index
    %c0_284 = arith.constant 0 : index
    %c0_285 = arith.constant 0 : index
    %846 = vector.load %arg4[%c5_283, %c0_284, %c0_285] : memref<6x32x96xf32, #tpu.memory_space<vmem>>, vector<1x32x96xf32>
    %847 = vector.shape_cast %846 : vector<1x32x96xf32> to vector<32x96xf32>
    %cst_286 = arith.constant dense<0.000000e+00> : vector<8x96xf32>
    %848 = tpu.matmul %845, %847, %cst_286 {dimension_numbers = #tpu.dot_dimension_numbers<[1], [0], [0], [1], [0, 0, 1, 1], [], []>} : vector<8x32xf32>, vector<32x96xf32>, vector<8x96xf32> -> vector<8x96xf32>
    %849 = vector.extract_strided_slice %848 {offsets = [0, 0], sizes = [8, 32], strides = [1, 1]} : vector<8x96xf32> to vector<8x32xf32>
    %850 = vector.extract_strided_slice %819 {offsets = [0, 0], sizes = [1, 32], strides = [1, 1]} : vector<9x32xf32> to vector<1x32xf32>
    %851 = vector.broadcast %850 : vector<1x32xf32> to vector<8x32xf32>
    %852 = arith.addf %849, %851 : vector<8x32xf32>
    %cst_287 = arith.constant 0.353553385 : f32
    %853 = vector.broadcast %cst_287 : f32 to vector<8x32xf32>
    %854 = arith.mulf %852, %853 : vector<8x32xf32>
    %855 = vector.extract_strided_slice %848 {offsets = [0, 32], sizes = [8, 32], strides = [1, 1]} : vector<8x96xf32> to vector<8x32xf32>
    %856 = vector.extract_strided_slice %819 {offsets = [1, 0], sizes = [1, 32], strides = [1, 1]} : vector<9x32xf32> to vector<1x32xf32>
    %857 = vector.broadcast %856 : vector<1x32xf32> to vector<8x32xf32>
    %858 = arith.addf %855, %857 : vector<8x32xf32>
    %859 = vector.extract_strided_slice %848 {offsets = [0, 64], sizes = [8, 32], strides = [1, 1]} : vector<8x96xf32> to vector<8x32xf32>
    %860 = vector.extract_strided_slice %819 {offsets = [2, 0], sizes = [1, 32], strides = [1, 1]} : vector<9x32xf32> to vector<1x32xf32>
    %861 = vector.broadcast %860 : vector<1x32xf32> to vector<8x32xf32>
    %862 = arith.addf %859, %861 : vector<8x32xf32>
    %cst_288 = arith.constant 0.000000e+00 : f32
    %863 = vector.broadcast %cst_288 : f32 to vector<8x32xf32>
    %864 = vector.extract_strided_slice %854 {offsets = [0, 0], sizes = [8, 8], strides = [1, 1]} : vector<8x32xf32> to vector<8x8xf32>
    %865 = vector.extract_strided_slice %858 {offsets = [0, 0], sizes = [8, 8], strides = [1, 1]} : vector<8x32xf32> to vector<8x8xf32>
    %cst_289 = arith.constant dense<0.000000e+00> : vector<8x8xf32>
    %866 = tpu.matmul %864, %865, %cst_289 {dimension_numbers = #tpu.dot_dimension_numbers<[1], [1], [0], [0], [0, 0, 1, 0], [], []>} : vector<8x8xf32>, vector<8x8xf32>, vector<8x8xf32> -> vector<8x8xf32>
    %cst_290 = arith.constant dense<0xFF800000> : vector<8xf32>
    %867 = vector.multi_reduction <maximumf>, %866, %cst_290 [1] : vector<8x8xf32> to vector<8xf32>
    %868 = vector.shape_cast %867 : vector<8xf32> to vector<8x1xf32>
    %869 = vector.broadcast %868 : vector<8x1xf32> to vector<8x8xf32>
    %870 = arith.subf %866, %869 : vector<8x8xf32>
    %871 = math.exp %870 : vector<8x8xf32>
    %cst_291 = arith.constant dense<0.000000e+00> : vector<8xf32>
    %872 = vector.multi_reduction <add>, %871, %cst_291 [1] : vector<8x8xf32> to vector<8xf32>
    %873 = vector.shape_cast %872 : vector<8xf32> to vector<8x1xf32>
    %874 = tpu.reciprocal %873 {approx = true} : vector<8x1xf32> -> vector<8x1xf32>
    %875 = vector.broadcast %874 : vector<8x1xf32> to vector<8x8xf32>
    %876 = arith.mulf %871, %875 : vector<8x8xf32>
    %877 = vector.extract_strided_slice %862 {offsets = [0, 0], sizes = [8, 8], strides = [1, 1]} : vector<8x32xf32> to vector<8x8xf32>
    %cst_292 = arith.constant dense<0.000000e+00> : vector<8x8xf32>
    %878 = tpu.matmul %876, %877, %cst_292 {dimension_numbers = #tpu.dot_dimension_numbers<[1], [0], [0], [1], [0, 0, 1, 1], [], []>} : vector<8x8xf32>, vector<8x8xf32>, vector<8x8xf32> -> vector<8x8xf32>
    %879 = vector.extract_strided_slice %821 {offsets = [0, 0], sizes = [8, 32], strides = [1, 1]} : vector<32x32xf32> to vector<8x32xf32>
    %cst_293 = arith.constant dense<0.000000e+00> : vector<8x32xf32>
    %880 = tpu.matmul %878, %879, %cst_293 {dimension_numbers = #tpu.dot_dimension_numbers<[1], [0], [0], [1], [0, 0, 1, 1], [], []>} : vector<8x8xf32>, vector<8x32xf32>, vector<8x32xf32> -> vector<8x32xf32>
    %881 = arith.addf %863, %880 : vector<8x32xf32>
    %882 = vector.extract_strided_slice %854 {offsets = [0, 8], sizes = [8, 8], strides = [1, 1]} : vector<8x32xf32> to vector<8x8xf32>
    %883 = vector.extract_strided_slice %858 {offsets = [0, 8], sizes = [8, 8], strides = [1, 1]} : vector<8x32xf32> to vector<8x8xf32>
    %cst_294 = arith.constant dense<0.000000e+00> : vector<8x8xf32>
    %884 = tpu.matmul %882, %883, %cst_294 {dimension_numbers = #tpu.dot_dimension_numbers<[1], [1], [0], [0], [0, 0, 1, 0], [], []>} : vector<8x8xf32>, vector<8x8xf32>, vector<8x8xf32> -> vector<8x8xf32>
    %cst_295 = arith.constant dense<0xFF800000> : vector<8xf32>
    %885 = vector.multi_reduction <maximumf>, %884, %cst_295 [1] : vector<8x8xf32> to vector<8xf32>
    %886 = vector.shape_cast %885 : vector<8xf32> to vector<8x1xf32>
    %887 = vector.broadcast %886 : vector<8x1xf32> to vector<8x8xf32>
    %888 = arith.subf %884, %887 : vector<8x8xf32>
    %889 = math.exp %888 : vector<8x8xf32>
    %cst_296 = arith.constant dense<0.000000e+00> : vector<8xf32>
    %890 = vector.multi_reduction <add>, %889, %cst_296 [1] : vector<8x8xf32> to vector<8xf32>
    %891 = vector.shape_cast %890 : vector<8xf32> to vector<8x1xf32>
    %892 = tpu.reciprocal %891 {approx = true} : vector<8x1xf32> -> vector<8x1xf32>
    %893 = vector.broadcast %892 : vector<8x1xf32> to vector<8x8xf32>
    %894 = arith.mulf %889, %893 : vector<8x8xf32>
    %895 = vector.extract_strided_slice %862 {offsets = [0, 8], sizes = [8, 8], strides = [1, 1]} : vector<8x32xf32> to vector<8x8xf32>
    %cst_297 = arith.constant dense<0.000000e+00> : vector<8x8xf32>
    %896 = tpu.matmul %894, %895, %cst_297 {dimension_numbers = #tpu.dot_dimension_numbers<[1], [0], [0], [1], [0, 0, 1, 1], [], []>} : vector<8x8xf32>, vector<8x8xf32>, vector<8x8xf32> -> vector<8x8xf32>
    %897 = vector.extract_strided_slice %821 {offsets = [8, 0], sizes = [8, 32], strides = [1, 1]} : vector<32x32xf32> to vector<8x32xf32>
    %cst_298 = arith.constant dense<0.000000e+00> : vector<8x32xf32>
    %898 = tpu.matmul %896, %897, %cst_298 {dimension_numbers = #tpu.dot_dimension_numbers<[1], [0], [0], [1], [0, 0, 1, 1], [], []>} : vector<8x8xf32>, vector<8x32xf32>, vector<8x32xf32> -> vector<8x32xf32>
    %899 = arith.addf %881, %898 : vector<8x32xf32>
    %900 = vector.extract_strided_slice %854 {offsets = [0, 16], sizes = [8, 8], strides = [1, 1]} : vector<8x32xf32> to vector<8x8xf32>
    %901 = vector.extract_strided_slice %858 {offsets = [0, 16], sizes = [8, 8], strides = [1, 1]} : vector<8x32xf32> to vector<8x8xf32>
    %cst_299 = arith.constant dense<0.000000e+00> : vector<8x8xf32>
    %902 = tpu.matmul %900, %901, %cst_299 {dimension_numbers = #tpu.dot_dimension_numbers<[1], [1], [0], [0], [0, 0, 1, 0], [], []>} : vector<8x8xf32>, vector<8x8xf32>, vector<8x8xf32> -> vector<8x8xf32>
    %cst_300 = arith.constant dense<0xFF800000> : vector<8xf32>
    %903 = vector.multi_reduction <maximumf>, %902, %cst_300 [1] : vector<8x8xf32> to vector<8xf32>
    %904 = vector.shape_cast %903 : vector<8xf32> to vector<8x1xf32>
    %905 = vector.broadcast %904 : vector<8x1xf32> to vector<8x8xf32>
    %906 = arith.subf %902, %905 : vector<8x8xf32>
    %907 = math.exp %906 : vector<8x8xf32>
    %cst_301 = arith.constant dense<0.000000e+00> : vector<8xf32>
    %908 = vector.multi_reduction <add>, %907, %cst_301 [1] : vector<8x8xf32> to vector<8xf32>
    %909 = vector.shape_cast %908 : vector<8xf32> to vector<8x1xf32>
    %910 = tpu.reciprocal %909 {approx = true} : vector<8x1xf32> -> vector<8x1xf32>
    %911 = vector.broadcast %910 : vector<8x1xf32> to vector<8x8xf32>
    %912 = arith.mulf %907, %911 : vector<8x8xf32>
    %913 = vector.extract_strided_slice %862 {offsets = [0, 16], sizes = [8, 8], strides = [1, 1]} : vector<8x32xf32> to vector<8x8xf32>
    %cst_302 = arith.constant dense<0.000000e+00> : vector<8x8xf32>
    %914 = tpu.matmul %912, %913, %cst_302 {dimension_numbers = #tpu.dot_dimension_numbers<[1], [0], [0], [1], [0, 0, 1, 1], [], []>} : vector<8x8xf32>, vector<8x8xf32>, vector<8x8xf32> -> vector<8x8xf32>
    %915 = vector.extract_strided_slice %821 {offsets = [16, 0], sizes = [8, 32], strides = [1, 1]} : vector<32x32xf32> to vector<8x32xf32>
    %cst_303 = arith.constant dense<0.000000e+00> : vector<8x32xf32>
    %916 = tpu.matmul %914, %915, %cst_303 {dimension_numbers = #tpu.dot_dimension_numbers<[1], [0], [0], [1], [0, 0, 1, 1], [], []>} : vector<8x8xf32>, vector<8x32xf32>, vector<8x32xf32> -> vector<8x32xf32>
    %917 = arith.addf %899, %916 : vector<8x32xf32>
    %918 = vector.extract_strided_slice %854 {offsets = [0, 24], sizes = [8, 8], strides = [1, 1]} : vector<8x32xf32> to vector<8x8xf32>
    %919 = vector.extract_strided_slice %858 {offsets = [0, 24], sizes = [8, 8], strides = [1, 1]} : vector<8x32xf32> to vector<8x8xf32>
    %cst_304 = arith.constant dense<0.000000e+00> : vector<8x8xf32>
    %920 = tpu.matmul %918, %919, %cst_304 {dimension_numbers = #tpu.dot_dimension_numbers<[1], [1], [0], [0], [0, 0, 1, 0], [], []>} : vector<8x8xf32>, vector<8x8xf32>, vector<8x8xf32> -> vector<8x8xf32>
    %cst_305 = arith.constant dense<0xFF800000> : vector<8xf32>
    %921 = vector.multi_reduction <maximumf>, %920, %cst_305 [1] : vector<8x8xf32> to vector<8xf32>
    %922 = vector.shape_cast %921 : vector<8xf32> to vector<8x1xf32>
    %923 = vector.broadcast %922 : vector<8x1xf32> to vector<8x8xf32>
    %924 = arith.subf %920, %923 : vector<8x8xf32>
    %925 = math.exp %924 : vector<8x8xf32>
    %cst_306 = arith.constant dense<0.000000e+00> : vector<8xf32>
    %926 = vector.multi_reduction <add>, %925, %cst_306 [1] : vector<8x8xf32> to vector<8xf32>
    %927 = vector.shape_cast %926 : vector<8xf32> to vector<8x1xf32>
    %928 = tpu.reciprocal %927 {approx = true} : vector<8x1xf32> -> vector<8x1xf32>
    %929 = vector.broadcast %928 : vector<8x1xf32> to vector<8x8xf32>
    %930 = arith.mulf %925, %929 : vector<8x8xf32>
    %931 = vector.extract_strided_slice %862 {offsets = [0, 24], sizes = [8, 8], strides = [1, 1]} : vector<8x32xf32> to vector<8x8xf32>
    %cst_307 = arith.constant dense<0.000000e+00> : vector<8x8xf32>
    %932 = tpu.matmul %930, %931, %cst_307 {dimension_numbers = #tpu.dot_dimension_numbers<[1], [0], [0], [1], [0, 0, 1, 1], [], []>} : vector<8x8xf32>, vector<8x8xf32>, vector<8x8xf32> -> vector<8x8xf32>
    %933 = vector.extract_strided_slice %821 {offsets = [24, 0], sizes = [8, 32], strides = [1, 1]} : vector<32x32xf32> to vector<8x32xf32>
    %cst_308 = arith.constant dense<0.000000e+00> : vector<8x32xf32>
    %934 = tpu.matmul %932, %933, %cst_308 {dimension_numbers = #tpu.dot_dimension_numbers<[1], [0], [0], [1], [0, 0, 1, 1], [], []>} : vector<8x8xf32>, vector<8x32xf32>, vector<8x32xf32> -> vector<8x32xf32>
    %935 = arith.addf %917, %934 : vector<8x32xf32>
    %936 = arith.addf %817, %935 : vector<8x32xf32>
    %937 = vector.extract_strided_slice %819 {offsets = [3, 0], sizes = [1, 32], strides = [1, 1]} : vector<9x32xf32> to vector<1x32xf32>
    %938 = vector.broadcast %937 : vector<1x32xf32> to vector<8x32xf32>
    %939 = arith.addf %936, %938 : vector<8x32xf32>
    %940 = vector.extract_strided_slice %819 {offsets = [6, 0], sizes = [1, 32], strides = [1, 1]} : vector<9x32xf32> to vector<1x32xf32>
    %941 = vector.extract_strided_slice %819 {offsets = [7, 0], sizes = [1, 32], strides = [1, 1]} : vector<9x32xf32> to vector<1x32xf32>
    %cst_309 = arith.constant dense<0.000000e+00> : vector<8xf32>
    %942 = vector.multi_reduction <add>, %939, %cst_309 [1] : vector<8x32xf32> to vector<8xf32>
    %943 = vector.shape_cast %942 : vector<8xf32> to vector<8x1xf32>
    %cst_310 = arith.constant 3.200000e+01 : f32
    %944 = vector.broadcast %cst_310 : f32 to vector<8x1xf32>
    %945 = arith.divf %943, %944 : vector<8x1xf32>
    %946 = vector.broadcast %945 : vector<8x1xf32> to vector<8x32xf32>
    %947 = arith.subf %939, %946 : vector<8x32xf32>
    %948 = arith.mulf %947, %947 : vector<8x32xf32>
    %cst_311 = arith.constant dense<0.000000e+00> : vector<8xf32>
    %949 = vector.multi_reduction <add>, %948, %cst_311 [1] : vector<8x32xf32> to vector<8xf32>
    %950 = vector.shape_cast %949 : vector<8xf32> to vector<8x1xf32>
    %cst_312 = arith.constant 3.200000e+01 : f32
    %951 = vector.broadcast %cst_312 : f32 to vector<8x1xf32>
    %952 = arith.divf %950, %951 : vector<8x1xf32>
    %953 = vector.broadcast %945 : vector<8x1xf32> to vector<8x32xf32>
    %954 = arith.subf %939, %953 : vector<8x32xf32>
    %cst_313 = arith.constant 9.99999974E-6 : f32
    %955 = vector.broadcast %cst_313 : f32 to vector<8x1xf32>
    %956 = arith.addf %952, %955 : vector<8x1xf32>
    %957 = math.rsqrt %956 : vector<8x1xf32>
    %958 = vector.broadcast %957 : vector<8x1xf32> to vector<8x32xf32>
    %959 = arith.mulf %954, %958 : vector<8x32xf32>
    %960 = vector.broadcast %940 : vector<1x32xf32> to vector<8x32xf32>
    %961 = arith.mulf %959, %960 : vector<8x32xf32>
    %962 = vector.broadcast %941 : vector<1x32xf32> to vector<8x32xf32>
    %963 = arith.addf %961, %962 : vector<8x32xf32>
    %c5_314 = arith.constant 5 : index
    %c0_315 = arith.constant 0 : index
    %c0_316 = arith.constant 0 : index
    %964 = vector.load %arg6[%c5_314, %c0_315, %c0_316] : memref<6x32x128xf32, #tpu.memory_space<vmem>>, vector<1x32x128xf32>
    %965 = vector.shape_cast %964 : vector<1x32x128xf32> to vector<32x128xf32>
    %cst_317 = arith.constant dense<0.000000e+00> : vector<8x128xf32>
    %966 = tpu.matmul %963, %965, %cst_317 {dimension_numbers = #tpu.dot_dimension_numbers<[1], [0], [0], [1], [0, 0, 1, 1], [], []>} : vector<8x32xf32>, vector<32x128xf32>, vector<8x128xf32> -> vector<8x128xf32>
    %c5_318 = arith.constant 5 : index
    %c0_319 = arith.constant 0 : index
    %c0_320 = arith.constant 0 : index
    %967 = vector.load %arg9[%c5_318, %c0_319, %c0_320] : memref<6x1x128xf32, #tpu.memory_space<vmem>>, vector<1x1x128xf32>
    %968 = vector.shape_cast %967 : vector<1x1x128xf32> to vector<1x128xf32>
    %969 = vector.broadcast %968 : vector<1x128xf32> to vector<8x128xf32>
    %970 = arith.addf %966, %969 : vector<8x128xf32>
    %cst_321 = arith.constant 0.000000e+00 : f32
    %971 = vector.broadcast %cst_321 : f32 to vector<8x128xf32>
    %972 = arith.maximumf %970, %971 : vector<8x128xf32>
    %c5_322 = arith.constant 5 : index
    %c0_323 = arith.constant 0 : index
    %c0_324 = arith.constant 0 : index
    %973 = vector.load %arg7[%c5_322, %c0_323, %c0_324] : memref<6x128x32xf32, #tpu.memory_space<vmem>>, vector<1x128x32xf32>
    %974 = vector.shape_cast %973 : vector<1x128x32xf32> to vector<128x32xf32>
    %cst_325 = arith.constant dense<0.000000e+00> : vector<8x32xf32>
    %975 = tpu.matmul %972, %974, %cst_325 {dimension_numbers = #tpu.dot_dimension_numbers<[1], [0], [0], [1], [0, 0, 1, 1], [], []>} : vector<8x128xf32>, vector<128x32xf32>, vector<8x32xf32> -> vector<8x32xf32>
    %976 = arith.addf %939, %975 : vector<8x32xf32>
    %977 = vector.extract_strided_slice %819 {offsets = [8, 0], sizes = [1, 32], strides = [1, 1]} : vector<9x32xf32> to vector<1x32xf32>
    %978 = vector.broadcast %977 : vector<1x32xf32> to vector<8x32xf32>
    %979 = arith.addf %976, %978 : vector<8x32xf32>
    %c0_326 = arith.constant 0 : index
    %c0_327 = arith.constant 0 : index
    %980 = vector.load %arg10[%c0_326, %c0_327] : memref<2x32xf32, #tpu.memory_space<vmem>>, vector<2x32xf32>
    %981 = vector.extract_strided_slice %980 {offsets = [0, 0], sizes = [1, 32], strides = [1, 1]} : vector<2x32xf32> to vector<1x32xf32>
    %982 = vector.extract_strided_slice %980 {offsets = [1, 0], sizes = [1, 32], strides = [1, 1]} : vector<2x32xf32> to vector<1x32xf32>
    %cst_328 = arith.constant dense<0.000000e+00> : vector<8xf32>
    %983 = vector.multi_reduction <add>, %979, %cst_328 [1] : vector<8x32xf32> to vector<8xf32>
    %984 = vector.shape_cast %983 : vector<8xf32> to vector<8x1xf32>
    %cst_329 = arith.constant 3.200000e+01 : f32
    %985 = vector.broadcast %cst_329 : f32 to vector<8x1xf32>
    %986 = arith.divf %984, %985 : vector<8x1xf32>
    %987 = vector.broadcast %986 : vector<8x1xf32> to vector<8x32xf32>
    %988 = arith.subf %979, %987 : vector<8x32xf32>
    %989 = arith.mulf %988, %988 : vector<8x32xf32>
    %cst_330 = arith.constant dense<0.000000e+00> : vector<8xf32>
    %990 = vector.multi_reduction <add>, %989, %cst_330 [1] : vector<8x32xf32> to vector<8xf32>
    %991 = vector.shape_cast %990 : vector<8xf32> to vector<8x1xf32>
    %cst_331 = arith.constant 3.200000e+01 : f32
    %992 = vector.broadcast %cst_331 : f32 to vector<8x1xf32>
    %993 = arith.divf %991, %992 : vector<8x1xf32>
    %994 = vector.broadcast %986 : vector<8x1xf32> to vector<8x32xf32>
    %995 = arith.subf %979, %994 : vector<8x32xf32>
    %cst_332 = arith.constant 9.99999974E-6 : f32
    %996 = vector.broadcast %cst_332 : f32 to vector<8x1xf32>
    %997 = arith.addf %993, %996 : vector<8x1xf32>
    %998 = math.rsqrt %997 : vector<8x1xf32>
    %999 = vector.broadcast %998 : vector<8x1xf32> to vector<8x32xf32>
    %1000 = arith.mulf %995, %999 : vector<8x32xf32>
    %1001 = vector.broadcast %981 : vector<1x32xf32> to vector<8x32xf32>
    %1002 = arith.mulf %1000, %1001 : vector<8x32xf32>
    %1003 = vector.broadcast %982 : vector<1x32xf32> to vector<8x32xf32>
    %1004 = arith.addf %1002, %1003 : vector<8x32xf32>
    %cst_333 = arith.constant dense<0.000000e+00> : vector<32xf32>
    %1005 = vector.multi_reduction <add>, %1004, %cst_333 [0] : vector<8x32xf32> to vector<32xf32>
    %1006 = vector.shape_cast %1005 : vector<32xf32> to vector<1x32xf32>
    %cst_334 = arith.constant 8.000000e+00 : f32
    %1007 = vector.broadcast %cst_334 : f32 to vector<1x32xf32>
    %1008 = arith.divf %1006, %1007 : vector<1x32xf32>
    %c0_335 = arith.constant 0 : index
    %c0_336 = arith.constant 0 : index
    %c0_337 = arith.constant 0 : index
    %1009 = vector.load %arg11[%c0_335, %c0_336, %c0_337] : memref<1x1x32xf32, #tpu.memory_space<vmem>>, vector<1x1x32xf32>
    %1010 = vector.shape_cast %1009 : vector<1x1x32xf32> to vector<1x32xf32>
    %1011 = vector.shape_cast %1008 : vector<1x32xf32> to vector<1x1x32xf32>
    tpu.vector_store %arg11[%c0_335, %c0_336, %c0_337], %1011 {strides = array<i32>} : memref<1x1x32xf32, #tpu.memory_space<vmem>>, vector<1x1x32xf32>,
    return
  }
  func.func @transform_0(%arg0: i32) -> (i32, i32, i32) {
    %c0_i32 = arith.constant 0 : i32
    %c0_i32_0 = arith.constant 0 : i32
    %c0_i32_1 = arith.constant 0 : i32
    return %arg0, %c0_i32, %c0_i32_0 : i32, i32, i32
  }
  func.func @transform_1(%arg0: i32) -> (i32, i32) {
    %c0_i32 = arith.constant 0 : i32
    %c0_i32_0 = arith.constant 0 : i32
    %c0_i32_1 = arith.constant 0 : i32
    return %c0_i32, %c0_i32_0 : i32, i32
  }
  func.func @transform_2(%arg0: i32) -> (i32, i32) {
    %c0_i32 = arith.constant 0 : i32
    %c0_i32_0 = arith.constant 0 : i32
    %c0_i32_1 = arith.constant 0 : i32
    return %c0_i32, %c0_i32_0 : i32, i32
  }
  func.func @transform_3(%arg0: i32) -> (i32, i32, i32) {
    %c0_i32 = arith.constant 0 : i32
    %c0_i32_0 = arith.constant 0 : i32
    %c0_i32_1 = arith.constant 0 : i32
    %c0_i32_2 = arith.constant 0 : i32
    return %c0_i32, %c0_i32_0, %c0_i32_1 : i32, i32, i32
  }
  func.func @transform_4(%arg0: i32) -> (i32, i32, i32) {
    %c0_i32 = arith.constant 0 : i32
    %c0_i32_0 = arith.constant 0 : i32
    %c0_i32_1 = arith.constant 0 : i32
    %c0_i32_2 = arith.constant 0 : i32
    return %c0_i32, %c0_i32_0, %c0_i32_1 : i32, i32, i32
  }
  func.func @transform_5(%arg0: i32) -> (i32, i32, i32) {
    %c0_i32 = arith.constant 0 : i32
    %c0_i32_0 = arith.constant 0 : i32
    %c0_i32_1 = arith.constant 0 : i32
    %c0_i32_2 = arith.constant 0 : i32
    return %c0_i32, %c0_i32_0, %c0_i32_1 : i32, i32, i32
  }
  func.func @transform_6(%arg0: i32) -> (i32, i32, i32) {
    %c0_i32 = arith.constant 0 : i32
    %c0_i32_0 = arith.constant 0 : i32
    %c0_i32_1 = arith.constant 0 : i32
    %c0_i32_2 = arith.constant 0 : i32
    return %c0_i32, %c0_i32_0, %c0_i32_1 : i32, i32, i32
  }
  func.func @transform_7(%arg0: i32) -> (i32, i32, i32) {
    %c0_i32 = arith.constant 0 : i32
    %c0_i32_0 = arith.constant 0 : i32
    %c0_i32_1 = arith.constant 0 : i32
    %c0_i32_2 = arith.constant 0 : i32
    return %c0_i32, %c0_i32_0, %c0_i32_1 : i32, i32, i32
  }
  func.func @transform_8(%arg0: i32) -> (i32, i32, i32) {
    %c0_i32 = arith.constant 0 : i32
    %c0_i32_0 = arith.constant 0 : i32
    %c0_i32_1 = arith.constant 0 : i32
    %c0_i32_2 = arith.constant 0 : i32
    return %c0_i32, %c0_i32_0, %c0_i32_1 : i32, i32, i32
  }
  func.func @transform_9(%arg0: i32) -> (i32, i32) {
    %c0_i32 = arith.constant 0 : i32
    %c0_i32_0 = arith.constant 0 : i32
    %c0_i32_1 = arith.constant 0 : i32
    return %c0_i32, %c0_i32_0 : i32, i32
  }
  func.func @transform_10(%arg0: i32) -> (i32, i32, i32) {
    %c0_i32 = arith.constant 0 : i32
    %c0_i32_0 = arith.constant 0 : i32
    %c0_i32_1 = arith.constant 0 : i32
    return %arg0, %c0_i32, %c0_i32_0 : i32, i32, i32
  }
}

</mosaic_0001>

<bundles_post_ra>
// kernel: tpu_custom_call.1
= control target key start
LH: loop header
LB: loop body
LE: loop exit
PB: predicated region body
PF: predicated region fallthrough
CT: control target
= control target key end

     0   :  { %s5413_s0 = inlined_call_operand.vmem [shape: f32[2,8,20], index: 0, kind: input, shape index: {}]   ;;  %s5414_s1 = inlined_call_operand.vmem [shape: f32[8,32], index: 1, kind: input, shape index: {}]   ;;  %s5415_s2 = inlined_call_operand.vmem [shape: f32[20,32], index: 2, kind: input, shape index: {}]   ;;  %s5416_s3 = inlined_call_operand.vmem [shape: f32[6,32,96], index: 3, kind: input, shape index: {}]   ;;  %s5417_s4 = inlined_call_operand.vmem [shape: f32[6,32,32], index: 4, kind: input, shape index: {}]   ;;  %s5418_s5 = inlined_call_operand.vmem [shape: f32[6,32,128], index: 5, kind: input, shape index: {}]   ;;  %s5419_s6 = inlined_call_operand.vmem [shape: f32[6,128,32], index: 6, kind: input, shape index: {}]   ;;  %s5420_s7 = inlined_call_operand.vmem [shape: f32[6,9,32], index: 7, kind: input, shape index: {}]   ;;  %s5421_s8 = inlined_call_operand.vmem [shape: f32[6,1,128], index: 8, kind: input, shape index: {}]   ;;  %s5422_s9 = inlined_call_operand.vmem [shape: f32[2,32], index: 9, kind: input, shape index: {}]   ;;  %s5423_s10 = inlined_call_operand.hbm [shape: f32[2,1,32], index: 10, kind: output, shape index: {}]  }
   0x1   :  { %5457 = sst [smem:[#allocation12_spill]] %s5413_s0 }
   0x2   :  { %5458 = sst [smem:[#allocation13_spill]] %s5414_s1 }
   0x3   :  { %5459 = sst [smem:[#allocation14_spill]] %s5415_s2 }
   0x4   :  { %5460 = sst [smem:[#allocation15_spill]] %s5423_s10 }
   0x5   :  { %15 = vsyncpa [#allocation3], 0 }
   0x6   :  { %17 = vsyncpa [#allocation3 + $0x1], 0  ;;  %s4310_s13 = smov 0   ;;  %s4312_s14 = smov 0  }
   0x7   :  { %s4314_s15 = smov 0   ;;  %s4316_s16 = smov 0  }
   0x8 LB: > { %5461 = sst [smem:[#allocation5_spill]] %s4227_s13  ;;  %s4331_s17 = sadd.s32 4294967295, %s4239_s16   ;;  %s4239_s16 = sphi %s4316_s16, %s5490_s16   ;;  %s4235_s15 = sphi %s4314_s15, %s5492_s15   ;;  %s4231_s14 = sphi %s4312_s14, %s5494_s14   ;;  %s4227_s13 = sphi %s4310_s13, %s5493_s13  }
   0x9   : > { %5462 = sst [smem:[#allocation6_spill]] %s4235_s15  ;;  %s3714_s18 = sadd.s32 4294967294, %s4239_s16  }
   0xa   : > { %5463 = sst [smem:[#allocation7_spill]] %s4239_s16  ;;  %s4335_s19 = sadd.s32 1, %s4239_s16  }
   0xb   : > { %5464 = sst [smem:[#allocation8_spill]] %s4335_s19  ;;  %s245_s20 = sadd.s32 1, %s4235_s15 }
   0xc   : > { %s242_s21 = ssub.s32 %s4239_s16, %s4335_s19  ;;  %p255_p0 = scmp.ne.s32.totalorder %s4235_s15, %s4231_s14 }
   0xd   : > { %p243_p1 = scmp.eq.s32.totalorder %s242_s21, 0  ;;  %p256_p2 = scmp.eq.s32.totalorder %s4331_s17, 1 }
   0xe   : > { %p261_p3 = scmp.ne.s32.totalorder %s4231_s14, %s4227_s13  ;;  %p262_p4 = scmp.eq.s32.totalorder %s3714_s18, 1 }
   0xf   : > { %s4346_s22 = scalar_select %p243_p1, %s4235_s15, %s245_s20  }
  0x10   : > { %p4348_p5 = por %p256_p2, %p255_p0  ;;  %p4352_p6 = por %p262_p4, %p261_p3 }
  0x11   : > { %5465 = sst [smem:[#allocation9_spill]] %s4346_s22  ;;  %p3717_p7 = scmp.ge.s32.totalorder %s4239_s16, 1 }
  0x12   : > { %s5466_s23 = scalar_select %p4348_p5, 1, 0 }
  0x13   : > { %s5468_s24 = scalar_select %p4352_p6, 1, 0 }
  0x14   : > { %5467 = sst [smem:[#allocation10_spill]] %s5466_s23  ;;  %p314_p8 = scmp.lt.s32.totalorder %s4239_s16, 3 }
  0x15   : > { %5469 = sst [smem:[#allocation11_spill]] %s5468_s24 }
  0x16   : > { %p315_p9 = pnand %p3717_p7, %p314_p8 }
  0x17   : > { %s5470_s2 = sld [smem:[#allocation14_spill]] (!%p315_p9)  ;;  %p350_p10 = scmp.lt.s32.totalorder (!%p315_p9), %s4331_s17, 1 }
  0x18   : > { %318 = sbr.rel (%p315_p9) target bundleno = 13492 (0x34b4), region = 60  ;;  %s5471_s0 = sld [smem:[#allocation12_spill]] (!%p315_p9) }
  0x19   : > { %s5472_s1 = sld [smem:[#allocation13_spill]] (!%p315_p9)  ;;  %s5444_s26 = smov (!%p315_p9), 32  }
  0x1a   : > { %s5436_s27 = smov (!%p315_p9), 96   ;;  %s5446_s28 = smov (!%p315_p9), 64  }
  0x1b   : > { %s5438_s29 = smov (!%p315_p9), 120   ;;  %s5442_s30 = smov (!%p315_p9), 88  }
  0x1c   : > { %s5426_s18 = smov (!%p315_p9), 72   ;;  %s5424_s20 = smov (!%p315_p9), 112  }
  0x1d   : > { %v357_v0 = vld [vmem:[%s5470_s2 + $0x10] sm:$0xf]  ;;  %vm362_vm0 = vcmask 1043456   ;;  %v356_v1 = vld [vmem:[%s5470_s2 + $0x8] sm:$0xff]  ;;  %v355_v2 = vld [vmem:[%s5470_s2] sm:$0xff]  ;;  %s351_s11 = scalar_select %p350_p10, %s4331_s17, 1 }
  0x1e   : > { %3719 = vmatpush.msk.msra.mxu0 %vm362_vm0, %v357_v0  ;;  %vm358_vm1 = vcmask 162816   ;;  %vm395_vm2 = vcmask 261120   ;;  %v4241_v9 = vmov 32.0   ;;  %v432_v21 = vld [vmem:[%s5416_s3 + $0x18] sm:$0xff]  ;;  %v431_v22 = vld [vmem:[%s5416_s3 + $0x10] sm:$0xff]  ;;  %v430_v23 = vld [vmem:[%s5416_s3 + $0x8] sm:$0xff] }
  0x1f   : > { %s3718_s12 = sshll.u32 %s351_s11, 3  ;;  %v387_v5 = vld [vmem:[%s5472_s1] sm:$0xff]  ;;  %4051 = vrcp.f32 %v4241_v9  ;;  %448 = vmatpush.msra.mxu1 %v432_v21  ;;  %vm474_vm7 = vcmask 64512   ;;  %s5440_s11 = smov 56  }
  0x20   : > { %380 = vmatpush.msra.mxu0 %v356_v1  ;;  %s353_s21 = scalar_lea.vmem %s5471_s0, %s3718_s12  ;;  %v429_v24 = vld [vmem:[%s5416_s3] sm:$0xff]  ;;  %s5434_s12 = smov 80  }
  0x21   : > { %v354_v3 = vld [vmem:[%s353_s21] sm:$0xff]  ;;  %449 = vmatpush.msra.mxu1 %v431_v22  ;;  %s5430_s21 = smov 104   ;;  %s5428_s25 = smov 40  }
  0x22   : > { %381 = vmatpush.msra.mxu0 %v355_v2  ;;  %v4399_v25 = vld [vmem:[%s5420_s7] sm:$0xff]  ;;  %s5483_s1 = smov 40   ;;  %s5484_s13 = smov 64  }
  0x23   : > { %3720 = vmatmul.msk.f32.vlgmr.msra.gmra.mxu0 %vm358_vm1, %v354_v3  ;;  %450 = vmatpush.msra.mxu1 %v430_v23  ;;  %v459_v26 = vperm.slane %v4399_v25, 1  ;;  %v425_v36 = vperm.slane %v4399_v25, 4  ;;  %v427_v39 = vperm.slane %v4399_v25, 5  ;;  %v456_v45 = vperm.slane %v4399_v25, 0  ;;  %v392_v23 = vld [vmem:[%s5417_s4 + $0x8] sm:$0xff] }
  0x24   : > { %v465_v51 = vperm.slane %v4399_v25, 2 }
  0x25   : > { %v4052_v10 = vpop.eup %4051  ;;  %451 = vmatpush.msra.mxu1 %v429_v24  ;;  %461 = vrot.lane.b32.xlu1 %v459_v26, %s5444_s26  ;;  %s5475_s26 = smov 56  }
  0x26   : > { %v400_v11 = vmul.f32 32.0, %v4052_v10  ;;  %vm404_vm3 = vweird.f32 %v4052_v10 }
  0x28   : > { %v401_v12 = vsub.f32 1.0, %v400_v11 }
  0x2a   : > { %v402_v13 = vmul.f32 %v4052_v10, %v401_v12 }
  0x2c   : > { %v403_v14 = vadd.f32 %v4052_v10, %v402_v13 }
  0x2e   : > { %v4379_v15 = vsel %vm404_vm3, %v4052_v10, %v403_v14 }
  0x97   : > { %v462_v42 = vpop.permute.xlu1 %461 }
  0xa0   : > { %v383_v4 = vpop.f32.mrf.mxu0 }
  0xa1   : > { %v386_v6 = vmul.f32 5.656854, %v383_v4 }
  0xa3   : > { %v4375_v7 = vadd.f32 %v387_v5, %v386_v6 }
  0xa5   : > { %v396_v8 = vsel %vm395_vm2, %v4375_v7, 0.0 }
  0xa6   : > { %397 = vadd.xlane.f32.xlu0 %v396_v8 }
 0x119   : > { %v398_v16 = vpop.xlane.xlu0 %397 }
 0x11a   : > { %v406_v17 = vmul.f32 %v4379_v15, %v398_v16 }
 0x11c   : > { %v407_v18 = vsub.f32 %v4375_v7, %v406_v17  ;;  %v391_v17 = vld [vmem:[%s5417_s4] sm:$0xff] }
 0x11e   : > { %v408_v19 = vmul.f32 %v407_v18, %v407_v18 }
 0x120   : > { %v409_v20 = vsel %vm395_vm2, %v408_v19, 0.0 }
 0x121   : > { %410 = vadd.xlane.f32.xlu0 %v409_v20 }
 0x194   : > { %v411_v27 = vpop.xlane.xlu0 %410 }
 0x195   : > { %v412_v28 = vmul.f32 %v411_v27, %v4379_v15 }
 0x197   : > { %v413_v29 = vadd.f32 1e-05, %v412_v28 }
 0x199   : > { %4053 = vrsqrt.f32 %v413_v29  ;;  %vm420_vm5 = vweird.f32 %v413_v29 }
 0x19f   : > { %v4054_v30 = vpop.eup %4053 }
 0x1a0   : > { %v415_v31 = vmul.f32 %v4054_v30, %v413_v29  ;;  %vm421_vm4 = vweird.f32 %v4054_v30 }
 0x1a1   : > { %vm422_vm6 = vmor %vm420_vm5, %vm421_vm4 }
 0x1a2   : > { %v416_v32 = vmul.f32 %v4054_v30, %v415_v31 }
 0x1a4   : > { %v417_v33 = vmul.f32 0.5, %v416_v32 }
 0x1a6   : > { %v418_v34 = vsub.f32 1.5, %v417_v33 }
 0x1a8   : > { %v419_v35 = vmul.f32 %v4054_v30, %v418_v34 }
 0x1aa   : > { %v423_v37 = vsel %vm422_vm6, %v4054_v30, %v419_v35 }
 0x1ab   : > { %v424_v38 = vmul.f32 %v423_v37, %v407_v18 }
 0x1ad   : > { %v426_v40 = vmul.f32 %v425_v36, %v424_v38 }
 0x1af   : > { %v428_v41 = vadd.f32 %v427_v39, %v426_v40 }
 0x1b1   : > { %3721 = vmatmul.msk.f32.vlgmr.msra.gmra.mxu1 %vm395_vm2, %v428_v41 }
 0x22e   : > { %v453_v43 = vpop.f32.mrf.mxu1 }
 0x22f   : > { %v464_v44 = vadd.f32 %v462_v42, %v453_v43  ;;  %v457_v46 = vadd.f32 %v456_v45, %v453_v43 }
 0x231   : > { %472 = vrot.lane.b32.xlu1 %v464_v44, %s5436_s27  ;;  %v458_v48 = vmul.f32 0.35355338, %v457_v46  ;;  %v394_v46 = vld [vmem:[%s5417_s4 + $0x18] sm:$0xff]  ;;  %s5473_s27 = smov 32  }
 0x2a3   : > { %v473_v47 = vpop.permute.xlu1 %472 }
 0x2a4   : > { %3722 = vmatpush.xpose.msk.msrb.mxu0 %vm474_vm7, %v473_v47  ;;  %v393_v47 = vld [vmem:[%s5417_s4 + $0x10] sm:$0xff] }
 0x2a7   : > { %3723 = vmatmul.msk.f32.vlgmr.msrb.gmra.mxu0 %vm474_vm7, %v458_v48 }
 0x2a8   : > { %621 = vmatpush.msra.mxu0 %v392_v23 }
 0x2aa   : > { %732 = vmatpush.msrb.mxu0 %v393_v47 }
 0x324   : > { %v497_v49 = vpop.f32.mrf.mxu0 }
 0x325   : > { %v500_v50 = vsel %vm474_vm7, %v497_v49, -inf }
 0x326   : > { %501 = vmax.xlane.f32.xlu2 %v500_v50 }
 0x33e   : > { %467 = vrot.lane.b32.xlu2 %v465_v51, %s5446_s28 }
 0x399   : > { %v502_v52 = vpop.xlane.xlu2 %501 }
 0x39a   : > { %v503_v53 = vsub.f32 %v497_v49, %v502_v52 }
 0x39c   : > { %v504_v54 = vmul.f32 1.442695, %v503_v53 }
 0x39e   : > { %4055 = vpow2.f32 %v504_v54 }
 0x3a1   : > { %v468_v55 = vpop.permute.xlu2 %467 }
 0x3a2   : > { %v4414_v56 = vadd.f32 %v468_v55, %v453_v43 }
 0x3a4   : > { %v4056_v57 = vpop.eup %4055  ;;  %512 = vrot.lane.b32.xlu1 %v4414_v56, %s5446_s28 }
 0x3a5   : > { %v506_v58 = vsel %vm474_vm7, %v4056_v57, 0.0 }
 0x3a6   : > { %507 = vadd.xlane.f32.xlu0 %v506_v58 }
 0x3ac   : > { %538 = vrot.lane.b32.xlu1 %v458_v48, %s5438_s29  ;;  %s5474_s29 = smov 88  }
 0x3ba   : > { %540 = vrot.lane.b32.xlu0 %v464_v44, %s5442_s30  ;;  %s5476_s30 = smov 120  }
 0x3c2   : > { %577 = vrot.lane.b32.xlu0 %v4414_v56, %s5440_s11  ;;  %s5477_s11 = smov 96  }
 0x3ca   : > { %651 = vrot.lane.b32.xlu0 %v464_v44, %s5434_s12  ;;  %s5478_s12 = smov 80  }
 0x3d2   : > { %740 = vrot.lane.b32.xlu0 %v464_v44, %s5426_s18  ;;  %s5432_s18 = smov 48  }
 0x3da   : > { %649 = vrot.lane.b32.xlu0 %v458_v48, %s5424_s20  ;;  %s5480_s20 = smov 104  }
 0x416   : > { %v513_v59 = vpop.permute.xlu1 %512 }
 0x417   : > { %533 = vmatpush.msra.mxu3 %v513_v59 }
 0x419   : > { %v508_v60 = vpop.xlane.xlu0 %507 }
 0x41a   : > { %4057 = vrcp.f32 %v508_v60 }
 0x41e   : > { %v539_v0 = vpop.permute.xlu1 %538 }
 0x420   : > { %v4058_v61 = vpop.eup %4057 }
 0x421   : > { %v510_v62 = vmul.f32 %v4058_v61, %v4056_v57 }
 0x423   : > { %3724 = vmatmul.msk.f32.vlgmr.msra.gmra.mxu3 %vm474_vm7, %v510_v62 }
 0x42c   : > { %v541_v63 = vpop.permute.xlu0 %540 }
 0x42d   : > { %3725 = vmatpush.xpose.msk.msrb.mxu3 %vm474_vm7, %v541_v63 }
 0x430   : > { %3726 = vmatmul.msk.f32.vlgmr.msrb.gmra.mxu3 %vm474_vm7, %v539_v0 }
 0x434   : > { %v578_v1 = vpop.permute.xlu0 %577 }
 0x435   : > { %598 = vmatpush.msrb.mxu1 %v578_v1  ;;  %v859_v1 = vld [vmem:[%s5418_s5 + $0x18] sm:$0xff] }
 0x437   : > { %644 = vmatpush.msra.mxu1 %v391_v17 }
 0x43c   : > { %v652_v2 = vpop.permute.xlu0 %651 }
 0x43d   : > { %3730 = vmatpush.xpose.msk.msra.mxu3 %vm474_vm7, %v652_v2  ;;  %v857_v2 = vld [vmem:[%s5418_s5 + $0x8] sm:$0xff] }
 0x444   : > { %v741_v3 = vpop.permute.xlu0 %740 }
 0x44c   : > { %v650_v4 = vpop.permute.xlu0 %649 }
 0x44d   : > { %3731 = vmatmul.msk.f32.vlgmr.msra.gmra.mxu3 %vm474_vm7, %v650_v4  ;;  %v903_v4 = vld [vmem:[%s5419_s6 + $0x78] sm:$0xff] }
 0x4a6   : > { %v535_v5 = vpop.f32.mrf.mxu3 }
 0x4b3   : > { %v563_v6 = vpop.f32.mrf.mxu3 }
 0x4b4   : > { %v566_v8 = vsel %vm474_vm7, %v563_v6, -inf }
 0x4b5   : > { %567 = vmax.xlane.f32.xlu1 %v566_v8 }
 0x4d0   : > { %v674_v9 = vpop.f32.mrf.mxu3 }
 0x4d1   : > { %v677_v10 = vsel %vm474_vm7, %v674_v9, -inf }
 0x4d2   : > { %678 = vmax.xlane.f32.xlu0 %v677_v10  ;;  %v900_v10 = vld [vmem:[%s5419_s6 + $0x60] sm:$0xff] }
 0x528   : > { %v568_v11 = vpop.xlane.xlu1 %567 }
 0x529   : > { %v569_v12 = vsub.f32 %v563_v6, %v568_v11  ;;  %v901_v6 = vld [vmem:[%s5419_s6 + $0x68] sm:$0xff] }
 0x52b   : > { %v570_v13 = vmul.f32 1.442695, %v569_v12  ;;  %v899_v12 = vld [vmem:[%s5419_s6 + $0x58] sm:$0xff] }
 0x52d   : > { %4059 = vpow2.f32 %v570_v13  ;;  %v898_v13 = vld [vmem:[%s5419_s6 + $0x50] sm:$0xff] }
 0x533   : > { %v4060_v14 = vpop.eup %4059 }
 0x534   : > { %v572_v16 = vsel %vm474_vm7, %v4060_v14, 0.0 }
 0x535   : > { %573 = vadd.xlane.f32.xlu2 %v572_v16  ;;  %v896_v16 = vld [vmem:[%s5419_s6 + $0x40] sm:$0xff] }
 0x545   : > { %v679_v26 = vpop.xlane.xlu0 %678 }
 0x546   : > { %v680_v27 = vsub.f32 %v674_v9, %v679_v26 }
 0x548   : > { %v681_v29 = vmul.f32 1.442695, %v680_v27  ;;  %v891_v27 = vld [vmem:[%s5419_s6 + $0x18] sm:$0xff] }
 0x54d   : > { %738 = vrot.lane.b32.xlu2 %v458_v48, %s5430_s21  ;;  %s5481_s21 = smov 112  }
 0x555   : > { %777 = vrot.lane.b32.xlu2 %v4414_v56, %s5428_s25  ;;  %s5485_s25 = sld [smem:[#allocation15_spill]] }
 0x55b   : > { %s3655_s0 = scalar_lea.hbm %s5485_s25, %s4331_s17 }
 0x55c   : > { %s3659_s23 = sshll.u32 %s3655_s0, 4  ;;  %s3660_s23 = int_to_ptr.hbm [resolvable:$true] %s3659_s23 }
 0x55d   : > { %s4191_s10 = sshra.s32 %s3660_s23, 4  ;;  %s4192_s10 = int_to_ptr.hbm [resolvable:$true] %s4191_s10 }
 0x55e   : > { %s4193_s2 = scalar_lea.hbm %s4192_s10, 1  ;;  %p4198_p0 = scmp.lt.s32.totalorder %s4192_s10, %s5485_s25 }
 0x55f   : > { %p4194_p11 = scmp.ne.s32.totalorder %s4192_s10, %s4193_s2 }
 0x561   : > { %p4195_p12 = pnand %p4194_p11, %p4348_p5 }
 0x563   : > { %p4196_p13 = pneg %p4195_p12 }
 0x5a8   : > { %v574_v18 = vpop.xlane.xlu2 %573 }
 0x5a9   : > { %4061 = vrcp.f32 %v574_v18  ;;  %v895_v18 = vld [vmem:[%s5419_s6 + $0x38] sm:$0xff] }
 0x5aa   : > { %4063 = vpow2.f32 %v681_v29  ;;  %v852_v29 = vperm.slane %v4399_v25, 6 }
 0x5af   : > { %v4062_v19 = vpop.eup %4061 }
 0x5b0   : > { %v739_v20 = vpop.permute.xlu2 %738  ;;  %v576_v21 = vmul.f32 %v4062_v19, %v4060_v14  ;;  %v4064_v32 = vpop.eup %4063  ;;  %v897_v14 = vld [vmem:[%s5419_s6 + $0x48] sm:$0xff] }
 0x5b1   : > { %v683_v33 = vsel %vm474_vm7, %v4064_v32, 0.0 }
 0x5b2   : > { %3727 = vmatmul.msk.f32.vlgmr.msrb.gmra.mxu1 %vm474_vm7, %v576_v21 }
 0x5b3   : > { %3734 = vmatpush.xpose.msk.msrb.mxu1 %vm474_vm7, %v741_v3  ;;  %v856_v3 = vld [vmem:[%s5418_s5] sm:$0xff] }
 0x5b8   : > { %v778_v22 = vpop.permute.xlu2 %777 }
 0x5b9   : > { %798 = vmatpush.msrb.mxu3 %v778_v22  ;;  %v893_v22 = vld [vmem:[%s5419_s6 + $0x28] sm:$0xff] }
 0x5ba   : > { %3729 = vmatmul.msk.f32.vlgmr.msra.gmra.mxu1 %vm474_vm7, %v535_v5  ;;  %v902_v5 = vld [vmem:[%s5419_s6 + $0x70] sm:$0xff] }
 0x5bb   : > { %904 = vmatpush.msra.mxu1 %v903_v4 }
 0x5bd   : > { %905 = vmatpush.msra.mxu1 %v902_v5 }
 0x5bf   : > { %906 = vmatpush.msra.mxu1 %v901_v6 }
 0x5c1   : > { %907 = vmatpush.msra.mxu1 %v900_v10 }
 0x5c2   : > { %3735 = vmatmul.msk.f32.vlgmr.msrb.gmra.mxu1 %vm474_vm7, %v739_v20  ;;  %v894_v20 = vld [vmem:[%s5419_s6 + $0x30] sm:$0xff] }
 0x5c3   : > { %908 = vmatpush.msra.mxu1 %v899_v12 }
 0x5c5   : > { %909 = vmatpush.msra.mxu1 %v898_v13 }
 0x5c7   : > { %910 = vmatpush.msra.mxu1 %v897_v14 }
 0x5c9   : > { %911 = vmatpush.msra.mxu1 %v896_v16 }
 0x5cb   : > { %912 = vmatpush.msra.mxu1 %v895_v18 }
 0x5cd   : > { %913 = vmatpush.msra.mxu1 %v894_v20 }
 0x5cf   : > { %914 = vmatpush.msra.mxu1 %v893_v22 }
 0x62f   : > { %v600_v24 = vpop.f32.mrf.mxu1 }
 0x630   : > { %3728 = vmatmul.msk.f32.vlgmr.msra.gmra.mxu0 %vm474_vm7, %v600_v24  ;;  %v892_v24 = vld [vmem:[%s5419_s6 + $0x20] sm:$0xff] }
 0x631   : > { %879 = vmatpush.msra.mxu0 %v859_v1  ;;  %915 = vmatpush.msra.mxu1 %v892_v24 }
 0x633   : > { %916 = vmatpush.msra.mxu1 %v891_v27 }
 0x637   : > { %v646_v28 = vpop.f32.mrf.mxu1 }
 0x63f   : > { %v763_v30 = vpop.f32.mrf.mxu1 }
 0x640   : > { %v766_v31 = vsel %vm474_vm7, %v763_v30, -inf }
 0x641   : > { %767 = vmax.xlane.f32.xlu1 %v766_v31 }
 0x649   : > { %684 = vadd.xlane.f32.xlu1 %v683_v33 }
 0x6ad   : > { %v623_v50 = vpop.f32.mrf.mxu0 }
 0x6ae   : > { %v647_v51 = vadd.f32 %v646_v28, %v623_v50 }
 0x6b4   : > { %v768_v34 = vpop.xlane.xlu1 %767 }
 0x6b5   : > { %v769_v35 = vsub.f32 %v763_v30, %v768_v34 }
 0x6b7   : > { %v770_v36 = vmul.f32 1.442695, %v769_v35  ;;  %v890_v35 = vld [vmem:[%s5419_s6 + $0x10] sm:$0xff] }
 0x6b8   : > { %917 = vmatpush.msra.mxu1 %v890_v35 }
 0x6b9   : > { %4065 = vpow2.f32 %v770_v36  ;;  %v889_v36 = vld [vmem:[%s5419_s6 + $0x8] sm:$0xff] }
 0x6ba   : > { %918 = vmatpush.msra.mxu1 %v889_v36 }
 0x6bc   : > { %v685_v39 = vpop.xlane.xlu1 %684 }
 0x6bf   : > { %v4066_v37 = vpop.eup %4065 }
 0x6c0   : > { %v772_v38 = vsel %vm474_vm7, %v4066_v37, 0.0 }
 0x6c1   : > { %773 = vadd.xlane.f32.xlu1 %v772_v38 }
 0x6da   : > { %688 = vrot.lane.b32.xlu1 %v4414_v56, %s5432_s18  ;;  %v828_v56 = vperm.slane %v4399_v25, 3  ;;  %s5479_s18 = smov 72  }
 0x734   : > { %v774_v40 = vpop.xlane.xlu1 %773 }
 0x735   : > { %4067 = vrcp.f32 %v774_v40 }
 0x736   : > { %4069 = vrcp.f32 %v685_v39 }
 0x73b   : > { %v4068_v41 = vpop.eup %4067 }
 0x73c   : > { %v776_v42 = vmul.f32 %v4068_v41, %v4066_v37  ;;  %v4070_v43 = vpop.eup %4069  ;;  %v888_v37 = vld [vmem:[%s5419_s6] sm:$0xff]  ;;  %v4040_v41 = vld [vmem:[%s5420_s7 + $0x8] ss:$0 sm:$0xff] }
 0x73d   : > { %v687_v45 = vmul.f32 %v4070_v43, %v4064_v32  ;;  %v854_v32 = vperm.slane %v4399_v25, 7  ;;  %919 = vmatpush.msra.mxu1 %v888_v37  ;;  %v4039_v25 = vld [vmem:[%s5421_s8] ss:$0 sm:$0xff] }
 0x73e   : > { %3736 = vmatmul.msk.f32.vlgmr.msrb.gmra.mxu3 %vm474_vm7, %v776_v42 }
 0x74c   : > { %v689_v44 = vpop.permute.xlu1 %688 }
 0x74d   : > { %709 = vmatpush.msra.mxu2 %v689_v44 }
 0x74e   : > { %3732 = vmatmul.msk.f32.vlgmr.msra.gmra.mxu2 %vm474_vm7, %v687_v45 }
 0x74f   : > { %821 = vmatpush.msrb.mxu2 %v394_v46 }
 0x7c1   : > { %v800_v48 = vpop.f32.mrf.mxu3 }
 0x7c2   : > { %3737 = vmatmul.msk.f32.vlgmr.msrb.gmra.mxu2 %vm474_vm7, %v800_v48 }
 0x7d1   : > { %v711_v49 = vpop.f32.mrf.mxu2 }
 0x7d2   : > { %3733 = vmatmul.msk.f32.vlgmr.msrb.gmra.mxu0 %vm474_vm7, %v711_v49 }
 0x845   : > { %v823_v54 = vpop.f32.mrf.mxu2 }
 0x84f   : > { %v734_v52 = vpop.f32.mrf.mxu0 }
 0x850   : > { %v737_v53 = vadd.f32 %v734_v52, %v647_v51  ;;  %v3748_v51 = vld [vmem:[%s5416_s3 + $0x38] sm:$0xff]  ;;  %v3747_v52 = vld [vmem:[%s5416_s3 + $0x30] sm:$0xff] }
 0x851   : > { %981 = vmatpush.msra.mxu3 %v3748_v51 }
 0x852   : > { %v826_v55 = vadd.f32 %v823_v54, %v737_v53  ;;  %v3746_v53 = vld [vmem:[%s5416_s3 + $0x28] sm:$0xff]  ;;  %v3745_v54 = vld [vmem:[%s5416_s3 + $0x20] sm:$0xff] }
 0x853   : > { %982 = vmatpush.msra.mxu3 %v3747_v52 }
 0x854   : > { %v827_v57 = vadd.f32 %v826_v55, %v4375_v7  ;;  %v858_v7 = vld [vmem:[%s5418_s5 + $0x10] sm:$0xff] }
 0x855   : > { %880 = vmatpush.msra.mxu0 %v858_v7  ;;  %983 = vmatpush.msra.mxu3 %v3746_v53  ;;  %v4565_v55 = vld [vmem:[%s5420_s7 + $0x10] sm:$0xff] }
 0x856   : > { %v4465_v58 = vadd.f32 %v828_v56, %v827_v57  ;;  %v998_v56 = vperm.slane %v4565_v55, 2  ;;  %v992_v57 = vperm.slane %v4565_v55, 1  ;;  %v959_v5 = vperm.slane %v4565_v55, 5 }
 0x857   : > { %881 = vmatpush.msra.mxu0 %v857_v2  ;;  %984 = vmatpush.msra.mxu3 %v3745_v54  ;;  %v957_v2 = vperm.slane %v4565_v55, 4  ;;  %v3741_v54 = vld [vmem:[%s5417_s4 + $0x20] sm:$0xff] }
 0x858   : > { %v830_v59 = vsel %vm395_vm2, %v4465_v58, 0.0 }
 0x859   : > { %831 = vadd.xlane.f32.xlu2 %v830_v59  ;;  %882 = vmatpush.msra.mxu0 %v856_v3 }
 0x8cc   : > { %v832_v60 = vpop.xlane.xlu2 %831 }
 0x8cd   : > { %v833_v61 = vmul.f32 %v832_v60, %v4379_v15 }
 0x8cf   : > { %v834_v62 = vsub.f32 %v4465_v58, %v833_v61 }
 0x8d1   : > { %v835_v63 = vmul.f32 %v834_v62, %v834_v62 }
 0x8d3   : > { %v836_v0 = vsel %vm395_vm2, %v835_v63, 0.0 }
 0x8d4   : > { %837 = vadd.xlane.f32.xlu0 %v836_v0 }
 0x947   : > { %v838_v8 = vpop.xlane.xlu0 %837 }
 0x948   : > { %v839_v9 = vmul.f32 %v838_v8, %v4379_v15 }
 0x94a   : > { %v840_v11 = vadd.f32 1e-05, %v839_v9  ;;  %v989_v9 = vperm.slane %v4565_v55, 0 }
 0x94c   : > { %4071 = vrsqrt.f32 %v840_v11  ;;  %vm847_vm9 = vweird.f32 %v840_v11 }
 0x952   : > { %v4072_v17 = vpop.eup %4071 }
 0x953   : > { %v842_v19 = vmul.f32 %v4072_v17, %v840_v11  ;;  %vm848_vm8 = vweird.f32 %v4072_v17 }
 0x954   : > { %vm849_vm10 = vmor %vm847_vm9, %vm848_vm8 }
 0x955   : > { %v843_v21 = vmul.f32 %v4072_v17, %v842_v19 }
 0x957   : > { %v844_v23 = vmul.f32 0.5, %v843_v21 }
 0x959   : > { %v845_v26 = vsub.f32 1.5, %v844_v23 }
 0x95b   : > { %v846_v28 = vmul.f32 %v4072_v17, %v845_v26 }
 0x95d   : > { %v850_v30 = vsel %vm849_vm10, %v4072_v17, %v846_v28 }
 0x95e   : > { %v851_v31 = vmul.f32 %v850_v30, %v834_v62 }
 0x960   : > { %v853_v33 = vmul.f32 %v852_v29, %v851_v31 }
 0x962   : > { %v855_v34 = vadd.f32 %v854_v32, %v853_v33 }
 0x964   : > { %3738 = vmatmul.msk.f32.vlgmr.msra.gmra.mxu0 %vm395_vm2, %v855_v34 }
 0x9e1   : > { %v884_v38 = vpop.f32.mrf.mxu0 }
 0x9e2   : > { %v885_v39 = vadd.f32 %v4039_v25, %v884_v38 }
 0x9e4   : > { %v887_v40 = vmax.f32 %v885_v39, 0.0 }
 0x9e6   : > { %920 = vmatmul.f32.vlgmr.msra.gmra.mxu1 %v887_v40 }
 0xa63   : > { %v921_v42 = vpop.f32.mrf.mxu1 }
 0xa64   : > { %v924_v43 = vadd.f32 %v921_v42, %v4465_v58 }
 0xa66   : > { %v4543_v44 = vadd.f32 %v4040_v41, %v924_v43 }
 0xa68   : > { %v935_v45 = vsel %vm395_vm2, %v4543_v44, 0.0 }
 0xa69   : > { %936 = vadd.xlane.f32.xlu1 %v935_v45 }
 0xa82   : > { %1000 = vrot.lane.b32.xlu1 %v998_v56, %s5446_s28 }
 0xadc   : > { %v937_v46 = vpop.xlane.xlu1 %936 }
 0xadd   : > { %v938_v47 = vmul.f32 %v937_v46, %v4379_v15 }
 0xadf   : > { %v939_v48 = vsub.f32 %v4543_v44, %v938_v47 }
 0xae1   : > { %v940_v49 = vmul.f32 %v939_v48, %v939_v48 }
 0xae3   : > { %v941_v50 = vsel %vm395_vm2, %v940_v49, 0.0  ;;  %v3742_v49 = vld [vmem:[%s5417_s4 + $0x28] sm:$0xff] }
 0xae4   : > { %942 = vadd.xlane.f32.xlu0 %v941_v50 }
 0xaf4   : > { %v1001_v11 = vpop.permute.xlu1 %1000 }
 0xaf8   : > { %994 = vrot.lane.b32.xlu0 %v992_v57, %s5473_s27 }
 0xb57   : > { %v943_v58 = vpop.xlane.xlu0 %942 }
 0xb58   : > { %v944_v59 = vmul.f32 %v943_v58, %v4379_v15 }
 0xb5a   : > { %v945_v60 = vadd.f32 1e-05, %v944_v59 }
 0xb5c   : > { %4073 = vrsqrt.f32 %v945_v60  ;;  %vm952_vm12 = vweird.f32 %v945_v60 }
 0xb62   : > { %v4074_v61 = vpop.eup %4073 }
 0xb63   : > { %v947_v62 = vmul.f32 %v4074_v61, %v945_v60  ;;  %vm953_vm11 = vweird.f32 %v4074_v61 }
 0xb64   : > { %vm954_vm13 = vmor %vm952_vm12, %vm953_vm11 }
 0xb65   : > { %v948_v63 = vmul.f32 %v4074_v61, %v947_v62 }
 0xb67   : > { %v949_v0 = vmul.f32 0.5, %v948_v63 }
 0xb69   : > { %v950_v1 = vsub.f32 1.5, %v949_v0 }
 0xb6a   : > { %v995_v10 = vpop.permute.xlu0 %994 }
 0xb6b   : > { %v951_v7 = vmul.f32 %v4074_v61, %v950_v1 }
 0xb6d   : > { %v955_v3 = vsel %vm954_vm13, %v4074_v61, %v951_v7 }
 0xb6e   : > { %v956_v4 = vmul.f32 %v955_v3, %v939_v48 }
 0xb70   : > { %v958_v6 = vmul.f32 %v957_v2, %v956_v4 }
 0xb72   : > { %v960_v8 = vadd.f32 %v959_v5, %v958_v6 }
 0xb74   : > { %3749 = vmatmul.msk.f32.vlgmr.msra.gmra.mxu3 %vm395_vm2, %v960_v8 }
 0xbf7   : > { %v986_v12 = vpop.f32.mrf.mxu3 }
 0xbf8   : > { %v990_v13 = vadd.f32 %v989_v9, %v986_v12  ;;  %v997_v14 = vadd.f32 %v995_v10, %v986_v12  ;;  %v4576_v16 = vadd.f32 %v1001_v11, %v986_v12  ;;  %v3743_v11 = vld [vmem:[%s5417_s4 + $0x30] sm:$0xff] }
 0xbfa   : > { %v991_v17 = vmul.f32 0.35355338, %v990_v13  ;;  %1072 = vrot.lane.b32.xlu2 %v997_v14, %s5474_s29  ;;  %1109 = vrot.lane.b32.xlu1 %v4576_v16, %s5475_s26  ;;  %v3744_v13 = vld [vmem:[%s5417_s4 + $0x38] sm:$0xff] }
 0xbfb   : > { %1353 = vmatpush.msrb.mxu1 %v3744_v13 }
 0xbfc   : > { %1070 = vrot.lane.b32.xlu0 %v991_v17, %s5476_s30 }
 0xc02   : > { %1005 = vrot.lane.b32.xlu2 %v997_v14, %s5477_s11  ;;  %1183 = vrot.lane.b32.xlu1 %v997_v14, %s5478_s12 }
 0xc0a   : > { %1272 = vrot.lane.b32.xlu1 %v997_v14, %s5479_s18 }
 0xc12   : > { %1270 = vrot.lane.b32.xlu1 %v991_v17, %s5480_s20 }
 0xc54   : > { %v1073_v18 = vpop.permute.xlu2 %1072 }
 0xc55   : > { %3753 = vmatpush.xpose.msk.msrb.mxu3 %vm474_vm7, %v1073_v18 }
 0xc59   : > { %1176 = vmatpush.msra.mxu3 %v3741_v54  ;;  %v3776_v54 = vld [vmem:[%s5419_s6 + $0xa0] sm:$0xff] }
 0xc5c   : > { %v1006_v19 = vpop.permute.xlu2 %1005 }
 0xc5d   : > { %3750 = vmatpush.xpose.msk.msra.mxu2 %vm474_vm7, %v1006_v19 }
 0xc60   : > { %3751 = vmatmul.msk.f32.vlgmr.msra.gmra.mxu2 %vm474_vm7, %v991_v17 }
 0xc6c   : > { %v1110_v20 = vpop.permute.xlu1 %1109 }
 0xc6d   : > { %1130 = vmatpush.msrb.mxu2 %v1110_v20 }
 0xc6e   : > { %v1071_v21 = vpop.permute.xlu0 %1070 }
 0xc6f   : > { %3754 = vmatmul.msk.f32.vlgmr.msrb.gmra.mxu3 %vm474_vm7, %v1071_v21 }
 0xc70   : > { %1264 = vmatpush.msrb.mxu3 %v3743_v11 }
 0xc74   : > { %v1184_v22 = vpop.permute.xlu1 %1183 }
 0xc75   : > { %3758 = vmatpush.xpose.msk.msra.mxu2 %vm474_vm7, %v1184_v22 }
 0xc7c   : > { %v1273_v25 = vpop.permute.xlu1 %1272 }
 0xc84   : > { %v1271_v42 = vpop.permute.xlu1 %1270 }
 0xce3   : > { %v1029_v31 = vpop.f32.mrf.mxu2 }
 0xce4   : > { %v1032_v32 = vsel %vm474_vm7, %v1029_v31, -inf }
 0xcf2   : > { %v1095_v23 = vpop.f32.mrf.mxu3 }
 0xcf3   : > { %v1098_v24 = vsel %vm474_vm7, %v1095_v23, -inf }
 0xcf4   : > { %1099 = vmax.xlane.f32.xlu0 %v1098_v24 }
 0xd08   : > { %1181 = vrot.lane.b32.xlu0 %v991_v17, %s5481_s21 }
 0xd67   : > { %v1100_v26 = vpop.xlane.xlu0 %1099 }
 0xd68   : > { %v1101_v27 = vsub.f32 %v1095_v23, %v1100_v26  ;;  %v1360_v23 = vperm.slane %v4565_v55, 3 }
 0xd6a   : > { %v1102_v28 = vmul.f32 1.442695, %v1101_v27 }
 0xd6c   : > { %4075 = vpow2.f32 %v1102_v28 }
 0xd72   : > { %v4076_v29 = vpop.eup %4075 }
 0xd73   : > { %v1104_v30 = vsel %vm474_vm7, %v4076_v29, 0.0 }
 0xd74   : > { %1105 = vadd.xlane.f32.xlu2 %v1104_v30 }
 0xd7a   : > { %v1182_v39 = vpop.permute.xlu0 %1181 }
 0xd7c   : > { %1033 = vmax.xlane.f32.xlu2 %v1032_v32 }
 0xde7   : > { %v1106_v33 = vpop.xlane.xlu2 %1105 }
 0xde8   : > { %4077 = vrcp.f32 %v1106_v33  ;;  %v3769_v33 = vld [vmem:[%s5418_s5 + $0x38] sm:$0xff] }
 0xdee   : > { %v4078_v34 = vpop.eup %4077 }
 0xdef   : > { %v1108_v35 = vmul.f32 %v4078_v34, %v4076_v29  ;;  %v1034_v36 = vpop.xlane.xlu2 %1033  ;;  %v3767_v34 = vld [vmem:[%s5418_s5 + $0x28] sm:$0xff] }
 0xdf0   : > { %v1035_v37 = vsub.f32 %v1029_v31, %v1034_v36  ;;  %v3787_v36 = vld [vmem:[%s5419_s6 + $0xf8] sm:$0xff] }
 0xdf1   : > { %3755 = vmatmul.msk.f32.vlgmr.msrb.gmra.mxu2 %vm474_vm7, %v1108_v35  ;;  %v3766_v35 = vld [vmem:[%s5418_s5 + $0x20] sm:$0xff] }
 0xdf2   : > { %v1036_v38 = vmul.f32 1.442695, %v1035_v37  ;;  %3762 = vmatpush.xpose.msk.msrb.mxu2 %vm474_vm7, %v1273_v25  ;;  %v3786_v37 = vld [vmem:[%s5419_s6 + $0xf0] sm:$0xff]  ;;  %v3785_v25 = vld [vmem:[%s5419_s6 + $0xe8] sm:$0xff] }
 0xdf4   : > { %4079 = vpow2.f32 %v1036_v38 }
 0xdf9   : > { %3759 = vmatmul.msk.f32.vlgmr.msra.gmra.mxu2 %vm474_vm7, %v1182_v39 }
 0xdfa   : > { %v4080_v40 = vpop.eup %4079  ;;  %1439 = vmatpush.msra.mxu2 %v3787_v36 }
 0xdfb   : > { %v1038_v41 = vsel %vm474_vm7, %v4080_v40, 0.0 }
 0xdfc   : > { %1039 = vadd.xlane.f32.xlu2 %v1038_v41  ;;  %1440 = vmatpush.msra.mxu2 %v3786_v37 }
 0xdfe   : > { %1441 = vmatpush.msra.mxu2 %v3785_v25 }
 0xe01   : > { %3763 = vmatmul.msk.f32.vlgmr.msrb.gmra.mxu2 %vm474_vm7, %v1271_v42  ;;  %v3783_v42 = vld [vmem:[%s5419_s6 + $0xd8] sm:$0xff] }
 0xe14   : > { %1044 = vrot.lane.b32.xlu2 %v4576_v16, %s5446_s28  ;;  %s5482_s28 = smov 48  }
 0xe6f   : > { %v1040_v43 = vpop.xlane.xlu2 %1039 }
 0xe70   : > { %4081 = vrcp.f32 %v1040_v43  ;;  %v3782_v43 = vld [vmem:[%s5419_s6 + $0xd0] sm:$0xff] }
 0xe74   : > { %v1132_v45 = vpop.f32.mrf.mxu2 }
 0xe76   : > { %v4082_v46 = vpop.eup %4081 }
 0xe77   : > { %v1042_v47 = vmul.f32 %v4082_v46, %v4080_v40  ;;  %v1045_v48 = vpop.permute.xlu2 %1044  ;;  %v3784_v40 = vld [vmem:[%s5419_s6 + $0xe0] sm:$0xff] }
 0xe78   : > { %1065 = vmatpush.msrb.mxu0 %v1045_v48  ;;  %1442 = vmatpush.msra.mxu2 %v3784_v40  ;;  %v3780_v46 = vld [vmem:[%s5419_s6 + $0xc0] sm:$0xff]  ;;  %v3779_v48 = vld [vmem:[%s5419_s6 + $0xb8] sm:$0xff] }
 0xe79   : > { %3752 = vmatmul.msk.f32.vlgmr.msrb.gmra.mxu0 %vm474_vm7, %v1042_v47 }
 0xe7a   : > { %1153 = vmatpush.msra.mxu0 %v3742_v49  ;;  %1443 = vmatpush.msra.mxu2 %v3783_v42 }
 0xe7c   : > { %v1206_v50 = vpop.f32.mrf.mxu2  ;;  %1444 = vmatpush.msra.mxu2 %v3782_v43 }
 0xe7d   : > { %v1209_v51 = vsel %vm474_vm7, %v1206_v50, -inf }
 0xe7e   : > { %1210 = vmax.xlane.f32.xlu1 %v1209_v51 }
 0xe81   : > { %3756 = vmatmul.msk.f32.vlgmr.msra.gmra.mxu0 %vm474_vm7, %v1132_v45  ;;  %v3781_v45 = vld [vmem:[%s5419_s6 + $0xc8] sm:$0xff] }
 0xe82   : > { %1445 = vmatpush.msra.mxu2 %v3781_v45 }
 0xe84   : > { %v1295_v52 = vpop.f32.mrf.mxu2  ;;  %1446 = vmatpush.msra.mxu2 %v3780_v46 }
 0xe85   : > { %v1298_v53 = vsel %vm474_vm7, %v1295_v52, -inf }
 0xe86   : > { %1299 = vmax.xlane.f32.xlu0 %v1298_v53  ;;  %1447 = vmatpush.msra.mxu2 %v3779_v48 }
 0xe9a   : > { %1220 = vrot.lane.b32.xlu0 %v4576_v16, %s5482_s28 }
 0xef1   : > { %v1211_v56 = vpop.xlane.xlu1 %1210 }
 0xef2   : > { %v1212_v57 = vsub.f32 %v1206_v50, %v1211_v56  ;;  %v3778_v50 = vld [vmem:[%s5419_s6 + $0xb0] sm:$0xff] }
 0xef3   : > { %1448 = vmatpush.msra.mxu2 %v3778_v50 }
 0xef4   : > { %v1213_v58 = vmul.f32 1.442695, %v1212_v57  ;;  %v3775_v57 = vld [vmem:[%s5419_s6 + $0x98] sm:$0xff] }
 0xef6   : > { %4083 = vpow2.f32 %v1213_v58  ;;  %v1067_v59 = vpop.f32.mrf.mxu0 }
 0xef7   : > { %3757 = vmatmul.msk.f32.vlgmr.msra.gmra.mxu3 %vm474_vm7, %v1067_v59  ;;  %v1384_v59 = vperm.slane %v4565_v55, 6 }
 0xef8   : > { %1413 = vmatpush.msra.mxu3 %v3769_v33 }
 0xef9   : > { %v1300_v60 = vpop.xlane.xlu0 %1299 }
 0xefa   : > { %v1301_v61 = vsub.f32 %v1295_v52, %v1300_v60  ;;  %v3777_v52 = vld [vmem:[%s5419_s6 + $0xa8] sm:$0xff] }
 0xefb   : > { %1449 = vmatpush.msra.mxu2 %v3777_v52 }
 0xefc   : > { %v4084_v62 = vpop.eup %4083  ;;  %v1302_v63 = vmul.f32 1.442695, %v1301_v61 }
 0xefd   : > { %v1215_v0 = vsel %vm474_vm7, %v4084_v62, 0.0  ;;  %1450 = vmatpush.msra.mxu2 %v3776_v54 }
 0xefe   : > { %4085 = vpow2.f32 %v1302_v63  ;;  %1216 = vadd.xlane.f32.xlu2 %v1215_v0  ;;  %v1155_v12 = vpop.f32.mrf.mxu0 }
 0xeff   : > { %1451 = vmatpush.msra.mxu2 %v3775_v57 }
 0xf04   : > { %v4086_v1 = vpop.eup %4085 }
 0xf05   : > { %v1304_v7 = vsel %vm474_vm7, %v4086_v1, 0.0 }
 0xf06   : > { %1305 = vadd.xlane.f32.xlu1 %v1304_v7  ;;  %v3773_v7 = vld [vmem:[%s5419_s6 + $0x88] sm:$0xff] }
 0xf0c   : > { %v1221_v2 = vpop.permute.xlu0 %1220 }
 0xf0d   : > { %1241 = vmatpush.msrb.mxu0 %v1221_v2  ;;  %v3772_v2 = vld [vmem:[%s5419_s6 + $0x80] sm:$0xff] }
 0xf1f   : > { %1309 = vrot.lane.b32.xlu1 %v4576_v16, %s5483_s1 }
 0xf71   : > { %v1217_v3 = vpop.xlane.xlu2 %1216 }
 0xf72   : > { %4087 = vrcp.f32 %v1217_v3 }
 0xf78   : > { %v4088_v4 = vpop.eup %4087 }
 0xf79   : > { %v1219_v5 = vmul.f32 %v4088_v4, %v4084_v62  ;;  %v1306_v6 = vpop.xlane.xlu1 %1305  ;;  %v1386_v62 = vperm.slane %v4565_v55, 7  ;;  %v4041_v55 = vld [vmem:[%s5421_s8 + $0x1] ss:$0 sm:$0xff] }
 0xf7a   : > { %4089 = vrcp.f32 %v1306_v6  ;;  %v1178_v17 = vpop.f32.mrf.mxu3  ;;  %v4042_v6 = vld [vmem:[%s5420_s7 + $0x18] ss:$0 sm:$0xff] }
 0xf7b   : > { %3760 = vmatmul.msk.f32.vlgmr.msrb.gmra.mxu0 %vm474_vm7, %v1219_v5  ;;  %v1179_v19 = vadd.f32 %v1178_v17, %v1155_v12 }
 0xf80   : > { %v4090_v8 = vpop.eup %4089 }
 0xf81   : > { %v1308_v9 = vmul.f32 %v4090_v8, %v4086_v1  ;;  %v3774_v1 = vld [vmem:[%s5419_s6 + $0x90] sm:$0xff] }
 0xf82   : > { %1452 = vmatpush.msra.mxu2 %v3774_v1 }
 0xf84   : > { %1453 = vmatpush.msra.mxu2 %v3773_v7 }
 0xf86   : > { %1454 = vmatpush.msra.mxu2 %v3772_v2 }
 0xf91   : > { %v1310_v10 = vpop.permute.xlu1 %1309 }
 0xf92   : > { %1330 = vmatpush.msra.mxu0 %v1310_v10 }
 0xf93   : > { %3764 = vmatmul.msk.f32.vlgmr.msra.gmra.mxu0 %vm474_vm7, %v1308_v9 }
 0xff8   : > { %v1243_v14 = vpop.f32.mrf.mxu0 }
 0xff9   : > { %3761 = vmatmul.msk.f32.vlgmr.msrb.gmra.mxu3 %vm474_vm7, %v1243_v14 }
0x1010   : > { %v1332_v16 = vpop.f32.mrf.mxu0 }
0x1011   : > { %3765 = vmatmul.msk.f32.vlgmr.msrb.gmra.mxu1 %vm474_vm7, %v1332_v16 }
0x107c   : > { %v1266_v18 = vpop.f32.mrf.mxu3 }
0x107d   : > { %v1269_v20 = vadd.f32 %v1266_v18, %v1179_v19  ;;  %v3797_v18 = vld [vmem:[%s5416_s3 + $0x58] sm:$0xff]  ;;  %v3796_v19 = vld [vmem:[%s5416_s3 + $0x50] sm:$0xff] }
0x107e   : > { %1516 = vmatpush.msrb.mxu0 %v3797_v18 }
0x1080   : > { %1517 = vmatpush.msrb.mxu0 %v3796_v19 }
0x108e   : > { %v1355_v21 = vpop.f32.mrf.mxu1 }
0x108f   : > { %v1358_v22 = vadd.f32 %v1355_v21, %v1269_v20  ;;  %v3795_v20 = vld [vmem:[%s5416_s3 + $0x48] sm:$0xff]  ;;  %v3794_v21 = vld [vmem:[%s5416_s3 + $0x40] sm:$0xff] }
0x1090   : > { %1518 = vmatpush.msrb.mxu0 %v3795_v20 }
0x1091   : > { %v1359_v24 = vadd.f32 %v1358_v22, %v4543_v44  ;;  %v3768_v44 = vld [vmem:[%s5418_s5 + $0x30] sm:$0xff]  ;;  %v4731_v22 = vld [vmem:[%s5420_s7 + $0x20] sm:$0xff] }
0x1092   : > { %1414 = vmatpush.msra.mxu3 %v3768_v44  ;;  %1519 = vmatpush.msrb.mxu0 %v3794_v21  ;;  %v1492_v44 = vperm.slane %v4731_v22, 4  ;;  %v1494_v36 = vperm.slane %v4731_v22, 5  ;;  %v1533_v45 = vperm.slane %v4731_v22, 2 }
0x1093   : > { %v4631_v26 = vadd.f32 %v1360_v23, %v1359_v24  ;;  %v1527_v23 = vperm.slane %v4731_v22, 1 }
0x1094   : > { %1415 = vmatpush.msra.mxu3 %v3767_v34 }
0x1095   : > { %v1362_v27 = vsel %vm395_vm2, %v4631_v26, 0.0 }
0x1096   : > { %1363 = vadd.xlane.f32.xlu0 %v1362_v27  ;;  %1416 = vmatpush.msra.mxu3 %v3766_v35 }
0x1109   : > { %v1364_v28 = vpop.xlane.xlu0 %1363 }
0x110a   : > { %v1365_v29 = vmul.f32 %v1364_v28, %v4379_v15 }
0x110c   : > { %v1366_v30 = vsub.f32 %v4631_v26, %v1365_v29 }
0x110e   : > { %v1367_v31 = vmul.f32 %v1366_v30, %v1366_v30 }
0x1110   : > { %v1368_v32 = vsel %vm395_vm2, %v1367_v31, 0.0 }
0x1111   : > { %1369 = vadd.xlane.f32.xlu1 %v1368_v32 }
0x1184   : > { %v1370_v38 = vpop.xlane.xlu1 %1369 }
0x1185   : > { %v1371_v39 = vmul.f32 %v1370_v38, %v4379_v15  ;;  %v1524_v38 = vperm.slane %v4731_v22, 0 }
0x1187   : > { %v1372_v41 = vadd.f32 1e-05, %v1371_v39 }
0x1189   : > { %4091 = vrsqrt.f32 %v1372_v41  ;;  %vm1379_vm15 = vweird.f32 %v1372_v41 }
0x118f   : > { %v4092_v47 = vpop.eup %4091 }
0x1190   : > { %v1374_v49 = vmul.f32 %v4092_v47, %v1372_v41  ;;  %vm1380_vm14 = vweird.f32 %v4092_v47 }
0x1191   : > { %vm1381_vm0 = vmor %vm1379_vm15, %vm1380_vm14 }
0x1192   : > { %v1375_v51 = vmul.f32 %v4092_v47, %v1374_v49 }
0x1194   : > { %v1376_v53 = vmul.f32 0.5, %v1375_v51 }
0x1196   : > { %v1377_v56 = vsub.f32 1.5, %v1376_v53 }
0x1198   : > { %v1378_v58 = vmul.f32 %v4092_v47, %v1377_v56 }
0x119a   : > { %v1382_v60 = vsel %vm1381_vm0, %v4092_v47, %v1378_v58 }
0x119b   : > { %v1383_v61 = vmul.f32 %v1382_v60, %v1366_v30 }
0x119d   : > { %v1385_v63 = vmul.f32 %v1384_v59, %v1383_v61 }
0x119f   : > { %v1387_v0 = vadd.f32 %v1386_v62, %v1385_v63 }
0x11a1   : > { %3771 = vmatmul.msk.f32.vlgmr.msra.gmra.mxu3 %vm395_vm2, %v1387_v0 }
0x1224   : > { %v1418_v3 = vpop.f32.mrf.mxu3 }
0x1225   : > { %v1419_v4 = vadd.f32 %v4041_v55, %v1418_v3 }
0x1227   : > { %v1421_v5 = vmax.f32 %v1419_v4, 0.0 }
0x1229   : > { %1455 = vmatmul.f32.vlgmr.msra.gmra.mxu2 %v1421_v5 }
0x12ac   : > { %v1456_v8 = vpop.f32.mrf.mxu2 }
0x12ad   : > { %v1459_v9 = vadd.f32 %v1456_v8, %v4631_v26 }
0x12af   : > { %v4709_v10 = vadd.f32 %v4042_v6, %v1459_v9 }
0x12b1   : > { %v1470_v11 = vsel %vm395_vm2, %v4709_v10, 0.0 }
0x12b2   : > { %1471 = vadd.xlane.f32.xlu2 %v1470_v11 }
0x1325   : > { %v1472_v12 = vpop.xlane.xlu2 %1471 }
0x1326   : > { %v1473_v13 = vmul.f32 %v1472_v12, %v4379_v15 }
0x1328   : > { %v1474_v14 = vsub.f32 %v4709_v10, %v1473_v13 }
0x132a   : > { %v1475_v16 = vmul.f32 %v1474_v14, %v1474_v14 }
0x132c   : > { %v1476_v17 = vsel %vm395_vm2, %v1475_v16, 0.0 }
0x132d   : > { %1477 = vadd.xlane.f32.xlu2 %v1476_v17 }
0x1345   : > { %1529 = vrot.lane.b32.xlu2 %v1527_v23, %s5473_s27 }
0x13a0   : > { %v1478_v24 = vpop.xlane.xlu2 %1477 }
0x13a1   : > { %v1479_v26 = vmul.f32 %v1478_v24, %v4379_v15 }
0x13a3   : > { %v1480_v27 = vadd.f32 1e-05, %v1479_v26 }
0x13a5   : > { %4093 = vrsqrt.f32 %v1480_v27  ;;  %vm1487_vm3 = vweird.f32 %v1480_v27 }
0x13a8   : > { %v1530_v39 = vpop.permute.xlu2 %1529 }
0x13ab   : > { %v4094_v28 = vpop.eup %4093 }
0x13ac   : > { %v1482_v29 = vmul.f32 %v4094_v28, %v1480_v27  ;;  %vm1488_vm1 = vweird.f32 %v4094_v28 }
0x13ad   : > { %vm1489_vm4 = vmor %vm1487_vm3, %vm1488_vm1 }
0x13ae   : > { %v1483_v30 = vmul.f32 %v4094_v28, %v1482_v29 }
0x13b0   : > { %v1484_v31 = vmul.f32 0.5, %v1483_v30 }
0x13b2   : > { %v1485_v32 = vsub.f32 1.5, %v1484_v31 }
0x13b4   : > { %v1486_v33 = vmul.f32 %v4094_v28, %v1485_v32  ;;  %v3791_v32 = vld [vmem:[%s5417_s4 + $0x48] sm:$0xff] }
0x13b6   : > { %v1490_v34 = vsel %vm1489_vm4, %v4094_v28, %v1486_v33  ;;  %v3790_v33 = vld [vmem:[%s5417_s4 + $0x40] sm:$0xff] }
0x13b7   : > { %v1491_v35 = vmul.f32 %v1490_v34, %v1474_v14 }
0x13b9   : > { %v1493_v37 = vmul.f32 %v1492_v44, %v1491_v35 }
0x13bb   : > { %v1495_v25 = vadd.f32 %v1494_v36, %v1493_v37 }
0x13bd   : > { %3798 = vmatmul.msk.f32.vlgmr.msrb.gmra.mxu0 %vm395_vm2, %v1495_v25 }
0x143a   : > { %v1521_v40 = vpop.f32.mrf.mxu0 }
0x143b   : > { %v1525_v41 = vadd.f32 %v1524_v38, %v1521_v40  ;;  %v1532_v42 = vadd.f32 %v1530_v39, %v1521_v40 }
0x143d   : > { %v1526_v43 = vmul.f32 0.35355338, %v1525_v41  ;;  %1607 = vrot.lane.b32.xlu0 %v1532_v42, %s5474_s29  ;;  %v3792_v41 = vld [vmem:[%s5417_s4 + $0x50] sm:$0xff] }
0x143f   : > { %1605 = vrot.lane.b32.xlu1 %v1526_v43, %s5476_s30 }
0x1445   : > { %1535 = vrot.lane.b32.xlu0 %v1533_v45, %s5484_s13 }
0x144d   : > { %1540 = vrot.lane.b32.xlu0 %v1532_v42, %s5477_s11 }
0x14af   : > { %v1608_v46 = vpop.permute.xlu0 %1607 }
0x14b0   : > { %3802 = vmatpush.xpose.msk.msra.mxu0 %vm474_vm7, %v1608_v46 }
0x14b1   : > { %v1606_v47 = vpop.permute.xlu1 %1605 }
0x14b3   : > { %3803 = vmatmul.msk.f32.vlgmr.msra.gmra.mxu0 %vm474_vm7, %v1606_v47 }
0x14b4   : > { %1711 = vmatpush.msrb.mxu0 %v3790_v33  ;;  %v3823_v33 = vld [vmem:[%s5419_s6 + $0x110] sm:$0xff] }
0x14b6   : > { %1799 = vmatpush.msra.mxu0 %v3792_v41 }
0x14b7   : > { %v1536_v48 = vpop.permute.xlu0 %1535 }
0x14b8   : > { %v4747_v49 = vadd.f32 %v1536_v48, %v1521_v40 }
0x14ba   : > { %1644 = vrot.lane.b32.xlu1 %v4747_v49, %s5475_s26 }
0x14bf   : > { %v1541_v50 = vpop.permute.xlu0 %1540 }
0x14c0   : > { %3799 = vmatpush.xpose.msk.msra.mxu1 %vm474_vm7, %v1541_v50 }
0x14c2   : > { %1718 = vrot.lane.b32.xlu1 %v1532_v42, %s5478_s12 }
0x14c3   : > { %3800 = vmatmul.msk.f32.vlgmr.msra.gmra.mxu1 %vm474_vm7, %v1526_v43 }
0x14ca   : > { %1716 = vrot.lane.b32.xlu1 %v1526_v43, %s5481_s21 }
0x14d2   : > { %1805 = vrot.lane.b32.xlu1 %v1526_v43, %s5480_s20 }
0x152c   : > { %v1645_v51 = vpop.permute.xlu1 %1644 }
0x152d   : > { %1665 = vmatpush.msrb.mxu1 %v1645_v51 }
0x1530   : > { %v1630_v52 = vpop.f32.mrf.mxu0 }
0x1531   : > { %v1633_v53 = vsel %vm474_vm7, %v1630_v52, -inf }
0x1532   : > { %1634 = vmax.xlane.f32.xlu2 %v1633_v53  ;;  %v1895_v53 = vperm.slane %v4731_v22, 3 }
0x1534   : > { %v1719_v54 = vpop.permute.xlu1 %1718 }
0x1535   : > { %3807 = vmatpush.xpose.msk.msra.mxu1 %vm474_vm7, %v1719_v54 }
0x153c   : > { %v1717_v58 = vpop.permute.xlu1 %1716 }
0x1540   : > { %v1564_v56 = vpop.f32.mrf.mxu1 }
0x1541   : > { %v1567_v57 = vsel %vm474_vm7, %v1564_v56, -inf }
0x1542   : > { %1568 = vmax.xlane.f32.xlu1 %v1567_v57 }
0x1544   : > { %v1806_v62 = vpop.permute.xlu1 %1805 }
0x154a   : > { %1807 = vrot.lane.b32.xlu2 %v1532_v42, %s5479_s18  ;;  %v3793_v42 = vld [vmem:[%s5417_s4 + $0x58] sm:$0xff] }
0x154b   : > { %1888 = vmatpush.msrb.mxu2 %v3793_v42 }
0x15a5   : > { %v1635_v59 = vpop.xlane.xlu2 %1634 }
0x15a6   : > { %v1636_v60 = vsub.f32 %v1630_v52, %v1635_v59 }
0x15a8   : > { %v1637_v61 = vmul.f32 1.442695, %v1636_v60 }
0x15aa   : > { %4095 = vpow2.f32 %v1637_v61 }
0x15ad   : > { %v1808_v8 = vpop.permute.xlu2 %1807 }
0x15b0   : > { %v4096_v63 = vpop.eup %4095 }
0x15b1   : > { %v1639_v0 = vsel %vm474_vm7, %v4096_v63, 0.0 }
0x15b2   : > { %1640 = vadd.xlane.f32.xlu0 %v1639_v0  ;;  %v3816_v0 = vld [vmem:[%s5418_s5 + $0x48] sm:$0xff] }
0x15b5   : > { %v1569_v1 = vpop.xlane.xlu1 %1568 }
0x15b6   : > { %v1570_v7 = vsub.f32 %v1564_v56, %v1569_v1  ;;  %v3815_v1 = vld [vmem:[%s5418_s5 + $0x40] sm:$0xff] }
0x15b8   : > { %v1571_v2 = vmul.f32 1.442695, %v1570_v7  ;;  %v3836_v7 = vld [vmem:[%s5419_s6 + $0x178] sm:$0xff] }
0x15ba   : > { %4097 = vpow2.f32 %v1571_v2  ;;  %v3835_v2 = vld [vmem:[%s5419_s6 + $0x170] sm:$0xff] }
0x15c0   : > { %v4098_v55 = vpop.eup %4097 }
0x15c1   : > { %v1573_v3 = vsel %vm474_vm7, %v4098_v55, 0.0 }
0x15c2   : > { %1574 = vadd.xlane.f32.xlu0 %v1573_v3 }
0x1625   : > { %v1641_v4 = vpop.xlane.xlu0 %1640 }
0x1626   : > { %4099 = vrcp.f32 %v1641_v4 }
0x162c   : > { %v4100_v5 = vpop.eup %4099 }
0x162d   : > { %v1643_v6 = vmul.f32 %v4100_v5, %v4096_v63  ;;  %v3818_v63 = vld [vmem:[%s5418_s5 + $0x58] sm:$0xff]  ;;  %v3833_v5 = vld [vmem:[%s5419_s6 + $0x160] sm:$0xff] }
0x162f   : > { %3804 = vmatmul.msk.f32.vlgmr.msrb.gmra.mxu1 %vm474_vm7, %v1643_v6 }
0x1630   : > { %3811 = vmatpush.xpose.msk.msrb.mxu1 %vm474_vm7, %v1808_v8  ;;  %v3832_v8 = vld [vmem:[%s5419_s6 + $0x158] sm:$0xff] }
0x1635   : > { %v1575_v16 = vpop.xlane.xlu0 %1574 }
0x1637   : > { %3808 = vmatmul.msk.f32.vlgmr.msra.gmra.mxu1 %vm474_vm7, %v1717_v58 }
0x1638   : > { %1974 = vmatpush.msra.mxu1 %v3836_v7 }
0x163a   : > { %1975 = vmatpush.msra.mxu1 %v3835_v2 }
0x163f   : > { %3812 = vmatmul.msk.f32.vlgmr.msrb.gmra.mxu1 %vm474_vm7, %v1806_v62 }
0x16ac   : > { %v1667_v9 = vpop.f32.mrf.mxu1 }
0x16b4   : > { %v1741_v11 = vpop.f32.mrf.mxu1 }
0x16b5   : > { %v1744_v12 = vsel %vm474_vm7, %v1741_v11, -inf }
0x16b6   : > { %1745 = vmax.xlane.f32.xlu2 %v1744_v12  ;;  %v3829_v12 = vld [vmem:[%s5419_s6 + $0x140] sm:$0xff] }
0x16bc   : > { %v1830_v13 = vpop.f32.mrf.mxu1 }
0x16bd   : > { %v1833_v14 = vsel %vm474_vm7, %v1830_v13, -inf }
0x16be   : > { %1834 = vmax.xlane.f32.xlu0 %v1833_v14  ;;  %v3828_v14 = vld [vmem:[%s5419_s6 + $0x138] sm:$0xff] }
0x16ce   : > { %1844 = vrot.lane.b32.xlu2 %v4747_v49, %s5483_s1 }
0x16d2   : > { %1579 = vrot.lane.b32.xlu0 %v4747_v49, %s5484_s13 }
0x1729   : > { %v1746_v17 = vpop.xlane.xlu2 %1745 }
0x172a   : > { %v1747_v18 = vsub.f32 %v1741_v11, %v1746_v17  ;;  %v3830_v11 = vld [vmem:[%s5419_s6 + $0x148] sm:$0xff]  ;;  %v3827_v17 = vld [vmem:[%s5419_s6 + $0x130] sm:$0xff] }
0x172c   : > { %v1748_v19 = vmul.f32 1.442695, %v1747_v18 }
0x172e   : > { %4101 = vpow2.f32 %v1748_v19  ;;  %v3826_v19 = vld [vmem:[%s5419_s6 + $0x128] sm:$0xff] }
0x1731   : > { %v1835_v20 = vpop.xlane.xlu0 %1834  ;;  %v1845_v25 = vpop.permute.xlu2 %1844 }
0x1732   : > { %v1836_v21 = vsub.f32 %v1830_v13, %v1835_v20 }
0x1734   : > { %v4102_v23 = vpop.eup %4101  ;;  %v1837_v24 = vmul.f32 1.442695, %v1836_v21  ;;  %v3825_v21 = vld [vmem:[%s5419_s6 + $0x120] sm:$0xff] }
0x1735   : > { %v1750_v26 = vsel %vm474_vm7, %v4102_v23, 0.0 }
0x1736   : > { %4103 = vpow2.f32 %v1837_v24  ;;  %1751 = vadd.xlane.f32.xlu1 %v1750_v26  ;;  %v3824_v24 = vld [vmem:[%s5419_s6 + $0x118] sm:$0xff] }
0x1737   : > { %4105 = vrcp.f32 %v1575_v16 }
0x173c   : > { %v4104_v27 = vpop.eup %4103 }
0x173d   : > { %v1839_v28 = vsel %vm474_vm7, %v4104_v27, 0.0  ;;  %v4106_v29 = vpop.eup %4105 }
0x173e   : > { %1840 = vadd.xlane.f32.xlu0 %v1839_v28  ;;  %v1577_v30 = vmul.f32 %v4106_v29, %v4098_v55  ;;  %v3834_v55 = vld [vmem:[%s5419_s6 + $0x168] sm:$0xff] }
0x173f   : > { %1976 = vmatpush.msra.mxu1 %v3834_v55 }
0x1741   : > { %1977 = vmatpush.msra.mxu1 %v3833_v5 }
0x1743   : > { %1978 = vmatpush.msra.mxu1 %v3832_v8 }
0x1744   : > { %v1580_v31 = vpop.permute.xlu0 %1579 }
0x1745   : > { %1600 = vmatpush.msrb.mxu3 %v1580_v31 }
0x1746   : > { %3801 = vmatmul.msk.f32.vlgmr.msrb.gmra.mxu3 %vm474_vm7, %v1577_v30  ;;  %v1921_v30 = vperm.slane %v4731_v22, 7 }
0x1747   : > { %1688 = vmatpush.msra.mxu3 %v3791_v32 }
0x174e   : > { %3805 = vmatmul.msk.f32.vlgmr.msra.gmra.mxu3 %vm474_vm7, %v1667_v9  ;;  %v3831_v9 = vld [vmem:[%s5419_s6 + $0x150] sm:$0xff] }
0x174f   : > { %1755 = vrot.lane.b32.xlu1 %v4747_v49, %s5482_s28  ;;  %1979 = vmatpush.msra.mxu1 %v3831_v9 }
0x1751   : > { %1980 = vmatpush.msra.mxu1 %v3830_v11 }
0x1753   : > { %1981 = vmatpush.msra.mxu1 %v3829_v12 }
0x1755   : > { %1982 = vmatpush.msra.mxu1 %v3828_v14 }
0x1757   : > { %1983 = vmatpush.msra.mxu1 %v3827_v17 }
0x1759   : > { %1984 = vmatpush.msra.mxu1 %v3826_v19 }
0x175b   : > { %1985 = vmatpush.msra.mxu1 %v3825_v21 }
0x175d   : > { %1986 = vmatpush.msra.mxu1 %v3824_v24 }
0x175f   : > { %1987 = vmatpush.msra.mxu1 %v3823_v33 }
0x17a9   : > { %v1752_v44 = vpop.xlane.xlu1 %1751 }
0x17aa   : > { %4107 = vrcp.f32 %v1752_v44  ;;  %v3822_v44 = vld [vmem:[%s5419_s6 + $0x108] sm:$0xff] }
0x17ab   : > { %1988 = vmatpush.msra.mxu1 %v3822_v44 }
0x17b0   : > { %v4108_v35 = vpop.eup %4107 }
0x17b1   : > { %v1841_v34 = vpop.xlane.xlu0 %1840  ;;  %v1754_v36 = vmul.f32 %v4108_v35, %v4102_v23 }
0x17b2   : > { %4109 = vrcp.f32 %v1841_v34  ;;  %v3821_v34 = vld [vmem:[%s5419_s6 + $0x100] sm:$0xff] }
0x17b3   : > { %1989 = vmatpush.msra.mxu1 %v3821_v34 }
0x17b8   : > { %v4110_v38 = vpop.eup %4109 }
0x17b9   : > { %v1843_v39 = vmul.f32 %v4110_v38, %v4104_v27  ;;  %v1919_v27 = vperm.slane %v4731_v22, 6  ;;  %v4043_v22 = vld [vmem:[%s5421_s8 + $0x2] ss:$0 sm:$0xff] }
0x17c1   : > { %v1756_v37 = vpop.permute.xlu1 %1755 }
0x17c2   : > { %1776 = vmatpush.msrb.mxu3 %v1756_v37 }
0x17c3   : > { %3809 = vmatmul.msk.f32.vlgmr.msrb.gmra.mxu3 %vm474_vm7, %v1754_v36 }
0x17c4   : > { %1865 = vmatpush.msra.mxu3 %v1845_v25  ;;  %v4044_v25 = vld [vmem:[%s5420_s7 + $0x28] ss:$0 sm:$0xff] }
0x17c9   : > { %v1602_v40 = vpop.f32.mrf.mxu3 }
0x17ca   : > { %3806 = vmatmul.msk.f32.vlgmr.msrb.gmra.mxu0 %vm474_vm7, %v1602_v40 }
0x17cb   : > { %3813 = vmatmul.msk.f32.vlgmr.msra.gmra.mxu3 %vm474_vm7, %v1843_v39  ;;  %1948 = vmatpush.msrb.mxu0 %v3818_v63 }
0x17d1   : > { %v1690_v43 = vpop.f32.mrf.mxu3 }
0x1846   : > { %v1778_v45 = vpop.f32.mrf.mxu3 }
0x1847   : > { %3810 = vmatmul.msk.f32.vlgmr.msra.gmra.mxu0 %vm474_vm7, %v1778_v45  ;;  %v1713_v47 = vpop.f32.mrf.mxu0 }
0x1848   : > { %v1714_v49 = vadd.f32 %v1713_v47, %v1690_v43 }
0x184e   : > { %v1867_v46 = vpop.f32.mrf.mxu3 }
0x184f   : > { %3814 = vmatmul.msk.f32.vlgmr.msrb.gmra.mxu2 %vm474_vm7, %v1867_v46 }
0x18c4   : > { %v1801_v48 = vpop.f32.mrf.mxu0 }
0x18c5   : > { %v1804_v50 = vadd.f32 %v1801_v48, %v1714_v49  ;;  %v3846_v48 = vld [vmem:[%s5416_s3 + $0x78] sm:$0xff]  ;;  %v3845_v49 = vld [vmem:[%s5416_s3 + $0x70] sm:$0xff] }
0x18c6   : > { %2051 = vmatpush.msrb.mxu3 %v3846_v48 }
0x18c8   : > { %2052 = vmatpush.msrb.mxu3 %v3845_v49 }
0x18d2   : > { %v1890_v51 = vpop.f32.mrf.mxu2 }
0x18d3   : > { %v1893_v52 = vadd.f32 %v1890_v51, %v1804_v50  ;;  %v3844_v50 = vld [vmem:[%s5416_s3 + $0x68] sm:$0xff]  ;;  %v3843_v51 = vld [vmem:[%s5416_s3 + $0x60] sm:$0xff] }
0x18d4   : > { %2053 = vmatpush.msrb.mxu3 %v3844_v50 }
0x18d5   : > { %v1894_v54 = vadd.f32 %v1893_v52, %v4709_v10  ;;  %v3817_v10 = vld [vmem:[%s5418_s5 + $0x50] sm:$0xff] }
0x18d6   : > { %1949 = vmatpush.msrb.mxu0 %v3817_v10  ;;  %v4897_v52 = vld [vmem:[%s5420_s7 + $0x30] sm:$0xff]  ;;  %2054 = vmatpush.msrb.mxu3 %v3843_v51 }
0x18d7   : > { %v4797_v56 = vadd.f32 %v1895_v53, %v1894_v54  ;;  %v2062_v53 = vperm.slane %v4897_v52, 1  ;;  %v2027_v10 = vperm.slane %v4897_v52, 4  ;;  %v2029_v7 = vperm.slane %v4897_v52, 5 }
0x18d8   : > { %1950 = vmatpush.msrb.mxu0 %v3816_v0  ;;  %v2068_v11 = vperm.slane %v4897_v52, 2 }
0x18d9   : > { %v1897_v57 = vsel %vm395_vm2, %v4797_v56, 0.0 }
0x18da   : > { %1898 = vadd.xlane.f32.xlu2 %v1897_v57  ;;  %1951 = vmatpush.msrb.mxu0 %v3815_v1 }
0x194d   : > { %v1899_v58 = vpop.xlane.xlu2 %1898 }
0x194e   : > { %v1900_v59 = vmul.f32 %v1899_v58, %v4379_v15 }
0x1950   : > { %v1901_v60 = vsub.f32 %v4797_v56, %v1900_v59 }
0x1952   : > { %v1902_v61 = vmul.f32 %v1901_v60, %v1901_v60 }
0x1954   : > { %v1903_v62 = vsel %vm395_vm2, %v1902_v61, 0.0 }
0x1955   : > { %1904 = vadd.xlane.f32.xlu1 %v1903_v62 }
0x19c8   : > { %v1905_v3 = vpop.xlane.xlu1 %1904 }
0x19c9   : > { %v1906_v4 = vmul.f32 %v1905_v3, %v4379_v15  ;;  %v2059_v3 = vperm.slane %v4897_v52, 0 }
0x19cb   : > { %v1907_v6 = vadd.f32 1e-05, %v1906_v4 }
0x19cd   : > { %4111 = vrsqrt.f32 %v1907_v6  ;;  %vm1914_vm6 = vweird.f32 %v1907_v6 }
0x19d3   : > { %v4112_v13 = vpop.eup %4111 }
0x19d4   : > { %v1909_v16 = vmul.f32 %v4112_v13, %v1907_v6  ;;  %vm1915_vm5 = vweird.f32 %v4112_v13 }
0x19d5   : > { %vm1916_vm8 = vmor %vm1914_vm6, %vm1915_vm5 }
0x19d6   : > { %v1910_v18 = vmul.f32 %v4112_v13, %v1909_v16 }
0x19d8   : > { %v1911_v20 = vmul.f32 0.5, %v1910_v18 }
0x19da   : > { %v1912_v23 = vsub.f32 1.5, %v1911_v20 }
0x19dc   : > { %v1913_v26 = vmul.f32 %v4112_v13, %v1912_v23 }
0x19de   : > { %v1917_v28 = vsel %vm1916_vm8, %v4112_v13, %v1913_v26 }
0x19df   : > { %v1918_v29 = vmul.f32 %v1917_v28, %v1901_v60 }
0x19e1   : > { %v1920_v31 = vmul.f32 %v1919_v27, %v1918_v29 }
0x19e3   : > { %v1922_v32 = vadd.f32 %v1921_v30, %v1920_v31 }
0x19e5   : > { %3820 = vmatmul.msk.f32.vlgmr.msrb.gmra.mxu0 %vm395_vm2, %v1922_v32 }
0x1a62   : > { %v1953_v35 = vpop.f32.mrf.mxu0 }
0x1a63   : > { %v1954_v36 = vadd.f32 %v4043_v22, %v1953_v35 }
0x1a65   : > { %v1956_v37 = vmax.f32 %v1954_v36, 0.0 }
0x1a67   : > { %1990 = vmatmul.f32.vlgmr.msra.gmra.mxu1 %v1956_v37 }
0x1ae4   : > { %v1991_v38 = vpop.f32.mrf.mxu1 }
0x1ae5   : > { %v1994_v39 = vadd.f32 %v1991_v38, %v4797_v56 }
0x1ae7   : > { %v4875_v40 = vadd.f32 %v4044_v25, %v1994_v39 }
0x1ae9   : > { %v2005_v41 = vsel %vm395_vm2, %v4875_v40, 0.0 }
0x1aea   : > { %2006 = vadd.xlane.f32.xlu0 %v2005_v41 }
0x1b5d   : > { %v2007_v42 = vpop.xlane.xlu0 %2006 }
0x1b5e   : > { %v2008_v43 = vmul.f32 %v2007_v42, %v4379_v15 }
0x1b60   : > { %v2009_v45 = vsub.f32 %v4875_v40, %v2008_v43 }
0x1b62   : > { %v2010_v46 = vmul.f32 %v2009_v45, %v2009_v45 }
0x1b64   : > { %v2011_v47 = vsel %vm395_vm2, %v2010_v46, 0.0 }
0x1b65   : > { %2012 = vadd.xlane.f32.xlu0 %v2011_v47 }
0x1b79   : > { %2064 = vrot.lane.b32.xlu0 %v2062_v53, %s5473_s27 }
0x1bd8   : > { %v2013_v54 = vpop.xlane.xlu0 %2012 }
0x1bd9   : > { %v2014_v56 = vmul.f32 %v2013_v54, %v4379_v15 }
0x1bdb   : > { %v2015_v57 = vadd.f32 1e-05, %v2014_v56 }
0x1bdd   : > { %4113 = vrsqrt.f32 %v2015_v57  ;;  %vm2022_vm10 = vweird.f32 %v2015_v57 }
0x1be3   : > { %v4114_v58 = vpop.eup %4113 }
0x1be4   : > { %v2017_v59 = vmul.f32 %v4114_v58, %v2015_v57  ;;  %vm2023_vm9 = vweird.f32 %v4114_v58 }
0x1be5   : > { %vm2024_vm11 = vmor %vm2022_vm10, %vm2023_vm9 }
0x1be6   : > { %v2018_v60 = vmul.f32 %v4114_v58, %v2017_v59 }
0x1be8   : > { %v2019_v61 = vmul.f32 0.5, %v2018_v60  ;;  %v3840_v60 = vld [vmem:[%s5417_s4 + $0x68] sm:$0xff] }
0x1bea   : > { %v2020_v62 = vsub.f32 1.5, %v2019_v61 }
0x1beb   : > { %v2065_v4 = vpop.permute.xlu0 %2064 }
0x1bec   : > { %v2021_v63 = vmul.f32 %v4114_v58, %v2020_v62 }
0x1bee   : > { %v2025_v0 = vsel %vm2024_vm11, %v4114_v58, %v2021_v63 }
0x1bef   : > { %v2026_v1 = vmul.f32 %v2025_v0, %v2009_v45 }
0x1bf1   : > { %v2028_v2 = vmul.f32 %v2027_v10, %v2026_v1  ;;  %v3839_v10 = vld [vmem:[%s5417_s4 + $0x60] sm:$0xff] }
0x1bf3   : > { %v2030_v55 = vadd.f32 %v2029_v7, %v2028_v2 }
0x1bf5   : > { %3847 = vmatmul.msk.f32.vlgmr.msrb.gmra.mxu3 %vm395_vm2, %v2030_v55 }
0x1c78   : > { %v2056_v5 = vpop.f32.mrf.mxu3 }
0x1c79   : > { %v2060_v6 = vadd.f32 %v2059_v3, %v2056_v5  ;;  %v2067_v8 = vadd.f32 %v2065_v4, %v2056_v5 }
0x1c7b   : > { %v2061_v9 = vmul.f32 0.35355338, %v2060_v6  ;;  %2142 = vrot.lane.b32.xlu2 %v2067_v8, %s5474_s29  ;;  %v3841_v6 = vld [vmem:[%s5417_s4 + $0x70] sm:$0xff] }
0x1c7d   : > { %2140 = vrot.lane.b32.xlu1 %v2061_v9, %s5476_s30 }
0x1c83   : > { %2070 = vrot.lane.b32.xlu2 %v2068_v11, %s5484_s13 }
0x1c85   : > { %2075 = vrot.lane.b32.xlu1 %v2067_v8, %s5477_s11 }
0x1cd5   : > { %v2143_v12 = vpop.permute.xlu2 %2142 }
0x1cd6   : > { %3851 = vmatpush.xpose.msk.msra.mxu3 %vm474_vm7, %v2143_v12 }
0x1cda   : > { %2246 = vmatpush.msrb.mxu3 %v3839_v10  ;;  %v3871_v10 = vld [vmem:[%s5419_s6 + $0x188] sm:$0xff] }
0x1cdd   : > { %v2071_v13 = vpop.permute.xlu2 %2070 }
0x1cde   : > { %v4912_v14 = vadd.f32 %v2071_v13, %v2056_v5 }
0x1ce0   : > { %2179 = vrot.lane.b32.xlu1 %v4912_v14, %s5475_s26 }
0x1ce8   : > { %2253 = vrot.lane.b32.xlu1 %v2067_v8, %s5478_s12 }
0x1cef   : > { %v2141_v16 = vpop.permute.xlu1 %2140 }
0x1cf0   : > { %3852 = vmatmul.msk.f32.vlgmr.msra.gmra.mxu3 %vm474_vm7, %v2141_v16  ;;  %2342 = vrot.lane.b32.xlu1 %v2067_v8, %s5479_s18  ;;  %v3842_v8 = vld [vmem:[%s5417_s4 + $0x78] sm:$0xff] }
0x1cf1   : > { %2334 = vmatpush.msra.mxu3 %v3841_v6  ;;  %2423 = vmatpush.msrb.mxu1 %v3842_v8 }
0x1cf7   : > { %v2076_v17 = vpop.permute.xlu1 %2075 }
0x1cf8   : > { %3848 = vmatpush.xpose.msk.msra.mxu2 %vm474_vm7, %v2076_v17  ;;  %2340 = vrot.lane.b32.xlu1 %v2061_v9, %s5480_s20 }
0x1cfb   : > { %3849 = vmatmul.msk.f32.vlgmr.msra.gmra.mxu2 %vm474_vm7, %v2061_v9 }
0x1d52   : > { %v2180_v18 = vpop.permute.xlu1 %2179 }
0x1d53   : > { %2200 = vmatpush.msrb.mxu2 %v2180_v18 }
0x1d5a   : > { %v2254_v19 = vpop.permute.xlu1 %2253 }
0x1d5b   : > { %3856 = vmatpush.xpose.msk.msra.mxu2 %vm474_vm7, %v2254_v19 }
0x1d62   : > { %v2343_v26 = vpop.permute.xlu1 %2342 }
0x1d6a   : > { %v2341_v29 = vpop.permute.xlu1 %2340 }
0x1d73   : > { %v2165_v20 = vpop.f32.mrf.mxu3 }
0x1d74   : > { %v2168_v21 = vsel %vm474_vm7, %v2165_v20, -inf }
0x1d75   : > { %2169 = vmax.xlane.f32.xlu0 %v2168_v21 }
0x1d7e   : > { %v2099_v23 = vpop.f32.mrf.mxu2 }
0x1d7f   : > { %v2102_v24 = vsel %vm474_vm7, %v2099_v23, -inf }
0x1d80   : > { %2103 = vmax.xlane.f32.xlu1 %v2102_v24 }
0x1d89   : > { %2251 = vrot.lane.b32.xlu0 %v2061_v9, %s5481_s21 }
0x1de8   : > { %v2170_v27 = vpop.xlane.xlu0 %2169 }
0x1de9   : > { %v2171_v28 = vsub.f32 %v2165_v20, %v2170_v27  ;;  %v2430_v20 = vperm.slane %v4897_v52, 3 }
0x1deb   : > { %v2172_v30 = vmul.f32 1.442695, %v2171_v28 }
0x1ded   : > { %4115 = vpow2.f32 %v2172_v30 }
0x1df3   : > { %v4116_v31 = vpop.eup %4115  ;;  %v2104_v32 = vpop.xlane.xlu1 %2103 }
0x1df4   : > { %v2105_v33 = vsub.f32 %v2099_v23, %v2104_v32  ;;  %v2174_v44 = vsel %vm474_vm7, %v4116_v31, 0.0  ;;  %v3865_v32 = vld [vmem:[%s5418_s5 + $0x68] sm:$0xff] }
0x1df5   : > { %2175 = vadd.xlane.f32.xlu2 %v2174_v44  ;;  %v3885_v44 = vld [vmem:[%s5419_s6 + $0x1f8] sm:$0xff] }
0x1df6   : > { %v2106_v34 = vmul.f32 1.442695, %v2105_v33  ;;  %v3864_v33 = vld [vmem:[%s5418_s5 + $0x60] sm:$0xff] }
0x1df8   : > { %4117 = vpow2.f32 %v2106_v34  ;;  %v3884_v34 = vld [vmem:[%s5419_s6 + $0x1f0] sm:$0xff] }
0x1dfb   : > { %v2252_v38 = vpop.permute.xlu0 %2251 }
0x1dfe   : > { %v4118_v22 = vpop.eup %4117 }
0x1dff   : > { %v2108_v35 = vsel %vm474_vm7, %v4118_v22, 0.0 }
0x1e00   : > { %2109 = vadd.xlane.f32.xlu2 %v2108_v35 }
0x1e68   : > { %v2176_v36 = vpop.xlane.xlu2 %2175 }
0x1e69   : > { %4119 = vrcp.f32 %v2176_v36 }
0x1e6f   : > { %v4120_v37 = vpop.eup %4119 }
0x1e70   : > { %v2178_v25 = vmul.f32 %v4120_v37, %v4116_v31  ;;  %v3867_v31 = vld [vmem:[%s5418_s5 + $0x78] sm:$0xff]  ;;  %v3882_v37 = vld [vmem:[%s5419_s6 + $0x1e0] sm:$0xff] }
0x1e72   : > { %3853 = vmatmul.msk.f32.vlgmr.msrb.gmra.mxu2 %vm474_vm7, %v2178_v25 }
0x1e73   : > { %3860 = vmatpush.xpose.msk.msrb.mxu2 %vm474_vm7, %v2343_v26  ;;  %v2110_v46 = vpop.xlane.xlu2 %2109 }
0x1e7a   : > { %3857 = vmatmul.msk.f32.vlgmr.msra.gmra.mxu2 %vm474_vm7, %v2252_v38  ;;  %v3881_v38 = vld [vmem:[%s5419_s6 + $0x1d8] sm:$0xff] }
0x1e7b   : > { %2509 = vmatpush.msra.mxu2 %v3885_v44 }
0x1e7d   : > { %2510 = vmatpush.msra.mxu2 %v3884_v34 }
0x1e82   : > { %3861 = vmatmul.msk.f32.vlgmr.msrb.gmra.mxu2 %vm474_vm7, %v2341_v29 }
0x1ef5   : > { %v2202_v39 = vpop.f32.mrf.mxu2 }
0x1efd   : > { %v2276_v41 = vpop.f32.mrf.mxu2 }
0x1efe   : > { %v2279_v42 = vsel %vm474_vm7, %v2276_v41, -inf }
0x1eff   : > { %2280 = vmax.xlane.f32.xlu0 %v2279_v42  ;;  %v3878_v42 = vld [vmem:[%s5419_s6 + $0x1c0] sm:$0xff] }
0x1f05   : > { %v2365_v43 = vpop.f32.mrf.mxu2 }
0x1f06   : > { %v2368_v45 = vsel %vm474_vm7, %v2365_v43, -inf }
0x1f07   : > { %2369 = vmax.xlane.f32.xlu2 %v2368_v45  ;;  %v3877_v45 = vld [vmem:[%s5419_s6 + $0x1b8] sm:$0xff] }
0x1f1f   : > { %2114 = vrot.lane.b32.xlu2 %v4912_v14, %s5484_s13 }
0x1f27   : > { %2290 = vrot.lane.b32.xlu2 %v4912_v14, %s5482_s28 }
0x1f72   : > { %v2281_v47 = vpop.xlane.xlu0 %2280 }
0x1f73   : > { %v2282_v48 = vsub.f32 %v2276_v41, %v2281_v47  ;;  %v3879_v41 = vld [vmem:[%s5419_s6 + $0x1c8] sm:$0xff]  ;;  %v3876_v47 = vld [vmem:[%s5419_s6 + $0x1b0] sm:$0xff] }
0x1f75   : > { %v2283_v49 = vmul.f32 1.442695, %v2282_v48 }
0x1f77   : > { %4121 = vpow2.f32 %v2283_v49  ;;  %v3875_v49 = vld [vmem:[%s5419_s6 + $0x1a8] sm:$0xff] }
0x1f78   : > { %4123 = vrcp.f32 %v2110_v46 }
0x1f7a   : > { %v2370_v50 = vpop.xlane.xlu2 %2369 }
0x1f7b   : > { %v2371_v51 = vsub.f32 %v2365_v43, %v2370_v50 }
0x1f7d   : > { %v4122_v53 = vpop.eup %4121  ;;  %v2372_v54 = vmul.f32 1.442695, %v2371_v51  ;;  %v3874_v51 = vld [vmem:[%s5419_s6 + $0x1a0] sm:$0xff] }
0x1f7e   : > { %v2285_v56 = vsel %vm474_vm7, %v4122_v53, 0.0  ;;  %v4124_v57 = vpop.eup %4123 }
0x1f7f   : > { %4125 = vpow2.f32 %v2372_v54  ;;  %2286 = vadd.xlane.f32.xlu1 %v2285_v56  ;;  %v2112_v58 = vmul.f32 %v4124_v57, %v4118_v22  ;;  %v3883_v22 = vld [vmem:[%s5419_s6 + $0x1e8] sm:$0xff]  ;;  %v3873_v54 = vld [vmem:[%s5419_s6 + $0x198] sm:$0xff]  ;;  %v2454_v57 = vperm.slane %v4897_v52, 6 }
0x1f80   : > { %2511 = vmatpush.msra.mxu2 %v3883_v22 }
0x1f82   : > { %v2115_v59 = vpop.permute.xlu2 %2114  ;;  %2512 = vmatpush.msra.mxu2 %v3882_v37 }
0x1f83   : > { %2135 = vmatpush.msra.mxu0 %v2115_v59 }
0x1f84   : > { %3850 = vmatmul.msk.f32.vlgmr.msra.gmra.mxu0 %vm474_vm7, %v2112_v58  ;;  %2513 = vmatpush.msra.mxu2 %v3881_v38 }
0x1f85   : > { %v4126_v61 = vpop.eup %4125  ;;  %2223 = vmatpush.msrb.mxu0 %v3840_v60  ;;  %v2456_v60 = vperm.slane %v4897_v52, 7  ;;  %v4045_v52 = vld [vmem:[%s5421_s8 + $0x3] ss:$0 sm:$0xff] }
0x1f86   : > { %v2374_v62 = vsel %vm474_vm7, %v4126_v61, 0.0 }
0x1f87   : > { %2375 = vadd.xlane.f32.xlu0 %v2374_v62 }
0x1f8a   : > { %v2291_v63 = vpop.permute.xlu2 %2290 }
0x1f8b   : > { %2311 = vmatpush.msra.mxu0 %v2291_v63  ;;  %v3872_v63 = vld [vmem:[%s5419_s6 + $0x190] sm:$0xff] }
0x1f8c   : > { %3854 = vmatmul.msk.f32.vlgmr.msrb.gmra.mxu0 %vm474_vm7, %v2202_v39  ;;  %v3880_v39 = vld [vmem:[%s5419_s6 + $0x1d0] sm:$0xff] }
0x1f8d   : > { %2514 = vmatpush.msra.mxu2 %v3880_v39 }
0x1f8f   : > { %2515 = vmatpush.msra.mxu2 %v3879_v41 }
0x1f91   : > { %2516 = vmatpush.msra.mxu2 %v3878_v42 }
0x1f93   : > { %2517 = vmatpush.msra.mxu2 %v3877_v45 }
0x1f95   : > { %2518 = vmatpush.msra.mxu2 %v3876_v47 }
0x1f97   : > { %2519 = vmatpush.msra.mxu2 %v3875_v49 }
0x1f98   : > { %2379 = vrot.lane.b32.xlu1 %v4912_v14, %s5483_s1 }
0x1f99   : > { %2520 = vmatpush.msra.mxu2 %v3874_v51 }
0x1f9b   : > { %2521 = vmatpush.msra.mxu2 %v3873_v54 }
0x1f9d   : > { %2522 = vmatpush.msra.mxu2 %v3872_v63 }
0x1f9f   : > { %2523 = vmatpush.msra.mxu2 %v3871_v10 }
0x1ff2   : > { %v2287_v0 = vpop.xlane.xlu1 %2286 }
0x1ff3   : > { %4127 = vrcp.f32 %v2287_v0  ;;  %v3870_v0 = vld [vmem:[%s5419_s6 + $0x180] sm:$0xff] }
0x1ff4   : > { %2524 = vmatpush.msra.mxu2 %v3870_v0 }
0x1ff9   : > { %v4128_v1 = vpop.eup %4127 }
0x1ffa   : > { %v2289_v7 = vmul.f32 %v4128_v1, %v4122_v53  ;;  %v2376_v2 = vpop.xlane.xlu0 %2375 }
0x1ffb   : > { %4129 = vrcp.f32 %v2376_v2 }
0x1ffc   : > { %3858 = vmatmul.msk.f32.vlgmr.msra.gmra.mxu0 %vm474_vm7, %v2289_v7 }
0x2001   : > { %v2137_v55 = vpop.f32.mrf.mxu0  ;;  %v4130_v3 = vpop.eup %4129 }
0x2002   : > { %3855 = vmatmul.msk.f32.vlgmr.msrb.gmra.mxu3 %vm474_vm7, %v2137_v55  ;;  %v2378_v4 = vmul.f32 %v4130_v3, %v4126_v61  ;;  %v4046_v55 = vld [vmem:[%s5420_s7 + $0x38] ss:$0 sm:$0xff] }
0x2003   : > { %2483 = vmatpush.msrb.mxu3 %v3867_v31 }
0x2009   : > { %v2225_v9 = vpop.f32.mrf.mxu0 }
0x200a   : > { %v2380_v5 = vpop.permute.xlu1 %2379 }
0x200b   : > { %2400 = vmatpush.msrb.mxu0 %v2380_v5 }
0x200c   : > { %3862 = vmatmul.msk.f32.vlgmr.msrb.gmra.mxu0 %vm474_vm7, %v2378_v4 }
0x2079   : > { %v2313_v11 = vpop.f32.mrf.mxu0 }
0x207a   : > { %3859 = vmatmul.msk.f32.vlgmr.msra.gmra.mxu3 %vm474_vm7, %v2313_v11 }
0x2085   : > { %v2248_v13 = vpop.f32.mrf.mxu3 }
0x2086   : > { %v2249_v16 = vadd.f32 %v2248_v13, %v2225_v9 }
0x2089   : > { %v2402_v12 = vpop.f32.mrf.mxu0 }
0x208a   : > { %3863 = vmatmul.msk.f32.vlgmr.msrb.gmra.mxu1 %vm474_vm7, %v2402_v12 }
0x20fd   : > { %v2336_v14 = vpop.f32.mrf.mxu3 }
0x20fe   : > { %v2339_v17 = vadd.f32 %v2336_v14, %v2249_v16  ;;  %v3895_v14 = vld [vmem:[%s5416_s3 + $0x98] sm:$0xff]  ;;  %v3894_v16 = vld [vmem:[%s5416_s3 + $0x90] sm:$0xff] }
0x20ff   : > { %2586 = vmatpush.msra.mxu0 %v3895_v14 }
0x2101   : > { %2587 = vmatpush.msra.mxu0 %v3894_v16 }
0x2107   : > { %v2425_v18 = vpop.f32.mrf.mxu1 }
0x2108   : > { %v2428_v19 = vadd.f32 %v2425_v18, %v2339_v17  ;;  %v3893_v17 = vld [vmem:[%s5416_s3 + $0x88] sm:$0xff]  ;;  %v3892_v18 = vld [vmem:[%s5416_s3 + $0x80] sm:$0xff] }
0x2109   : > { %2588 = vmatpush.msra.mxu0 %v3893_v17 }
0x210a   : > { %v2429_v21 = vadd.f32 %v2428_v19, %v4875_v40  ;;  %v3866_v40 = vld [vmem:[%s5418_s5 + $0x70] sm:$0xff]  ;;  %v5063_v19 = vld [vmem:[%s5420_s7 + $0x40] sm:$0xff] }
0x210b   : > { %2484 = vmatpush.msrb.mxu3 %v3866_v40  ;;  %2589 = vmatpush.msra.mxu0 %v3892_v18  ;;  %v2564_v34 = vperm.slane %v5063_v19, 5 }
0x210c   : > { %v4963_v23 = vadd.f32 %v2430_v20, %v2429_v21  ;;  %v2597_v20 = vperm.slane %v5063_v19, 1  ;;  %v2603_v21 = vperm.slane %v5063_v19, 2 }
0x210d   : > { %2485 = vmatpush.msrb.mxu3 %v3865_v32  ;;  %v2562_v32 = vperm.slane %v5063_v19, 4 }
0x210e   : > { %v2432_v24 = vsel %vm395_vm2, %v4963_v23, 0.0  ;;  %2599 = vrot.lane.b32.xlu1 %v2597_v20, %s5473_s27 }
0x210f   : > { %2433 = vadd.xlane.f32.xlu0 %v2432_v24  ;;  %2486 = vmatpush.msrb.mxu3 %v3864_v33 }
0x2180   : > { %v2600_v37 = vpop.permute.xlu1 %2599 }
0x2182   : > { %v2434_v26 = vpop.xlane.xlu0 %2433 }
0x2183   : > { %v2435_v27 = vmul.f32 %v2434_v26, %v4379_v15 }
0x2185   : > { %v2436_v28 = vsub.f32 %v4963_v23, %v2435_v27 }
0x2187   : > { %v2437_v29 = vmul.f32 %v2436_v28, %v2436_v28 }
0x2189   : > { %v2438_v30 = vsel %vm395_vm2, %v2437_v29, 0.0 }
0x218a   : > { %2439 = vadd.xlane.f32.xlu2 %v2438_v30 }
0x21a2   : > { %2605 = vrot.lane.b32.xlu2 %v2603_v21, %s5484_s13 }
0x21fd   : > { %v2440_v35 = vpop.xlane.xlu2 %2439 }
0x21fe   : > { %v2441_v36 = vmul.f32 %v2440_v35, %v4379_v15 }
0x2200   : > { %v2442_v25 = vadd.f32 1e-05, %v2441_v36  ;;  %v2594_v36 = vperm.slane %v5063_v19, 0 }
0x2202   : > { %4131 = vrsqrt.f32 %v2442_v25  ;;  %vm2449_vm13 = vweird.f32 %v2442_v25 }
0x2208   : > { %v4132_v43 = vpop.eup %4131 }
0x2209   : > { %v2444_v46 = vmul.f32 %v4132_v43, %v2442_v25  ;;  %vm2450_vm12 = vweird.f32 %v4132_v43  ;;  %v2606_v25 = vpop.permute.xlu2 %2605 }
0x220a   : > { %vm2451_vm14 = vmor %vm2449_vm13, %vm2450_vm12 }
0x220b   : > { %v2445_v48 = vmul.f32 %v4132_v43, %v2444_v46 }
0x220d   : > { %v2446_v50 = vmul.f32 0.5, %v2445_v48 }
0x220f   : > { %v2447_v53 = vsub.f32 1.5, %v2446_v50 }
0x2211   : > { %v2448_v56 = vmul.f32 %v4132_v43, %v2447_v53 }
0x2213   : > { %v2452_v58 = vsel %vm2451_vm14, %v4132_v43, %v2448_v56 }
0x2214   : > { %v2453_v59 = vmul.f32 %v2452_v58, %v2436_v28 }
0x2216   : > { %v2455_v61 = vmul.f32 %v2454_v57, %v2453_v59 }
0x2218   : > { %v2457_v62 = vadd.f32 %v2456_v60, %v2455_v61 }
0x221a   : > { %3869 = vmatmul.msk.f32.vlgmr.msrb.gmra.mxu3 %vm395_vm2, %v2457_v62 }
0x229d   : > { %v2488_v1 = vpop.f32.mrf.mxu3 }
0x229e   : > { %v2489_v7 = vadd.f32 %v4045_v52, %v2488_v1 }
0x22a0   : > { %v2491_v2 = vmax.f32 %v2489_v7, 0.0 }
0x22a2   : > { %2525 = vmatmul.f32.vlgmr.msra.gmra.mxu2 %v2491_v2 }
0x2325   : > { %v2526_v3 = vpop.f32.mrf.mxu2 }
0x2326   : > { %v2529_v4 = vadd.f32 %v2526_v3, %v4963_v23 }
0x2328   : > { %v5041_v5 = vadd.f32 %v4046_v55, %v2529_v4 }
0x232a   : > { %v2540_v6 = vsel %vm395_vm2, %v5041_v5, 0.0 }
0x232b   : > { %2541 = vadd.xlane.f32.xlu0 %v2540_v6 }
0x239e   : > { %v2542_v8 = vpop.xlane.xlu0 %2541 }
0x239f   : > { %v2543_v9 = vmul.f32 %v2542_v8, %v4379_v15 }
0x23a1   : > { %v2544_v11 = vsub.f32 %v5041_v5, %v2543_v9 }
0x23a3   : > { %v2545_v12 = vmul.f32 %v2544_v11, %v2544_v11 }
0x23a5   : > { %v2546_v13 = vsel %vm395_vm2, %v2545_v12, 0.0 }
0x23a6   : > { %2547 = vadd.xlane.f32.xlu0 %v2546_v13 }
0x2419   : > { %v2548_v23 = vpop.xlane.xlu0 %2547 }
0x241a   : > { %v2549_v24 = vmul.f32 %v2548_v23, %v4379_v15 }
0x241c   : > { %v2550_v26 = vadd.f32 1e-05, %v2549_v24 }
0x241e   : > { %4133 = vrsqrt.f32 %v2550_v26  ;;  %vm2557_vm0 = vweird.f32 %v2550_v26 }
0x2424   : > { %v4134_v27 = vpop.eup %4133 }
0x2425   : > { %v2552_v28 = vmul.f32 %v4134_v27, %v2550_v26  ;;  %vm2558_vm15 = vweird.f32 %v4134_v27 }
0x2426   : > { %vm2559_vm1 = vmor %vm2557_vm0, %vm2558_vm15 }
0x2427   : > { %v2553_v29 = vmul.f32 %v4134_v27, %v2552_v28 }
0x2429   : > { %v2554_v30 = vmul.f32 0.5, %v2553_v29 }
0x242b   : > { %v2555_v31 = vsub.f32 1.5, %v2554_v30  ;;  %v3889_v30 = vld [vmem:[%s5417_s4 + $0x88] sm:$0xff] }
0x242d   : > { %v2556_v40 = vmul.f32 %v4134_v27, %v2555_v31 }
0x242f   : > { %v2560_v33 = vsel %vm2559_vm1, %v4134_v27, %v2556_v40 }
0x2430   : > { %v2561_v44 = vmul.f32 %v2560_v33, %v2544_v11 }
0x2432   : > { %v2563_v22 = vmul.f32 %v2562_v32, %v2561_v44  ;;  %v3888_v32 = vld [vmem:[%s5417_s4 + $0x80] sm:$0xff] }
0x2434   : > { %v2565_v35 = vadd.f32 %v2564_v34, %v2563_v22 }
0x2436   : > { %3896 = vmatmul.msk.f32.vlgmr.msra.gmra.mxu0 %vm395_vm2, %v2565_v35 }
0x24b3   : > { %v2591_v38 = vpop.f32.mrf.mxu0 }
0x24b4   : > { %v2595_v39 = vadd.f32 %v2594_v36, %v2591_v38  ;;  %v2602_v41 = vadd.f32 %v2600_v37, %v2591_v38  ;;  %v5074_v42 = vadd.f32 %v2606_v25, %v2591_v38  ;;  %v3890_v25 = vld [vmem:[%s5417_s4 + $0x90] sm:$0xff]  ;;  %v3891_v38 = vld [vmem:[%s5417_s4 + $0x98] sm:$0xff] }
0x24b5   : > { %2958 = vmatpush.msrb.mxu2 %v3891_v38 }
0x24b6   : > { %v2596_v43 = vmul.f32 0.35355338, %v2595_v39  ;;  %2677 = vrot.lane.b32.xlu0 %v2602_v41, %s5474_s29  ;;  %2714 = vrot.lane.b32.xlu2 %v5074_v42, %s5475_s26 }
0x24b8   : > { %2675 = vrot.lane.b32.xlu1 %v2596_v43, %s5476_s30 }
0x24be   : > { %2610 = vrot.lane.b32.xlu0 %v2602_v41, %s5477_s11  ;;  %2788 = vrot.lane.b32.xlu2 %v2602_v41, %s5478_s12 }
0x24c6   : > { %2877 = vrot.lane.b32.xlu2 %v2602_v41, %s5479_s18 }
0x24ce   : > { %2875 = vrot.lane.b32.xlu2 %v2596_v43, %s5480_s20 }
0x2510   : > { %v2715_v46 = vpop.permute.xlu2 %2714 }
0x2518   : > { %v2789_v49 = vpop.permute.xlu2 %2788 }
0x2520   : > { %v2878_v52 = vpop.permute.xlu2 %2877 }
0x2528   : > { %v2678_v45 = vpop.permute.xlu0 %2677  ;;  %v2876_v3 = vpop.permute.xlu2 %2875 }
0x2529   : > { %3900 = vmatpush.xpose.msk.msrb.mxu0 %vm474_vm7, %v2678_v45 }
0x252a   : > { %v2676_v47 = vpop.permute.xlu1 %2675 }
0x252c   : > { %3901 = vmatmul.msk.f32.vlgmr.msrb.gmra.mxu0 %vm474_vm7, %v2676_v47 }
0x252d   : > { %2781 = vmatpush.msra.mxu0 %v3888_v32  ;;  %v3919_v32 = vld [vmem:[%s5419_s6 + $0x200] sm:$0xff] }
0x252f   : > { %2869 = vmatpush.msrb.mxu0 %v3890_v25 }
0x2530   : > { %v2611_v48 = vpop.permute.xlu0 %2610 }
0x2531   : > { %3897 = vmatpush.xpose.msk.msra.mxu1 %vm474_vm7, %v2611_v48 }
0x2534   : > { %3898 = vmatmul.msk.f32.vlgmr.msra.gmra.mxu1 %vm474_vm7, %v2596_v43 }
0x2535   : > { %2735 = vmatpush.msrb.mxu1 %v2715_v46 }
0x2537   : > { %3905 = vmatpush.xpose.msk.msra.mxu1 %vm474_vm7, %v2789_v49 }
0x25a9   : > { %v2700_v50 = vpop.f32.mrf.mxu0 }
0x25aa   : > { %v2703_v51 = vsel %vm474_vm7, %v2700_v50, -inf }
0x25ab   : > { %2704 = vmax.xlane.f32.xlu1 %v2703_v51 }
0x25b1   : > { %v2634_v59 = vpop.f32.mrf.mxu1 }
0x25b2   : > { %v2637_v60 = vsel %vm474_vm7, %v2634_v59, -inf }
0x25c4   : > { %2786 = vrot.lane.b32.xlu1 %v2596_v43, %s5481_s21 }
0x261e   : > { %v2705_v53 = vpop.xlane.xlu1 %2704 }
0x261f   : > { %v2706_v54 = vsub.f32 %v2700_v50, %v2705_v53  ;;  %v2965_v50 = vperm.slane %v5063_v19, 3 }
0x2621   : > { %v2707_v56 = vmul.f32 1.442695, %v2706_v54 }
0x2623   : > { %4135 = vpow2.f32 %v2707_v56 }
0x2629   : > { %v4136_v57 = vpop.eup %4135 }
0x262a   : > { %v2709_v58 = vsel %vm474_vm7, %v4136_v57, 0.0 }
0x262b   : > { %2710 = vadd.xlane.f32.xlu0 %v2709_v58 }
0x2633   : > { %2638 = vmax.xlane.f32.xlu0 %v2637_v60 }
0x2636   : > { %v2787_v7 = vpop.permute.xlu1 %2786 }
0x269e   : > { %v2711_v61 = vpop.xlane.xlu0 %2710 }
0x269f   : > { %4137 = vrcp.f32 %v2711_v61  ;;  %v3916_v61 = vld [vmem:[%s5418_s5 + $0x98] sm:$0xff] }
0x26a5   : > { %v4138_v62 = vpop.eup %4137 }
0x26a6   : > { %v2713_v63 = vmul.f32 %v4138_v62, %v4136_v57  ;;  %v2639_v10 = vpop.xlane.xlu0 %2638  ;;  %v3914_v62 = vld [vmem:[%s5418_s5 + $0x88] sm:$0xff] }
0x26a7   : > { %v2640_v0 = vsub.f32 %v2634_v59, %v2639_v10  ;;  %v3934_v10 = vld [vmem:[%s5419_s6 + $0x278] sm:$0xff] }
0x26a8   : > { %3902 = vmatmul.msk.f32.vlgmr.msrb.gmra.mxu1 %vm474_vm7, %v2713_v63  ;;  %v3913_v63 = vld [vmem:[%s5418_s5 + $0x80] sm:$0xff] }
0x26a9   : > { %v2641_v1 = vmul.f32 1.442695, %v2640_v0  ;;  %3909 = vmatpush.xpose.msk.msrb.mxu1 %vm474_vm7, %v2878_v52  ;;  %v3933_v0 = vld [vmem:[%s5419_s6 + $0x270] sm:$0xff]  ;;  %v3932_v52 = vld [vmem:[%s5419_s6 + $0x268] sm:$0xff] }
0x26ab   : > { %4139 = vpow2.f32 %v2641_v1 }
0x26b0   : > { %3906 = vmatmul.msk.f32.vlgmr.msra.gmra.mxu1 %vm474_vm7, %v2787_v7 }
0x26b1   : > { %v4140_v2 = vpop.eup %4139  ;;  %3044 = vmatpush.msra.mxu1 %v3934_v10 }
0x26b2   : > { %v2643_v55 = vsel %vm474_vm7, %v4140_v2, 0.0 }
0x26b3   : > { %2644 = vadd.xlane.f32.xlu1 %v2643_v55  ;;  %3045 = vmatpush.msra.mxu1 %v3933_v0 }
0x26b5   : > { %3046 = vmatpush.msra.mxu1 %v3932_v52 }
0x26b8   : > { %3910 = vmatmul.msk.f32.vlgmr.msrb.gmra.mxu1 %vm474_vm7, %v2876_v3  ;;  %v3930_v3 = vld [vmem:[%s5419_s6 + $0x258] sm:$0xff] }
0x26cc   : > { %2825 = vrot.lane.b32.xlu1 %v5074_v42, %s5482_s28 }
0x2725   : > { %v2737_v4 = vpop.f32.mrf.mxu1 }
0x2726   : > { %v2645_v23 = vpop.xlane.xlu1 %2644 }
0x272d   : > { %v2811_v6 = vpop.f32.mrf.mxu1 }
0x272e   : > { %v2814_v8 = vsel %vm474_vm7, %v2811_v6, -inf }
0x272f   : > { %2815 = vmax.xlane.f32.xlu2 %v2814_v8  ;;  %v3927_v8 = vld [vmem:[%s5419_s6 + $0x240] sm:$0xff] }
0x2735   : > { %v2900_v9 = vpop.f32.mrf.mxu1 }
0x2736   : > { %v2903_v11 = vsel %vm474_vm7, %v2900_v9, -inf }
0x2737   : > { %2904 = vmax.xlane.f32.xlu0 %v2903_v11  ;;  %v3926_v11 = vld [vmem:[%s5419_s6 + $0x238] sm:$0xff] }
0x273e   : > { %v2826_v31 = vpop.permute.xlu1 %2825 }
0x274b   : > { %2649 = vrot.lane.b32.xlu0 %v5074_v42, %s5484_s13 }
0x27a2   : > { %v2816_v12 = vpop.xlane.xlu2 %2815 }
0x27a3   : > { %v2817_v13 = vsub.f32 %v2811_v6, %v2816_v12  ;;  %v3928_v6 = vld [vmem:[%s5419_s6 + $0x248] sm:$0xff] }
0x27a5   : > { %v2818_v14 = vmul.f32 1.442695, %v2817_v13  ;;  %v3925_v13 = vld [vmem:[%s5419_s6 + $0x230] sm:$0xff] }
0x27a7   : > { %4141 = vpow2.f32 %v2818_v14 }
0x27aa   : > { %v2905_v16 = vpop.xlane.xlu0 %2904 }
0x27ab   : > { %v2906_v17 = vsub.f32 %v2900_v9, %v2905_v16  ;;  %v3924_v16 = vld [vmem:[%s5419_s6 + $0x228] sm:$0xff] }
0x27ad   : > { %v4142_v18 = vpop.eup %4141  ;;  %v2907_v20 = vmul.f32 1.442695, %v2906_v17 }
0x27ae   : > { %v2820_v21 = vsel %vm474_vm7, %v4142_v18, 0.0 }
0x27af   : > { %4143 = vpow2.f32 %v2907_v20  ;;  %2821 = vadd.xlane.f32.xlu0 %v2820_v21  ;;  %v3922_v21 = vld [vmem:[%s5419_s6 + $0x218] sm:$0xff] }
0x27b0   : > { %4145 = vrcp.f32 %v2645_v23 }
0x27b5   : > { %v4144_v24 = vpop.eup %4143 }
0x27b6   : > { %v2909_v26 = vsel %vm474_vm7, %v4144_v24, 0.0  ;;  %v4146_v27 = vpop.eup %4145 }
0x27b7   : > { %2910 = vadd.xlane.f32.xlu2 %v2909_v26  ;;  %v2647_v28 = vmul.f32 %v4146_v27, %v4140_v2  ;;  %v3931_v2 = vld [vmem:[%s5419_s6 + $0x260] sm:$0xff] }
0x27b8   : > { %3047 = vmatpush.msra.mxu1 %v3931_v2 }
0x27ba   : > { %3048 = vmatpush.msra.mxu1 %v3930_v3 }
0x27bd   : > { %v2650_v29 = vpop.permute.xlu0 %2649 }
0x27be   : > { %2670 = vmatpush.msra.mxu3 %v2650_v29 }
0x27bf   : > { %3899 = vmatmul.msk.f32.vlgmr.msra.gmra.mxu3 %vm474_vm7, %v2647_v28  ;;  %v2991_v28 = vperm.slane %v5063_v19, 7 }
0x27c0   : > { %2758 = vmatpush.msrb.mxu3 %v3889_v30 }
0x27c2   : > { %2846 = vmatpush.msra.mxu3 %v2826_v31  ;;  %v3921_v31 = vld [vmem:[%s5419_s6 + $0x210] sm:$0xff] }
0x27c7   : > { %3903 = vmatmul.msk.f32.vlgmr.msrb.gmra.mxu3 %vm474_vm7, %v2737_v4  ;;  %v3929_v4 = vld [vmem:[%s5419_s6 + $0x250] sm:$0xff] }
0x27c8   : > { %3049 = vmatpush.msra.mxu1 %v3929_v4 }
0x27ca   : > { %3050 = vmatpush.msra.mxu1 %v3928_v6 }
0x27cc   : > { %3051 = vmatpush.msra.mxu1 %v3927_v8 }
0x27ce   : > { %3052 = vmatpush.msra.mxu1 %v3926_v11 }
0x27cf   : > { %2914 = vrot.lane.b32.xlu2 %v5074_v42, %s5483_s1 }
0x27d0   : > { %3053 = vmatpush.msra.mxu1 %v3925_v13 }
0x27d2   : > { %3054 = vmatpush.msra.mxu1 %v3924_v16 }
0x2822   : > { %v2822_v40 = vpop.xlane.xlu0 %2821 }
0x2823   : > { %4147 = vrcp.f32 %v2822_v40  ;;  %v3920_v40 = vld [vmem:[%s5419_s6 + $0x208] sm:$0xff] }
0x2829   : > { %v4148_v33 = vpop.eup %4147 }
0x282a   : > { %v2824_v44 = vmul.f32 %v4148_v33, %v4142_v18  ;;  %v2911_v34 = vpop.xlane.xlu2 %2910  ;;  %v3923_v18 = vld [vmem:[%s5419_s6 + $0x220] sm:$0xff] }
0x282b   : > { %4149 = vrcp.f32 %v2911_v34  ;;  %3055 = vmatpush.msra.mxu1 %v3923_v18 }
0x282c   : > { %3907 = vmatmul.msk.f32.vlgmr.msra.gmra.mxu3 %vm474_vm7, %v2824_v44 }
0x282d   : > { %3056 = vmatpush.msra.mxu1 %v3922_v21 }
0x282f   : > { %3057 = vmatpush.msra.mxu1 %v3921_v31 }
0x2831   : > { %v4150_v22 = vpop.eup %4149  ;;  %3058 = vmatpush.msra.mxu1 %v3920_v40 }
0x2832   : > { %v2913_v35 = vmul.f32 %v4150_v22, %v4144_v24  ;;  %v2915_v36 = vpop.permute.xlu2 %2914  ;;  %v2989_v24 = vperm.slane %v5063_v19, 6  ;;  %v4047_v19 = vld [vmem:[%s5421_s8 + $0x4] ss:$0 sm:$0xff]  ;;  %v4048_v22 = vld [vmem:[%s5420_s7 + $0x48] ss:$0 sm:$0xff] }
0x2833   : > { %2935 = vmatpush.msrb.mxu3 %v2915_v36  ;;  %3059 = vmatpush.msra.mxu1 %v3919_v32 }
0x2834   : > { %3911 = vmatmul.msk.f32.vlgmr.msrb.gmra.mxu3 %vm474_vm7, %v2913_v35 }
0x2842   : > { %v2672_v37 = vpop.f32.mrf.mxu3 }
0x2843   : > { %3904 = vmatmul.msk.f32.vlgmr.msra.gmra.mxu0 %vm474_vm7, %v2672_v37 }
0x2844   : > { %3018 = vmatpush.msra.mxu0 %v3916_v61 }
0x284a   : > { %v2760_v39 = vpop.f32.mrf.mxu3 }
0x28af   : > { %v2848_v41 = vpop.f32.mrf.mxu3 }
0x28b0   : > { %3908 = vmatmul.msk.f32.vlgmr.msrb.gmra.mxu0 %vm474_vm7, %v2848_v41 }
0x28b7   : > { %v2937_v42 = vpop.f32.mrf.mxu3 }
0x28b8   : > { %3912 = vmatmul.msk.f32.vlgmr.msrb.gmra.mxu2 %vm474_vm7, %v2937_v42 }
0x28c0   : > { %v2783_v43 = vpop.f32.mrf.mxu0 }
0x28c1   : > { %v2784_v46 = vadd.f32 %v2783_v43, %v2760_v39 }
0x292d   : > { %v2871_v45 = vpop.f32.mrf.mxu0 }
0x292e   : > { %v2874_v47 = vadd.f32 %v2871_v45, %v2784_v46  ;;  %v3944_v45 = vld [vmem:[%s5416_s3 + $0xb8] sm:$0xff]  ;;  %v3943_v46 = vld [vmem:[%s5416_s3 + $0xb0] sm:$0xff] }
0x292f   : > { %3121 = vmatpush.msra.mxu3 %v3944_v45 }
0x2931   : > { %3122 = vmatpush.msra.mxu3 %v3943_v46 }
0x293b   : > { %v2960_v48 = vpop.f32.mrf.mxu2 }
0x293c   : > { %v2963_v49 = vadd.f32 %v2960_v48, %v2874_v47  ;;  %v3942_v47 = vld [vmem:[%s5416_s3 + $0xa8] sm:$0xff]  ;;  %v3941_v48 = vld [vmem:[%s5416_s3 + $0xa0] sm:$0xff] }
0x293d   : > { %3123 = vmatpush.msra.mxu3 %v3942_v47 }
0x293e   : > { %v2964_v51 = vadd.f32 %v2963_v49, %v5041_v5  ;;  %v3915_v5 = vld [vmem:[%s5418_s5 + $0x90] sm:$0xff] }
0x293f   : > { %3019 = vmatpush.msra.mxu0 %v3915_v5  ;;  %v5229_v49 = vld [vmem:[%s5420_s7 + $0x50] sm:$0xff]  ;;  %3124 = vmatpush.msra.mxu3 %v3941_v48 }
0x2940   : > { %v5129_v53 = vadd.f32 %v2965_v50, %v2964_v51  ;;  %v3132_v50 = vperm.slane %v5229_v49, 1  ;;  %v3097_v5 = vperm.slane %v5229_v49, 4  ;;  %v3099_v10 = vperm.slane %v5229_v49, 5 }
0x2941   : > { %3020 = vmatpush.msra.mxu0 %v3914_v62  ;;  %v3138_v6 = vperm.slane %v5229_v49, 2 }
0x2942   : > { %v2967_v54 = vsel %vm395_vm2, %v5129_v53, 0.0 }
0x2943   : > { %2968 = vadd.xlane.f32.xlu2 %v2967_v54  ;;  %3021 = vmatpush.msra.mxu0 %v3913_v63 }
0x29b6   : > { %v2969_v56 = vpop.xlane.xlu2 %2968 }
0x29b7   : > { %v2970_v57 = vmul.f32 %v2969_v56, %v4379_v15 }
0x29b9   : > { %v2971_v58 = vsub.f32 %v5129_v53, %v2970_v57 }
0x29bb   : > { %v2972_v59 = vmul.f32 %v2971_v58, %v2971_v58 }
0x29bd   : > { %v2973_v60 = vsel %vm395_vm2, %v2972_v59, 0.0 }
0x29be   : > { %2974 = vadd.xlane.f32.xlu1 %v2973_v60 }
0x2a31   : > { %v2975_v1 = vpop.xlane.xlu1 %2974 }
0x2a32   : > { %v2976_v7 = vmul.f32 %v2975_v1, %v4379_v15  ;;  %v3129_v1 = vperm.slane %v5229_v49, 0 }
0x2a34   : > { %v2977_v55 = vadd.f32 1e-05, %v2976_v7 }
0x2a36   : > { %4151 = vrsqrt.f32 %v2977_v55  ;;  %vm2984_vm4 = vweird.f32 %v2977_v55 }
0x2a3c   : > { %v4152_v9 = vpop.eup %4151 }
0x2a3d   : > { %v2979_v12 = vmul.f32 %v4152_v9, %v2977_v55  ;;  %vm2985_vm3 = vweird.f32 %v4152_v9 }
0x2a3e   : > { %vm2986_vm5 = vmor %vm2984_vm4, %vm2985_vm3 }
0x2a3f   : > { %v2980_v14 = vmul.f32 %v4152_v9, %v2979_v12 }
0x2a41   : > { %v2981_v17 = vmul.f32 0.5, %v2980_v14 }
0x2a43   : > { %v2982_v20 = vsub.f32 1.5, %v2981_v17 }
0x2a45   : > { %v2983_v23 = vmul.f32 %v4152_v9, %v2982_v20 }
0x2a47   : > { %v2987_v26 = vsel %vm2986_vm5, %v4152_v9, %v2983_v23 }
0x2a48   : > { %v2988_v27 = vmul.f32 %v2987_v26, %v2971_v58 }
0x2a4a   : > { %v2990_v29 = vmul.f32 %v2989_v24, %v2988_v27 }
0x2a4c   : > { %v2992_v30 = vadd.f32 %v2991_v28, %v2990_v29 }
0x2a4e   : > { %3918 = vmatmul.msk.f32.vlgmr.msra.gmra.mxu0 %vm395_vm2, %v2992_v30 }
0x2acb   : > { %v3023_v33 = vpop.f32.mrf.mxu0 }
0x2acc   : > { %v3024_v44 = vadd.f32 %v4047_v19, %v3023_v33 }
0x2ace   : > { %v3026_v34 = vmax.f32 %v3024_v44, 0.0 }
0x2ad0   : > { %3060 = vmatmul.f32.vlgmr.msra.gmra.mxu1 %v3026_v34 }
0x2b4d   : > { %v3061_v35 = vpop.f32.mrf.mxu1 }
0x2b4e   : > { %v3064_v36 = vadd.f32 %v3061_v35, %v5129_v53 }
0x2b50   : > { %v5207_v37 = vadd.f32 %v4048_v22, %v3064_v36 }
0x2b52   : > { %v3075_v25 = vsel %vm395_vm2, %v5207_v37, 0.0 }
0x2b53   : > { %3076 = vadd.xlane.f32.xlu0 %v3075_v25 }
0x2bc6   : > { %v3077_v38 = vpop.xlane.xlu0 %3076 }
0x2bc7   : > { %v3078_v39 = vmul.f32 %v3077_v38, %v4379_v15 }
0x2bc9   : > { %v3079_v41 = vsub.f32 %v5207_v37, %v3078_v39 }
0x2bcb   : > { %v3080_v42 = vmul.f32 %v3079_v41, %v3079_v41 }
0x2bcd   : > { %v3081_v43 = vsel %vm395_vm2, %v3080_v42, 0.0 }
0x2bce   : > { %3082 = vadd.xlane.f32.xlu0 %v3081_v43 }
0x2be2   : > { %3134 = vrot.lane.b32.xlu0 %v3132_v50, %s5473_s27  ;;  %s4197_s27 = scalar_lea.hbm %s5485_s25, 2 }
0x2be3   : > { %p4199_p1 = scmp.lt.s32.totalorder %s4197_s27, %s4193_s2 }
0x2be5   : > { %p4200_p2 = por %p4199_p1, %p4198_p0 }
0x2be7   : > { %p4201_p3 = pnand %p4200_p2, %p4196_p13 }
0x2c41   : > { %v3083_v51 = vpop.xlane.xlu0 %3082 }
0x2c42   : > { %v3084_v53 = vmul.f32 %v3083_v51, %v4379_v15 }
0x2c44   : > { %v3085_v54 = vadd.f32 1e-05, %v3084_v53 }
0x2c46   : > { %4153 = vrsqrt.f32 %v3085_v54  ;;  %vm3092_vm8 = vweird.f32 %v3085_v54 }
0x2c4c   : > { %v4154_v56 = vpop.eup %4153 }
0x2c4d   : > { %v3087_v57 = vmul.f32 %v4154_v56, %v3085_v54  ;;  %vm3093_vm6 = vweird.f32 %v4154_v56 }
0x2c4e   : > { %vm3094_vm9 = vmor %vm3092_vm8, %vm3093_vm6 }
0x2c4f   : > { %v3088_v58 = vmul.f32 %v4154_v56, %v3087_v57 }
0x2c51   : > { %v3089_v59 = vmul.f32 0.5, %v3088_v58 }
0x2c53   : > { %v3090_v60 = vsub.f32 1.5, %v3089_v59 }
0x2c54   : > { %v3135_v7 = vpop.permute.xlu0 %3134 }
0x2c55   : > { %v3091_v61 = vmul.f32 %v4154_v56, %v3090_v60  ;;  %v3938_v60 = vld [vmem:[%s5417_s4 + $0xa8] sm:$0xff] }
0x2c57   : > { %v3095_v62 = vsel %vm3094_vm9, %v4154_v56, %v3091_v61 }
0x2c58   : > { %v3096_v63 = vmul.f32 %v3095_v62, %v3079_v41  ;;  %v3937_v62 = vld [vmem:[%s5417_s4 + $0xa0] sm:$0xff] }
0x2c5a   : > { %v3098_v0 = vmul.f32 %v3097_v5, %v3096_v63 }
0x2c5c   : > { %v3100_v52 = vadd.f32 %v3099_v10, %v3098_v0 }
0x2c5e   : > { %3945 = vmatmul.msk.f32.vlgmr.msra.gmra.mxu3 %vm395_vm2, %v3100_v52 }
0x2ce1   : > { %v3126_v2 = vpop.f32.mrf.mxu3 }
0x2ce2   : > { %v3130_v55 = vadd.f32 %v3129_v1, %v3126_v2  ;;  %v3137_v3 = vadd.f32 %v3135_v7, %v3126_v2 }
0x2ce4   : > { %v3131_v4 = vmul.f32 0.35355338, %v3130_v55  ;;  %3212 = vrot.lane.b32.xlu0 %v3137_v3, %s5474_s29  ;;  %v3939_v55 = vld [vmem:[%s5417_s4 + $0xb0] sm:$0xff] }
0x2ce6   : > { %3210 = vrot.lane.b32.xlu2 %v3131_v4, %s5476_s30 }
0x2cec   : > { %3140 = vrot.lane.b32.xlu0 %v3138_v6, %s5484_s13 }
0x2d40   : > { %v3211_v9 = vpop.permute.xlu2 %3210 }
0x2d56   : > { %v3213_v8 = vpop.permute.xlu0 %3212 }
0x2d57   : > { %3949 = vmatpush.xpose.msk.msrb.mxu3 %vm474_vm7, %v3213_v8 }
0x2d5a   : > { %3950 = vmatmul.msk.f32.vlgmr.msrb.gmra.mxu3 %vm474_vm7, %v3211_v9 }
0x2d5b   : > { %3316 = vmatpush.msra.mxu3 %v3937_v62  ;;  %v3968_v62 = vld [vmem:[%s5419_s6 + $0x280] sm:$0xff] }
0x2d5d   : > { %3404 = vmatpush.msrb.mxu3 %v3939_v55 }
0x2d5e   : > { %v3141_v11 = vpop.permute.xlu0 %3140 }
0x2d5f   : > { %v5244_v12 = vadd.f32 %v3141_v11, %v3126_v2 }
0x2d61   : > { %3249 = vrot.lane.b32.xlu2 %v5244_v12, %s5475_s26 }
0x2d69   : > { %3323 = vrot.lane.b32.xlu2 %v3137_v3, %s5478_s12 }
0x2d71   : > { %3412 = vrot.lane.b32.xlu2 %v3137_v3, %s5479_s18 }
0x2dbb   : > { %v3250_v23 = vpop.permute.xlu2 %3249 }
0x2dc3   : > { %v3324_v26 = vpop.permute.xlu2 %3323 }
0x2dcb   : > { %v3413_v30 = vpop.permute.xlu2 %3412 }
0x2ddd   : > { %v3235_v13 = vpop.f32.mrf.mxu3 }
0x2dde   : > { %v3238_v14 = vsel %vm474_vm7, %v3235_v13, -inf }
0x2ddf   : > { %3239 = vmax.xlane.f32.xlu1 %v3238_v14 }
0x2df8   : > { %3145 = vrot.lane.b32.xlu1 %v3137_v3, %s5477_s11  ;;  %v3940_v3 = vld [vmem:[%s5417_s4 + $0xb8] sm:$0xff] }
0x2df9   : > { %3493 = vmatpush.msrb.mxu1 %v3940_v3 }
0x2e00   : > { %3321 = vrot.lane.b32.xlu1 %v3131_v4, %s5481_s21 }
0x2e08   : > { %3410 = vrot.lane.b32.xlu1 %v3131_v4, %s5480_s20 }
0x2e52   : > { %v3240_v16 = vpop.xlane.xlu1 %3239 }
0x2e53   : > { %v3241_v17 = vsub.f32 %v3235_v13, %v3240_v16 }
0x2e55   : > { %v3242_v18 = vmul.f32 1.442695, %v3241_v17  ;;  %v3500_v17 = vperm.slane %v5229_v49, 3 }
0x2e57   : > { %4155 = vpow2.f32 %v3242_v18 }
0x2e5d   : > { %v4156_v20 = vpop.eup %4155 }
0x2e5e   : > { %v3244_v21 = vsel %vm474_vm7, %v4156_v20, 0.0 }
0x2e5f   : > { %3245 = vadd.xlane.f32.xlu0 %v3244_v21 }
0x2e6a   : > { %v3146_v24 = vpop.permute.xlu1 %3145 }
0x2e6b   : > { %3946 = vmatpush.xpose.msk.msra.mxu2 %vm474_vm7, %v3146_v24 }
0x2e6e   : > { %3947 = vmatmul.msk.f32.vlgmr.msra.gmra.mxu2 %vm474_vm7, %v3131_v4 }
0x2e6f   : > { %3270 = vmatpush.msrb.mxu2 %v3250_v23 }
0x2e71   : > { %3954 = vmatpush.xpose.msk.msra.mxu2 %vm474_vm7, %v3324_v26 }
0x2e72   : > { %v3322_v31 = vpop.permute.xlu1 %3321 }
0x2e7a   : > { %v3411_v40 = vpop.permute.xlu1 %3410 }
0x2ed2   : > { %v3246_v27 = vpop.xlane.xlu0 %3245 }
0x2ed3   : > { %4157 = vrcp.f32 %v3246_v27 }
0x2ed9   : > { %v4158_v28 = vpop.eup %4157 }
0x2eda   : > { %v3248_v29 = vmul.f32 %v4158_v28, %v4156_v20 }
0x2edc   : > { %3951 = vmatmul.msk.f32.vlgmr.msrb.gmra.mxu2 %vm474_vm7, %v3248_v29  ;;  %v3965_v29 = vld [vmem:[%s5418_s5 + $0xb8] sm:$0xff] }
0x2edd   : > { %3958 = vmatpush.xpose.msk.msrb.mxu2 %vm474_vm7, %v3413_v30  ;;  %v3963_v30 = vld [vmem:[%s5418_s5 + $0xa8] sm:$0xff] }
0x2ee4   : > { %3955 = vmatmul.msk.f32.vlgmr.msra.gmra.mxu2 %vm474_vm7, %v3322_v31  ;;  %v3962_v31 = vld [vmem:[%s5418_s5 + $0xa0] sm:$0xff] }
0x2eec   : > { %3959 = vmatmul.msk.f32.vlgmr.msrb.gmra.mxu2 %vm474_vm7, %v3411_v40  ;;  %v3983_v40 = vld [vmem:[%s5419_s6 + $0x2f8] sm:$0xff] }
0x2eed   : > { %3579 = vmatpush.msra.mxu2 %v3983_v40 }
0x2ef1   : > { %v3169_v32 = vpop.f32.mrf.mxu2 }
0x2ef2   : > { %v3172_v19 = vsel %vm474_vm7, %v3169_v32, -inf }
0x2ef3   : > { %3173 = vmax.xlane.f32.xlu2 %v3172_v19  ;;  %v3981_v19 = vld [vmem:[%s5419_s6 + $0x2e8] sm:$0xff] }
0x2f5f   : > { %v3272_v33 = vpop.f32.mrf.mxu2 }
0x2f66   : > { %v3174_v44 = vpop.xlane.xlu2 %3173 }
0x2f67   : > { %v3175_v34 = vsub.f32 %v3169_v32, %v3174_v44  ;;  %v3346_v22 = vpop.f32.mrf.mxu2  ;;  %v3982_v32 = vld [vmem:[%s5419_s6 + $0x2f0] sm:$0xff] }
0x2f68   : > { %v3349_v35 = vsel %vm474_vm7, %v3346_v22, -inf  ;;  %3580 = vmatpush.msra.mxu2 %v3982_v32 }
0x2f69   : > { %v3176_v36 = vmul.f32 1.442695, %v3175_v34  ;;  %3350 = vmax.xlane.f32.xlu1 %v3349_v35  ;;  %v3980_v34 = vld [vmem:[%s5419_s6 + $0x2e0] sm:$0xff]  ;;  %v3979_v35 = vld [vmem:[%s5419_s6 + $0x2d8] sm:$0xff] }
0x2f6a   : > { %3581 = vmatpush.msra.mxu2 %v3981_v19 }
0x2f6b   : > { %4159 = vpow2.f32 %v3176_v36  ;;  %v3978_v36 = vld [vmem:[%s5419_s6 + $0x2d0] sm:$0xff] }
0x2f6c   : > { %3582 = vmatpush.msra.mxu2 %v3980_v34 }
0x2f6e   : > { %3583 = vmatpush.msra.mxu2 %v3979_v35 }
0x2f6f   : > { %v3435_v39 = vpop.f32.mrf.mxu2 }
0x2f70   : > { %v3438_v41 = vsel %vm474_vm7, %v3435_v39, -inf  ;;  %3584 = vmatpush.msra.mxu2 %v3978_v36 }
0x2f71   : > { %v4160_v25 = vpop.eup %4159 }
0x2f72   : > { %v3178_v38 = vsel %vm474_vm7, %v4160_v25, 0.0 }
0x2f73   : > { %3179 = vadd.xlane.f32.xlu0 %v3178_v38  ;;  %v3976_v38 = vld [vmem:[%s5419_s6 + $0x2c0] sm:$0xff] }
0x2f7b   : > { %3439 = vmax.xlane.f32.xlu0 %v3438_v41  ;;  %v3975_v41 = vld [vmem:[%s5419_s6 + $0x2b8] sm:$0xff] }
0x2f82   : > { %3360 = vrot.lane.b32.xlu1 %v5244_v12, %s5482_s28 }
0x2f8f   : > { %3184 = vrot.lane.b32.xlu0 %v5244_v12, %s5484_s13 }
0x2fdc   : > { %v3351_v42 = vpop.xlane.xlu1 %3350 }
0x2fdd   : > { %v3352_v43 = vsub.f32 %v3346_v22, %v3351_v42 }
0x2fdf   : > { %v3353_v45 = vmul.f32 1.442695, %v3352_v43  ;;  %v3974_v43 = vld [vmem:[%s5419_s6 + $0x2b0] sm:$0xff] }
0x2fe1   : > { %4161 = vpow2.f32 %v3353_v45 }
0x2fe6   : > { %v3180_v46 = vpop.xlane.xlu0 %3179 }
0x2fe7   : > { %v4162_v47 = vpop.eup %4161 }
0x2fe8   : > { %v3355_v48 = vsel %vm474_vm7, %v4162_v47, 0.0 }
0x2fe9   : > { %3356 = vadd.xlane.f32.xlu2 %v3355_v48  ;;  %v3972_v48 = vld [vmem:[%s5419_s6 + $0x2a0] sm:$0xff] }
0x2fee   : > { %v3440_v50 = vpop.xlane.xlu0 %3439 }
0x2fef   : > { %v3441_v51 = vsub.f32 %v3435_v39, %v3440_v50 }
0x2ff1   : > { %v3442_v53 = vmul.f32 1.442695, %v3441_v51  ;;  %v3971_v51 = vld [vmem:[%s5419_s6 + $0x298] sm:$0xff] }
0x2ff3   : > { %4163 = vpow2.f32 %v3442_v53 }
0x2ff4   : > { %4165 = vrcp.f32 %v3180_v46  ;;  %v3361_v61 = vpop.permute.xlu1 %3360  ;;  %v3973_v46 = vld [vmem:[%s5419_s6 + $0x2a8] sm:$0xff] }
0x2ff9   : > { %v4164_v54 = vpop.eup %4163 }
0x2ffa   : > { %v3444_v56 = vsel %vm474_vm7, %v4164_v54, 0.0  ;;  %v4166_v57 = vpop.eup %4165 }
0x2ffb   : > { %3445 = vadd.xlane.f32.xlu0 %v3444_v56  ;;  %v3182_v58 = vmul.f32 %v4166_v57, %v4160_v25  ;;  %v3977_v25 = vld [vmem:[%s5419_s6 + $0x2c8] sm:$0xff]  ;;  %v3526_v57 = vperm.slane %v5229_v49, 7 }
0x2ffc   : > { %3585 = vmatpush.msra.mxu2 %v3977_v25 }
0x2ffe   : > { %3586 = vmatpush.msra.mxu2 %v3976_v38 }
0x3000   : > { %3587 = vmatpush.msra.mxu2 %v3975_v41 }
0x3001   : > { %3449 = vrot.lane.b32.xlu2 %v5244_v12, %s5483_s1  ;;  %v3185_v59 = vpop.permute.xlu0 %3184  ;;  %s348_s1 = sand.u32 1, %s4231_s14  }
0x3002   : > { %3205 = vmatpush.msrb.mxu0 %v3185_v59  ;;  %3588 = vmatpush.msra.mxu2 %v3974_v43  ;;  %s349_s16 = scalar_lea.vmem [#allocation2], %s348_s1  ;;  %s3647_s24 = scalar_lea.sflag [#allocation3], %s348_s1 }
0x3003   : > { %3948 = vmatmul.msk.f32.vlgmr.msrb.gmra.mxu0 %vm474_vm7, %v3182_v58  ;;  %s3657_s19 = sshll.u32 %s349_s16, 4  ;;  %s3658_s19 = int_to_ptr.vmem [resolvable:$true] %s3657_s19 }
0x3004   : > { %3293 = vmatpush.msra.mxu0 %v3938_v60  ;;  %3589 = vmatpush.msra.mxu2 %v3973_v46 }
0x3006   : > { %3381 = vmatpush.msrb.mxu0 %v3361_v61  ;;  %3590 = vmatpush.msra.mxu2 %v3972_v48  ;;  %v3970_v61 = vld [vmem:[%s5419_s6 + $0x290] sm:$0xff] }
0x3008   : > { %3591 = vmatpush.msra.mxu2 %v3971_v51 }
0x300a   : > { %3592 = vmatpush.msra.mxu2 %v3970_v61 }
0x300b   : > { %3952 = vmatmul.msk.f32.vlgmr.msra.gmra.mxu0 %vm474_vm7, %v3272_v33 }
0x305c   : > { %v3357_v5 = vpop.xlane.xlu2 %3356 }
0x305d   : > { %4167 = vrcp.f32 %v3357_v5  ;;  %v3969_v5 = vld [vmem:[%s5419_s6 + $0x288] sm:$0xff] }
0x305e   : > { %3593 = vmatpush.msra.mxu2 %v3969_v5 }
0x3060   : > { %3594 = vmatpush.msra.mxu2 %v3968_v62 }
0x3063   : > { %v4168_v63 = vpop.eup %4167 }
0x3064   : > { %v3359_v10 = vmul.f32 %v4168_v63, %v4162_v47  ;;  %v3450_v0 = vpop.permute.xlu2 %3449 }
0x3065   : > { %3470 = vmatpush.msra.mxu0 %v3450_v0 }
0x3066   : > { %3956 = vmatmul.msk.f32.vlgmr.msrb.gmra.mxu0 %vm474_vm7, %v3359_v10 }
0x306e   : > { %v3446_v52 = vpop.xlane.xlu0 %3445 }
0x306f   : > { %4169 = vrcp.f32 %v3446_v52  ;;  %v4050_v52 = vld [vmem:[%s5420_s7 + $0x58] ss:$0 sm:$0xff] }
0x3075   : > { %v4170_v1 = vpop.eup %4169 }
0x3076   : > { %v3448_v7 = vmul.f32 %v4170_v1, %v4164_v54  ;;  %v3524_v54 = vperm.slane %v5229_v49, 6  ;;  %v4049_v49 = vld [vmem:[%s5421_s8 + $0x5] ss:$0 sm:$0xff] }
0x3078   : > { %3960 = vmatmul.msk.f32.vlgmr.msra.gmra.mxu0 %vm474_vm7, %v3448_v7 }
0x3080   : > { %v3207_v2 = vpop.f32.mrf.mxu0 }
0x3081   : > { %3953 = vmatmul.msk.f32.vlgmr.msra.gmra.mxu3 %vm474_vm7, %v3207_v2 }
0x3082   : > { %3553 = vmatpush.msra.mxu3 %v3965_v29 }
0x3088   : > { %v3295_v4 = vpop.f32.mrf.mxu0 }
0x30e3   : > { %v3383_v6 = vpop.f32.mrf.mxu0 }
0x30e4   : > { %3957 = vmatmul.msk.f32.vlgmr.msrb.gmra.mxu3 %vm474_vm7, %v3383_v6 }
0x30f5   : > { %v3472_v8 = vpop.f32.mrf.mxu0 }
0x30f6   : > { %3961 = vmatmul.msk.f32.vlgmr.msrb.gmra.mxu1 %vm474_vm7, %v3472_v8 }
0x3104   : > { %v3318_v9 = vpop.f32.mrf.mxu3 }
0x3105   : > { %v3319_v12 = vadd.f32 %v3318_v9, %v3295_v4 }
0x3167   : > { %v3406_v11 = vpop.f32.mrf.mxu3 }
0x3168   : > { %v3409_v13 = vadd.f32 %v3406_v11, %v3319_v12 }
0x3173   : > { %v3495_v14 = vpop.f32.mrf.mxu1 }
0x3174   : > { %v3498_v16 = vadd.f32 %v3495_v14, %v3409_v13 }
0x3176   : > { %v3499_v18 = vadd.f32 %v3498_v16, %v5207_v37  ;;  %v3964_v37 = vld [vmem:[%s5418_s5 + $0xb0] sm:$0xff] }
0x3177   : > { %3554 = vmatpush.msra.mxu3 %v3964_v37 }
0x3178   : > { %v5295_v20 = vadd.f32 %v3500_v17, %v3499_v18  ;;  %v4254_v18 = vmov 8.0  }
0x3179   : > { %3555 = vmatpush.msra.mxu3 %v3963_v30 }
0x317a   : > { %v3502_v21 = vsel %vm395_vm2, %v5295_v20, 0.0 }
0x317b   : > { %3503 = vadd.xlane.f32.xlu1 %v3502_v21  ;;  %3556 = vmatpush.msra.mxu3 %v3962_v31  ;;  %v3602_v21 = vld [vmem:[%s5422_s9] sm:$0x3] }
0x31ee   : > { %v3504_v23 = vpop.xlane.xlu1 %3503 }
0x31ef   : > { %v3505_v24 = vmul.f32 %v3504_v23, %v4379_v15 }
0x31f1   : > { %v3506_v26 = vsub.f32 %v5295_v20, %v3505_v24 }
0x31f3   : > { %v3507_v27 = vmul.f32 %v3506_v26, %v3506_v26 }
0x31f5   : > { %v3508_v28 = vsel %vm395_vm2, %v3507_v27, 0.0  ;;  %v3625_v27 = vperm.slane %v3602_v21, 0 }
0x31f6   : > { %3509 = vadd.xlane.f32.xlu2 %v3508_v28  ;;  %v3627_v28 = vperm.slane %v3602_v21, 1 }
0x3269   : > { %v3510_v33 = vpop.xlane.xlu2 %3509 }
0x326a   : > { %v3511_v44 = vmul.f32 %v3510_v33, %v4379_v15 }
0x326c   : > { %v3512_v22 = vadd.f32 1e-05, %v3511_v44 }
0x326e   : > { %4171 = vrsqrt.f32 %v3512_v22  ;;  %vm3519_vm10 = vweird.f32 %v3512_v22 }
0x3274   : > { %v4172_v39 = vpop.eup %4171 }
0x3275   : > { %v3514_v42 = vmul.f32 %v4172_v39, %v3512_v22  ;;  %vm3520_vm7 = vweird.f32 %v4172_v39 }
0x3276   : > { %vm3521_vm11 = vmor %vm3519_vm10, %vm3520_vm7 }
0x3277   : > { %v3515_v45 = vmul.f32 %v4172_v39, %v3514_v42 }
0x3279   : > { %v3516_v47 = vmul.f32 0.5, %v3515_v45 }
0x327b   : > { %v3517_v50 = vsub.f32 1.5, %v3516_v47 }
0x327d   : > { %v3518_v53 = vmul.f32 %v4172_v39, %v3517_v50 }
0x327f   : > { %v3522_v56 = vsel %vm3521_vm11, %v4172_v39, %v3518_v53 }
0x3280   : > { %v3523_v58 = vmul.f32 %v3522_v56, %v3506_v26 }
0x3282   : > { %v3525_v59 = vmul.f32 %v3524_v54, %v3523_v58 }
0x3284   : > { %v3527_v60 = vadd.f32 %v3526_v57, %v3525_v59 }
0x3286   : > { %3967 = vmatmul.msk.f32.vlgmr.msra.gmra.mxu3 %vm395_vm2, %v3527_v60 }
0x3309   : > { %v3558_v63 = vpop.f32.mrf.mxu3 }
0x330a   : > { %v3559_v10 = vadd.f32 %v4049_v49, %v3558_v63 }
0x330c   : > { %v3561_v0 = vmax.f32 %v3559_v10, 0.0 }
0x330e   : > { %3595 = vmatmul.f32.vlgmr.msra.gmra.mxu2 %v3561_v0 }
0x3391   : > { %v3596_v1 = vpop.f32.mrf.mxu2 }
0x3392   : > { %v3599_v7 = vadd.f32 %v3596_v1, %v5295_v20 }
0x3394   : > { %v3601_v2 = vadd.f32 %v4050_v52, %v3599_v7 }
0x3396   : > { %v3603_v55 = vsel %vm395_vm2, %v3601_v2, 0.0 }
0x3397   : > { %3604 = vadd.xlane.f32.xlu0 %v3603_v55 }
0x340a   : > { %v3605_v3 = vpop.xlane.xlu0 %3604 }
0x340b   : > { %v3606_v4 = vmul.f32 %v3605_v3, %v4379_v15 }
0x340d   : > { %v3607_v6 = vsub.f32 %v3601_v2, %v3606_v4 }
0x340f   : > { %v3608_v8 = vmul.f32 %v3607_v6, %v3607_v6 }
0x3411   : > { %v3609_v9 = vsel %vm395_vm2, %v3608_v8, 0.0 }
0x3412   : > { %3610 = vadd.xlane.f32.xlu0 %v3609_v9 }
0x3485   : > { %v3611_v11 = vpop.xlane.xlu0 %3610 }
0x3486   : > { %v3612_v12 = vmul.f32 %v3611_v11, %v4379_v15 }
0x3488   : > { %v3613_v13 = vadd.f32 1e-05, %v3612_v12 }
0x348a   : > { %4173 = vrsqrt.f32 %v3613_v13  ;;  %vm3620_vm13 = vweird.f32 %v3613_v13 }
0x348b   : > { %4175 = vrcp.f32 %v4254_v18 }
0x3490   : > { %v4174_v14 = vpop.eup %4173 }
0x3491   : > { %v3615_v16 = vmul.f32 %v4174_v14, %v3613_v13  ;;  %vm3621_vm12 = vweird.f32 %v4174_v14  ;;  %v4176_v24 = vpop.eup %4175 }
0x3492   : > { %vm3622_vm14 = vmor %vm3620_vm13, %vm3621_vm12  ;;  %v3637_v37 = vmul.f32 8.0, %v4176_v24  ;;  %vm3641_vm15 = vweird.f32 %v4176_v24 }
0x3493   : > { %v3616_v17 = vmul.f32 %v4174_v14, %v3615_v16 }
0x3494   : > { %v3638_v40 = vsub.f32 1.0, %v3637_v37 }
0x3495   : > { %v3617_v20 = vmul.f32 0.5, %v3616_v17 }
0x3496   : > { %v3639_v33 = vmul.f32 %v4176_v24, %v3638_v40 }
0x3497   : > { %v3618_v23 = vsub.f32 1.5, %v3617_v20 }
0x3498   : > { %v3640_v22 = vadd.f32 %v4176_v24, %v3639_v33 }
0x3499   : > { %v3619_v26 = vmul.f32 %v4174_v14, %v3618_v23 }
0x349a   : > { %v3642_v25 = vsel %vm3641_vm15, %v4176_v24, %v3640_v22 }
0x349b   : > { %v3623_v15 = vsel %vm3622_vm14, %v4174_v14, %v3619_v26 }
0x349c   : > { %v3624_v29 = vmul.f32 %v3623_v15, %v3607_v6 }
0x349e   : > { %v3626_v30 = vmul.f32 %v3625_v27, %v3624_v29 }
0x34a0   : > { %v3628_v31 = vadd.f32 %v3627_v28, %v3626_v30 }
0x34a2   : > { %v3629_v32 = vsel %vm395_vm2, %v3628_v31, 0.0  ;;  %vm3644_vm2 = vcmask 253952  }
0x34a3   : > { %v3630_v19 = vrot.slane %v3629_v32, 4 }
0x34a5   : > { %v3631_v44 = vadd.f32 %v3630_v19, %v3629_v32 }
0x34a7   : > { %v3632_v34 = vrot.slane %v3631_v44, 2 }
0x34a9   : > { %v3633_v35 = vadd.f32 %v3632_v34, %v3631_v44 }
0x34ab   : > { %v3634_v36 = vrot.slane %v3633_v35, 1 }
0x34ad   : > { %v3635_v38 = vadd.f32 %v3634_v36, %v3633_v35 }
0x34af   : > { %v3643_v39 = vmul.f32 %v3642_v25, %v3635_v38 }
0x34b1   : > { %3645 = vst.msk [vmem:[%s349_s16] sm:$0x1] %vm3644_vm2, %v3643_v39 }
0x34b2   : > { %4204 = shalt.err (!%p4201_p3)
}
0x34b3   : > { %3986 = dma.vmem_to_hbm [thread:$0]  (%p4348_p5), %s3658_s19, 16, %s3660_s23, %s3647_s24  }
0x34b4 PF: > { %s5487_s30 = sld [smem:[#allocation7_spill]] }
0x34b5   : > { %s5488_s11 = sld [smem:[#allocation5_spill]] }
0x34ba   : > { %p3992_p4 = scmp.ge.s32.totalorder %s5487_s30, 2 }
0x34bb   : > { %s3671_s18 = sand.u32 1, %s5488_s11  }
0x34bc   : > { %p3989_p7 = pnand %p3992_p4, %p4352_p6  ;;  %s3672_s20 = scalar_lea.sflag [#allocation3], %s3671_s18 }
0x34be   : > { %p3990_p8 = pneg %p3989_p7 }
0x34c0   : > { %4222 = dma.done.wait (%p3990_p8), %s3672_s20, 16  }
0x34c1   : > { %4224 = vsyncadd (%p3990_p8), %s3672_s20, 4294967280  ;;  %s5490_s16 = sld [smem:[#allocation8_spill]]  ;;  %s5493_s13 = smov %s4231_s14 }
0x34c2   : > { %s5491_s21 = sld [smem:[#allocation6_spill]] }
0x34c3   : > { %s5492_s15 = sld [smem:[#allocation9_spill]] }
0x34c7   : > { %p20_p9 = scmp.ge.s32.totalorder %s5490_s16, 4  }
0x34c8   : > { %s5494_s14 = smov %s5491_s21 }
0x34c9   :  { %22 = sbr.rel (!%p20_p9) target bundleno = 8 (0x8), region = 125 }
0x34ce   :  { %3677 = vsyncpa [#allocation3], 1 }
0x34cf   :  { %3679 = vsyncpa [#allocation3 + $0x1], 1 }

</bundles_post_ra>
